<compile_context>
chip_gen: v6e
topology: v6e:2x2x1
jax: 0.10.0
libtpu: 0.0.40
codegen_flags: <defaults>
</compile_context>

<pallas_src>
import functools
import math

import jax
import jax.numpy as jnp
from jax import lax
from jax.experimental import pallas as pl
from jax.experimental.pallas import tpu as pltpu


# ---------------------------------------------------------------------------
# Kernel helpers
# ---------------------------------------------------------------------------

def _mm(a, b):
    return jnp.dot(a, b, preferred_element_type=jnp.float32)


def _layernorm(h, g, b, eps):
    # two-pass variance (matches PyTorch LayerNorm numerics more closely)
    mean = jnp.mean(h, axis=-1, keepdims=True)
    c = h - mean
    var = jnp.mean(c * c, axis=-1, keepdims=True)
    return c * lax.rsqrt(var + eps) * g + b


# ---------------------------------------------------------------------------
# Fused forward kernel, grid over transformer layers
# ---------------------------------------------------------------------------

def _tfmodel_kernel(
        # resident inputs (block index constant across the layer grid)
        src_ref, enc_w1_ref, enc_b1_ref, enc_w2_ref, enc_b2pe_ref,
        head_w1_ref, head_b1_ref, head_w2_ref, head_b2_ref,
        lin2_w_ref, lin2_b_ref, flat_T_ref, flat_mask_ref, seg_ref,
        attn_bias_ref,
        # per-layer streamed inputs (leading nlayers axis)
        w_qkv_ref, b_qkv_ref, w_out_ref, vecs_ref, b1f_ref, w1f_ref, w2f_ref,
        # output + persistent scratch
        out_ref, x_scr,
        *, nhead, nlayers, eps):
    l = pl.program_id(0)

    # ---- layer-0 prologue: encoder MLP + positional encoding --------------
    @pl.when(l == 0)
    def _():
        h0 = jnp.maximum(_mm(src_ref[...], enc_w1_ref[...]) + enc_b1_ref[...],
                         0.0)
        x_scr[...] = _mm(h0, enc_w2_ref[...]) + enc_b2pe_ref[...]

    x = x_scr[...]                                      # (B*S, D) f32

    # ---- multi-head self attention (lane-aligned per-head weights) --------
    # vecs rows: 0=b_out 1=ln1_g 2=ln1_b 3=b2(ffn) 4=ln2_g 5=ln2_b
    attn = vecs_ref[0, 0:1]                             # start from out-proj bias
    for h in range(nhead):
        q = _mm(x, w_qkv_ref[0, h]) + b_qkv_ref[0, h]               # scale folded
        k = _mm(x, w_qkv_ref[0, nhead + h]) + b_qkv_ref[0, nhead + h]
        v = _mm(x, w_qkv_ref[0, 2 * nhead + h]) + b_qkv_ref[0, 2 * nhead + h]
        s = lax.dot_general(q, k, (((1,), (1,)), ((), ())),
                            preferred_element_type=jnp.float32)     # q @ k^T
        s = s + attn_bias_ref[...]                       # block-diag batch mask
        s = s - jnp.max(s, axis=-1, keepdims=True)
        p = jnp.exp(s)
        p = p / jnp.sum(p, axis=-1, keepdims=True)       # exact softmax
        attn = attn + _mm(_mm(p, v), w_out_ref[0, h])    # head-merge fused in

    x = _layernorm(x + attn, vecs_ref[0, 1:2], vecs_ref[0, 2:3], eps)

    # ---- feed-forward (bf16 weights, f32 accumulation) ---------------------
    hmid = jnp.maximum(
        _mm(x.astype(jnp.bfloat16), w1f_ref[0]) + b1f_ref[0], 0.0)  # (B*S,dff)
    hmid = _mm(hmid.astype(jnp.bfloat16), w2f_ref[0]) + vecs_ref[0, 3:4]
    x = _layernorm(x + hmid, vecs_ref[0, 4:5], vecs_ref[0, 5:6], eps)

    x_scr[...] = x

    # ---- last-layer epilogue: head MLP + flatten + linear2 -----------------
    @pl.when(l == nlayers - 1)
    def _():
        hh = jnp.maximum(_mm(x, head_w1_ref[...]) + head_b1_ref[...], 0.0)
        hh = jnp.maximum(_mm(hh, head_w2_ref[...]) + head_b2_ref[...], 0.0)
        # flatten(start_dim=1) + linear2, expressed as matmuls with 0/1
        # constants (no sublane->lane relayout in-kernel)
        h_exp = _mm(hh, flat_T_ref[...]) * flat_mask_ref[...]       # (B*S,S*16)
        r = _mm(h_exp, lin2_w_ref[...])                             # (B*S, ow)
        out_ref[...] = (_mm(seg_ref[...], r) + lin2_b_ref[...]
                        ).astype(out_ref.dtype)


# ---------------------------------------------------------------------------
# Host-side wrapper: single pallas_call, grid over layers
# ---------------------------------------------------------------------------

def tfmodel_forward(src, params, nhead):
    """src: (B, iw, ft_dim) -> (B, ow)."""
    B, S, F = src.shape
    D = params['enc_w2'].shape[1]
    dff = params['layers'][0]['w1'].shape[1]
    ow = params['lin2_w'].shape[1]
    nlayers = len(params['layers'])
    F16 = params['lin1_w2'].shape[1]            # 16
    Dh = D // nhead
    BS = B * S
    scale = 1.0 / math.sqrt(Dh)

    def row(v):
        return v.reshape(1, -1).astype(jnp.float32)

    src2d = src.reshape(BS, F).astype(jnp.float32)
    pe_t = jnp.tile(params['pe'][:S], (B, 1)).astype(jnp.float32)   # (BS, D)
    enc_b2pe = row(params['enc_b2']) + pe_t                          # b2 + pe

    # constants implementing flatten(start_dim=1) as matmuls
    flat_T = jnp.tile(jnp.eye(F16, dtype=jnp.float32), (1, S))       # (16,S*16)
    flat_mask = jnp.kron(jnp.tile(jnp.eye(S, dtype=jnp.float32), (B, 1)),
                         jnp.ones((1, F16), jnp.float32))            # (BS,S*16)
    seg = jnp.kron(jnp.eye(B, dtype=jnp.float32),
                   jnp.ones((1, S), jnp.float32))                    # (B, BS)
    # block-diagonal same-batch attention bias: 0 within batch, -1e30 across
    same = jnp.kron(jnp.eye(B, dtype=jnp.float32),
                    jnp.ones((S, S), jnp.float32))                   # (BS, BS)
    attn_bias = (same - 1.0) * 1e30

    # ---- stack per-layer weights into streamed slabs -----------------------
    w_qkv_l, b_qkv_l, w_out_l, vecs_l, b1f_l, w1f_l, w2f_l = \
        [], [], [], [], [], [], []
    for lp in params['layers']:
        w_in = lp['w_in'].astype(jnp.float32)            # (D, 3D), x@W layout
        b_in = lp['b_in'].astype(jnp.float32)            # (3D,)
        splits = [(w_in[:, :D], b_in[:D], scale),        # Q (scale folded)
                  (w_in[:, D:2 * D], b_in[D:2 * D], 1.0),  # K
                  (w_in[:, 2 * D:], b_in[2 * D:], 1.0)]    # V
        hw, hb = [], []
        for wj, bj, sc in splits:
            for h in range(nhead):
                hw.append(wj[:, h * Dh:(h + 1) * Dh] * sc)           # (D, Dh)
                hb.append((bj[h * Dh:(h + 1) * Dh] * sc).reshape(1, Dh))
        w_qkv_l.append(jnp.stack(hw))                    # (3*nhead, D, Dh)
        b_qkv_l.append(jnp.stack(hb))                    # (3*nhead, 1, Dh)

        wo = lp['w_out'].astype(jnp.float32)             # (D, D)
        w_out_l.append(jnp.stack(
            [wo[h * Dh:(h + 1) * Dh, :] for h in range(nhead)]))    # (nh,Dh,D)

        vecs_l.append(jnp.stack([
            lp['b_out'], lp['ln1_g'], lp['ln1_b'],
            lp['b2'], lp['ln2_g'], lp['ln2_b'],
            jnp.zeros((D,), jnp.float32), jnp.zeros((D,), jnp.float32),
        ]).astype(jnp.float32))                          # (8, D)
        b1f_l.append(lp['b1'].reshape(1, dff).astype(jnp.float32))
        w1f_l.append(lp['w1'].astype(jnp.bfloat16))      # (D, dff) bf16
        w2f_l.append(lp['w2'].astype(jnp.bfloat16))      # (dff, D) bf16

    w_qkv = jnp.stack(w_qkv_l)
    b_qkv = jnp.stack(b_qkv_l)
    w_out_s = jnp.stack(w_out_l)
    vecs = jnp.stack(vecs_l)
    b1f = jnp.stack(b1f_l)
    w1f = jnp.stack(w1f_l)
    w2f = jnp.stack(w2f_l)

    resident = [
        src2d,
        params['enc_w1'].astype(jnp.float32), row(params['enc_b1']),
        params['enc_w2'].astype(jnp.float32), enc_b2pe,
        params['lin1_w1'].astype(jnp.float32), row(params['lin1_b1']),
        params['lin1_w2'].astype(jnp.float32), row(params['lin1_b2']),
        params['lin2_w'].astype(jnp.float32), row(params['lin2_b']),
        flat_T, flat_mask, seg, attn_bias,
    ]
    per_layer = [w_qkv, b_qkv, w_out_s, vecs, b1f, w1f, w2f]

    def resident_spec(a):
        nd = a.ndim
        return pl.BlockSpec(a.shape, lambda l, _n=nd: (0,) * _n)

    def layer_spec(a):
        nd = a.ndim
        return pl.BlockSpec((1,) + a.shape[1:],
                            lambda l, _n=nd: (l,) + (0,) * (_n - 1))

    kernel = functools.partial(_tfmodel_kernel, nhead=nhead,
                               nlayers=nlayers, eps=1e-5)

    grid_spec = pltpu.PrefetchScalarGridSpec(
        num_scalar_prefetch=0,
        grid=(nlayers,),
        in_specs=[resident_spec(a) for a in resident]
                 + [layer_spec(a) for a in per_layer],
        out_specs=pl.BlockSpec((B, ow), lambda l: (0, 0)),
        scratch_shapes=[pltpu.VMEM((BS, D), jnp.float32)],   # persistent x
    )

    return pl.pallas_call(
        kernel,
        out_shape=jax.ShapeDtypeStruct((B, ow), jnp.float32),
        grid_spec=grid_spec,
        compiler_params=pltpu.CompilerParams(
            dimension_semantics=("arbitrary",),
            vmem_limit_bytes=32 * 1024 * 1024),
    )(*(resident + per_layer))


# ---------------------------------------------------------------------------
# Deterministic parameter initialization (x @ W layout, i.e. W = W_torch^T)
# ---------------------------------------------------------------------------

def positional_encoding_table(max_len, d_model):
    position = jnp.arange(max_len, dtype=jnp.float32)[:, None]
    div_term = jnp.exp(jnp.arange(0, d_model, 2, dtype=jnp.float32)
                       * (-math.log(10000.0) / d_model))
    pe = jnp.zeros((max_len, d_model), jnp.float32)
    pe = pe.at[:, 0::2].set(jnp.sin(position * div_term))
    pe = pe.at[:, 1::2].set(jnp.cos(position * div_term))
    return pe


def init_params(key, iw, ow, ft_dim, d_model, nhead, nlayers,
                dim_ff=2048, max_len=500):
    del nhead  # only used at call time
    keys = jax.random.split(key, 3 + nlayers)

    def w(k, shape, scale=0.02):
        return jax.random.normal(k, shape, jnp.float32) * scale

    ek = jax.random.split(keys[0], 4)
    hk = jax.random.split(keys[1], 4)
    ok = jax.random.split(keys[2], 2)

    params = {
        'enc_w1': w(ek[0], (ft_dim, d_model // 2)),
        'enc_b1': w(ek[1], (d_model // 2,), 0.01),
        'enc_w2': w(ek[2], (d_model // 2, d_model)),
        'enc_b2': w(ek[3], (d_model,), 0.01),
        'pe': positional_encoding_table(max_len, d_model),
        'lin1_w1': w(hk[0], (d_model, 64)),
        'lin1_b1': w(hk[1], (64,), 0.01),
        'lin1_w2': w(hk[2], (64, 16)),
        'lin1_b2': w(hk[3], (16,), 0.01),
        'lin2_w': w(ok[0], (16 * iw, ow)),
        'lin2_b': w(ok[1], (ow,), 0.01),
    }

    layers = []
    for i in range(nlayers):
        lk = jax.random.split(keys[3 + i], 8)
        layers.append(dict(
            w_in=w(lk[0], (d_model, 3 * d_model)),
            b_in=w(lk[1], (3 * d_model,), 0.01),
            w_out=w(lk[2], (d_model, d_model)),
            b_out=w(lk[3], (d_model,), 0.01),
            w1=w(lk[4], (d_model, dim_ff)),
            b1=w(lk[5], (dim_ff,), 0.01),
            w2=w(lk[6], (dim_ff, d_model)),
            b2=w(lk[7], (d_model,), 0.01),
            ln1_g=jnp.ones((d_model,), jnp.float32),
            ln1_b=jnp.zeros((d_model,), jnp.float32),
            ln2_g=jnp.ones((d_model,), jnp.float32),
            ln2_b=jnp.zeros((d_model,), jnp.float32),
        ))
    params['layers'] = layers
    return params


# ---------------------------------------------------------------------------
# Demo
# ---------------------------------------------------------------------------

if __name__ == "__main__":
    # Small shapes consistent with the module signature.
    batch, iw, ow, ft_dim = 2, 8, 4, 5
    d_model, nhead, nlayers = 64, 4, 2
    dim_ff = 2048  # nn.TransformerEncoderLayer default dim_feedforward

    key = jax.random.PRNGKey(0)
    pkey, xkey = jax.random.split(key)
    params = init_params(pkey, iw, ow, ft_dim, d_model, nhead, nlayers,
                         dim_ff=dim_ff)
    src = jax.random.normal(xkey, (batch, iw, ft_dim), jnp.float32)

    fwd = jax.jit(functools.partial(tfmodel_forward, nhead=nhead))
    out = jax.block_until_ready(fwd(src, params))

    assert out.shape == (batch, ow), out.shape
    assert bool(jnp.all(jnp.isfinite(out)))
    print("KERNEL_OK")
</pallas_src>

<mosaic_0001>
module attributes {stable_mosaic.version = 11 : i64} {
  func.func @_tfmodel_kernel(%arg0: i32, %arg1: memref<16x5xf32, #tpu.memory_space<vmem>>, %arg2: memref<5x32xf32, #tpu.memory_space<vmem>>, %arg3: memref<1x32xf32, #tpu.memory_space<vmem>>, %arg4: memref<32x64xf32, #tpu.memory_space<vmem>>, %arg5: memref<16x64xf32, #tpu.memory_space<vmem>>, %arg6: memref<64x64xf32, #tpu.memory_space<vmem>>, %arg7: memref<1x64xf32, #tpu.memory_space<vmem>>, %arg8: memref<64x16xf32, #tpu.memory_space<vmem>>, %arg9: memref<1x16xf32, #tpu.memory_space<vmem>>, %arg10: memref<128x4xf32, #tpu.memory_space<vmem>>, %arg11: memref<1x4xf32, #tpu.memory_space<vmem>>, %arg12: memref<16x128xf32, #tpu.memory_space<vmem>>, %arg13: memref<16x128xf32, #tpu.memory_space<vmem>>, %arg14: memref<2x16xf32, #tpu.memory_space<vmem>>, %arg15: memref<16x16xf32, #tpu.memory_space<vmem>>, %arg16: memref<1x12x64x16xf32, #tpu.memory_space<vmem>>, %arg17: memref<1x12x1x16xf32, #tpu.memory_space<vmem>>, %arg18: memref<1x4x16x64xf32, #tpu.memory_space<vmem>>, %arg19: memref<1x8x64xf32, #tpu.memory_space<vmem>>, %arg20: memref<1x1x2048xf32, #tpu.memory_space<vmem>>, %arg21: memref<1x64x2048xbf16, #tpu.memory_space<vmem>>, %arg22: memref<1x2048x64xbf16, #tpu.memory_space<vmem>>, %arg23: memref<2x4xf32, #tpu.memory_space<vmem>>, %arg24: memref<16x64xf32, #tpu.memory_space<vmem>>) attributes {dimension_semantics = [#tpu.dimension_semantics<arbitrary>], iteration_bounds = array<i64: 2>, scalar_prefetch = 0 : i64, scratch_operands = 1 : i64, tpu.core_type = #tpu.core_type<tc>, window_params = [{pipeline_mode = #tpu.pipeline_mode<synchronous>, transform_indices = @transform_0, window_bounds = array<i64: 16, 5>}, {pipeline_mode = #tpu.pipeline_mode<synchronous>, transform_indices = @transform_1, window_bounds = array<i64: 5, 32>}, {pipeline_mode = #tpu.pipeline_mode<synchronous>, transform_indices = @transform_2, window_bounds = array<i64: 1, 32>}, {pipeline_mode = #tpu.pipeline_mode<synchronous>, transform_indices = @transform_3, window_bounds = array<i64: 32, 64>}, {pipeline_mode = #tpu.pipeline_mode<synchronous>, transform_indices = @transform_4, window_bounds = array<i64: 16, 64>}, {pipeline_mode = #tpu.pipeline_mode<synchronous>, transform_indices = @transform_5, window_bounds = array<i64: 64, 64>}, {pipeline_mode = #tpu.pipeline_mode<synchronous>, transform_indices = @transform_6, window_bounds = array<i64: 1, 64>}, {pipeline_mode = #tpu.pipeline_mode<synchronous>, transform_indices = @transform_7, window_bounds = array<i64: 64, 16>}, {pipeline_mode = #tpu.pipeline_mode<synchronous>, transform_indices = @transform_8, window_bounds = array<i64: 1, 16>}, {pipeline_mode = #tpu.pipeline_mode<synchronous>, transform_indices = @transform_9, window_bounds = array<i64: 128, 4>}, {pipeline_mode = #tpu.pipeline_mode<synchronous>, transform_indices = @transform_10, window_bounds = array<i64: 1, 4>}, {pipeline_mode = #tpu.pipeline_mode<synchronous>, transform_indices = @transform_11, window_bounds = array<i64: 16, 128>}, {pipeline_mode = #tpu.pipeline_mode<synchronous>, transform_indices = @transform_12, window_bounds = array<i64: 16, 128>}, {pipeline_mode = #tpu.pipeline_mode<synchronous>, transform_indices = @transform_13, window_bounds = array<i64: 2, 16>}, {pipeline_mode = #tpu.pipeline_mode<synchronous>, transform_indices = @transform_14, window_bounds = array<i64: 16, 16>}, {transform_indices = @transform_15, window_bounds = array<i64: 1, 12, 64, 16>}, {transform_indices = @transform_16, window_bounds = array<i64: 1, 12, 1, 16>}, {transform_indices = @transform_17, window_bounds = array<i64: 1, 4, 16, 64>}, {transform_indices = @transform_18, window_bounds = array<i64: 1, 8, 64>}, {transform_indices = @transform_19, window_bounds = array<i64: 1, 1, 2048>}, {transform_indices = @transform_20, window_bounds = array<i64: 1, 64, 2048>}, {transform_indices = @transform_21, window_bounds = array<i64: 1, 2048, 64>}, {pipeline_mode = #tpu.pipeline_mode<synchronous>, transform_indices = @transform_22, window_bounds = array<i64: 2, 4>}]} {
    %c0_i32 = arith.constant 0 : i32
    %0 = arith.cmpi eq, %arg0, %c0_i32 : i32
    %1 = arith.extui %0 : i1 to i32
    %c0_i32_0 = arith.constant 0 : i32
    %2 = arith.cmpi ne, %1, %c0_i32_0 : i32
    scf.if %2 {
      %c0_185 = arith.constant 0 : index
      %c0_186 = arith.constant 0 : index
      %231 = vector.load %arg1[%c0_185, %c0_186] : memref<16x5xf32, #tpu.memory_space<vmem>>, vector<16x5xf32>
      %c0_187 = arith.constant 0 : index
      %c0_188 = arith.constant 0 : index
      %232 = vector.load %arg2[%c0_187, %c0_188] : memref<5x32xf32, #tpu.memory_space<vmem>>, vector<5x32xf32>
      %cst_189 = arith.constant dense<0.000000e+00> : vector<16x32xf32>
      %233 = tpu.matmul %231, %232, %cst_189 {dimension_numbers = #tpu.dot_dimension_numbers<[1], [0], [0], [1], [0, 0, 1, 1], [], []>} : vector<16x5xf32>, vector<5x32xf32>, vector<16x32xf32> -> vector<16x32xf32>
      %c0_190 = arith.constant 0 : index
      %c0_191 = arith.constant 0 : index
      %234 = vector.load %arg3[%c0_190, %c0_191] : memref<1x32xf32, #tpu.memory_space<vmem>>, vector<1x32xf32>
      %235 = vector.broadcast %234 : vector<1x32xf32> to vector<16x32xf32>
      %236 = arith.addf %233, %235 : vector<16x32xf32>
      %cst_192 = arith.constant 0.000000e+00 : f32
      %237 = vector.broadcast %cst_192 : f32 to vector<16x32xf32>
      %238 = arith.maximumf %236, %237 : vector<16x32xf32>
      %c0_193 = arith.constant 0 : index
      %c0_194 = arith.constant 0 : index
      %239 = vector.load %arg4[%c0_193, %c0_194] : memref<32x64xf32, #tpu.memory_space<vmem>>, vector<32x64xf32>
      %cst_195 = arith.constant dense<0.000000e+00> : vector<16x64xf32>
      %240 = tpu.matmul %238, %239, %cst_195 {dimension_numbers = #tpu.dot_dimension_numbers<[1], [0], [0], [1], [0, 0, 1, 1], [], []>} : vector<16x32xf32>, vector<32x64xf32>, vector<16x64xf32> -> vector<16x64xf32>
      %c0_196 = arith.constant 0 : index
      %c0_197 = arith.constant 0 : index
      %241 = vector.load %arg5[%c0_196, %c0_197] : memref<16x64xf32, #tpu.memory_space<vmem>>, vector<16x64xf32>
      %242 = arith.addf %240, %241 : vector<16x64xf32>
      %c0_198 = arith.constant 0 : index
      %c0_199 = arith.constant 0 : index
      %243 = vector.load %arg24[%c0_198, %c0_199] : memref<16x64xf32, #tpu.memory_space<vmem>>, vector<16x64xf32>
      tpu.vector_store %arg24[%c0_198, %c0_199], %242 {strides = array<i32>} : memref<16x64xf32, #tpu.memory_space<vmem>>, vector<16x64xf32>,
    } else {
    }
    %c0 = arith.constant 0 : index
    %c0_1 = arith.constant 0 : index
    %3 = vector.load %arg24[%c0, %c0_1] : memref<16x64xf32, #tpu.memory_space<vmem>>, vector<16x64xf32>
    %c0_2 = arith.constant 0 : index
    %c0_3 = arith.constant 0 : index
    %c0_4 = arith.constant 0 : index
    %4 = vector.load %arg19[%c0_2, %c0_3, %c0_4] : memref<1x8x64xf32, #tpu.memory_space<vmem>>, vector<1x1x64xf32>
    %5 = vector.shape_cast %4 : vector<1x1x64xf32> to vector<1x64xf32>
    %c0_5 = arith.constant 0 : index
    %c0_6 = arith.constant 0 : index
    %c0_7 = arith.constant 0 : index
    %c0_8 = arith.constant 0 : index
    %6 = vector.load %arg16[%c0_5, %c0_6, %c0_7, %c0_8] : memref<1x12x64x16xf32, #tpu.memory_space<vmem>>, vector<1x1x64x16xf32>
    %7 = vector.shape_cast %6 : vector<1x1x64x16xf32> to vector<64x16xf32>
    %cst = arith.constant dense<0.000000e+00> : vector<16x16xf32>
    %8 = tpu.matmul %3, %7, %cst {dimension_numbers = #tpu.dot_dimension_numbers<[1], [0], [0], [1], [0, 0, 1, 1], [], []>} : vector<16x64xf32>, vector<64x16xf32>, vector<16x16xf32> -> vector<16x16xf32>
    %c0_9 = arith.constant 0 : index
    %c0_10 = arith.constant 0 : index
    %c0_11 = arith.constant 0 : index
    %c0_12 = arith.constant 0 : index
    %9 = vector.load %arg17[%c0_9, %c0_10, %c0_11, %c0_12] : memref<1x12x1x16xf32, #tpu.memory_space<vmem>>, vector<1x1x1x16xf32>
    %10 = vector.shape_cast %9 : vector<1x1x1x16xf32> to vector<1x16xf32>
    %11 = vector.broadcast %10 : vector<1x16xf32> to vector<16x16xf32>
    %12 = arith.addf %8, %11 : vector<16x16xf32>
    %c0_13 = arith.constant 0 : index
    %c4 = arith.constant 4 : index
    %c0_14 = arith.constant 0 : index
    %c0_15 = arith.constant 0 : index
    %13 = vector.load %arg16[%c0_13, %c4, %c0_14, %c0_15] : memref<1x12x64x16xf32, #tpu.memory_space<vmem>>, vector<1x1x64x16xf32>
    %14 = vector.shape_cast %13 : vector<1x1x64x16xf32> to vector<64x16xf32>
    %cst_16 = arith.constant dense<0.000000e+00> : vector<16x16xf32>
    %15 = tpu.matmul %3, %14, %cst_16 {dimension_numbers = #tpu.dot_dimension_numbers<[1], [0], [0], [1], [0, 0, 1, 1], [], []>} : vector<16x64xf32>, vector<64x16xf32>, vector<16x16xf32> -> vector<16x16xf32>
    %c0_17 = arith.constant 0 : index
    %c4_18 = arith.constant 4 : index
    %c0_19 = arith.constant 0 : index
    %c0_20 = arith.constant 0 : index
    %16 = vector.load %arg17[%c0_17, %c4_18, %c0_19, %c0_20] : memref<1x12x1x16xf32, #tpu.memory_space<vmem>>, vector<1x1x1x16xf32>
    %17 = vector.shape_cast %16 : vector<1x1x1x16xf32> to vector<1x16xf32>
    %18 = vector.broadcast %17 : vector<1x16xf32> to vector<16x16xf32>
    %19 = arith.addf %15, %18 : vector<16x16xf32>
    %c0_21 = arith.constant 0 : index
    %c8 = arith.constant 8 : index
    %c0_22 = arith.constant 0 : index
    %c0_23 = arith.constant 0 : index
    %20 = vector.load %arg16[%c0_21, %c8, %c0_22, %c0_23] : memref<1x12x64x16xf32, #tpu.memory_space<vmem>>, vector<1x1x64x16xf32>
    %21 = vector.shape_cast %20 : vector<1x1x64x16xf32> to vector<64x16xf32>
    %cst_24 = arith.constant dense<0.000000e+00> : vector<16x16xf32>
    %22 = tpu.matmul %3, %21, %cst_24 {dimension_numbers = #tpu.dot_dimension_numbers<[1], [0], [0], [1], [0, 0, 1, 1], [], []>} : vector<16x64xf32>, vector<64x16xf32>, vector<16x16xf32> -> vector<16x16xf32>
    %c0_25 = arith.constant 0 : index
    %c8_26 = arith.constant 8 : index
    %c0_27 = arith.constant 0 : index
    %c0_28 = arith.constant 0 : index
    %23 = vector.load %arg17[%c0_25, %c8_26, %c0_27, %c0_28] : memref<1x12x1x16xf32, #tpu.memory_space<vmem>>, vector<1x1x1x16xf32>
    %24 = vector.shape_cast %23 : vector<1x1x1x16xf32> to vector<1x16xf32>
    %25 = vector.broadcast %24 : vector<1x16xf32> to vector<16x16xf32>
    %26 = arith.addf %22, %25 : vector<16x16xf32>
    %cst_29 = arith.constant dense<0.000000e+00> : vector<16x16xf32>
    %27 = tpu.matmul %12, %19, %cst_29 {dimension_numbers = #tpu.dot_dimension_numbers<[1], [1], [0], [0], [0, 0, 1, 0], [], []>} : vector<16x16xf32>, vector<16x16xf32>, vector<16x16xf32> -> vector<16x16xf32>
    %c0_30 = arith.constant 0 : index
    %c0_31 = arith.constant 0 : index
    %28 = vector.load %arg15[%c0_30, %c0_31] : memref<16x16xf32, #tpu.memory_space<vmem>>, vector<16x16xf32>
    %29 = arith.addf %27, %28 : vector<16x16xf32>
    %cst_32 = arith.constant dense<0xFF800000> : vector<16xf32>
    %30 = vector.multi_reduction <maximumf>, %29, %cst_32 [1] : vector<16x16xf32> to vector<16xf32>
    %31 = vector.shape_cast %30 : vector<16xf32> to vector<16x1xf32>
    %32 = vector.broadcast %31 : vector<16x1xf32> to vector<16x16xf32>
    %33 = arith.subf %29, %32 : vector<16x16xf32>
    %34 = math.exp %33 : vector<16x16xf32>
    %cst_33 = arith.constant dense<0.000000e+00> : vector<16xf32>
    %35 = vector.multi_reduction <add>, %34, %cst_33 [1] : vector<16x16xf32> to vector<16xf32>
    %36 = vector.shape_cast %35 : vector<16xf32> to vector<16x1xf32>
    %37 = vector.broadcast %36 : vector<16x1xf32> to vector<16x16xf32>
    %38 = arith.divf %34, %37 : vector<16x16xf32>
    %cst_34 = arith.constant dense<0.000000e+00> : vector<16x16xf32>
    %39 = tpu.matmul %38, %26, %cst_34 {dimension_numbers = #tpu.dot_dimension_numbers<[1], [0], [0], [1], [0, 0, 1, 1], [], []>} : vector<16x16xf32>, vector<16x16xf32>, vector<16x16xf32> -> vector<16x16xf32>
    %c0_35 = arith.constant 0 : index
    %c0_36 = arith.constant 0 : index
    %c0_37 = arith.constant 0 : index
    %c0_38 = arith.constant 0 : index
    %40 = vector.load %arg18[%c0_35, %c0_36, %c0_37, %c0_38] : memref<1x4x16x64xf32, #tpu.memory_space<vmem>>, vector<1x1x16x64xf32>
    %41 = vector.shape_cast %40 : vector<1x1x16x64xf32> to vector<16x64xf32>
    %cst_39 = arith.constant dense<0.000000e+00> : vector<16x64xf32>
    %42 = tpu.matmul %39, %41, %cst_39 {dimension_numbers = #tpu.dot_dimension_numbers<[1], [0], [0], [1], [0, 0, 1, 1], [], []>} : vector<16x16xf32>, vector<16x64xf32>, vector<16x64xf32> -> vector<16x64xf32>
    %43 = vector.broadcast %5 : vector<1x64xf32> to vector<16x64xf32>
    %44 = arith.addf %43, %42 : vector<16x64xf32>
    %c0_40 = arith.constant 0 : index
    %c1 = arith.constant 1 : index
    %c0_41 = arith.constant 0 : index
    %c0_42 = arith.constant 0 : index
    %45 = vector.load %arg16[%c0_40, %c1, %c0_41, %c0_42] : memref<1x12x64x16xf32, #tpu.memory_space<vmem>>, vector<1x1x64x16xf32>
    %46 = vector.shape_cast %45 : vector<1x1x64x16xf32> to vector<64x16xf32>
    %cst_43 = arith.constant dense<0.000000e+00> : vector<16x16xf32>
    %47 = tpu.matmul %3, %46, %cst_43 {dimension_numbers = #tpu.dot_dimension_numbers<[1], [0], [0], [1], [0, 0, 1, 1], [], []>} : vector<16x64xf32>, vector<64x16xf32>, vector<16x16xf32> -> vector<16x16xf32>
    %c0_44 = arith.constant 0 : index
    %c1_45 = arith.constant 1 : index
    %c0_46 = arith.constant 0 : index
    %c0_47 = arith.constant 0 : index
    %48 = vector.load %arg17[%c0_44, %c1_45, %c0_46, %c0_47] : memref<1x12x1x16xf32, #tpu.memory_space<vmem>>, vector<1x1x1x16xf32>
    %49 = vector.shape_cast %48 : vector<1x1x1x16xf32> to vector<1x16xf32>
    %50 = vector.broadcast %49 : vector<1x16xf32> to vector<16x16xf32>
    %51 = arith.addf %47, %50 : vector<16x16xf32>
    %c0_48 = arith.constant 0 : index
    %c5 = arith.constant 5 : index
    %c0_49 = arith.constant 0 : index
    %c0_50 = arith.constant 0 : index
    %52 = vector.load %arg16[%c0_48, %c5, %c0_49, %c0_50] : memref<1x12x64x16xf32, #tpu.memory_space<vmem>>, vector<1x1x64x16xf32>
    %53 = vector.shape_cast %52 : vector<1x1x64x16xf32> to vector<64x16xf32>
    %cst_51 = arith.constant dense<0.000000e+00> : vector<16x16xf32>
    %54 = tpu.matmul %3, %53, %cst_51 {dimension_numbers = #tpu.dot_dimension_numbers<[1], [0], [0], [1], [0, 0, 1, 1], [], []>} : vector<16x64xf32>, vector<64x16xf32>, vector<16x16xf32> -> vector<16x16xf32>
    %c0_52 = arith.constant 0 : index
    %c5_53 = arith.constant 5 : index
    %c0_54 = arith.constant 0 : index
    %c0_55 = arith.constant 0 : index
    %55 = vector.load %arg17[%c0_52, %c5_53, %c0_54, %c0_55] : memref<1x12x1x16xf32, #tpu.memory_space<vmem>>, vector<1x1x1x16xf32>
    %56 = vector.shape_cast %55 : vector<1x1x1x16xf32> to vector<1x16xf32>
    %57 = vector.broadcast %56 : vector<1x16xf32> to vector<16x16xf32>
    %58 = arith.addf %54, %57 : vector<16x16xf32>
    %c0_56 = arith.constant 0 : index
    %c9 = arith.constant 9 : index
    %c0_57 = arith.constant 0 : index
    %c0_58 = arith.constant 0 : index
    %59 = vector.load %arg16[%c0_56, %c9, %c0_57, %c0_58] : memref<1x12x64x16xf32, #tpu.memory_space<vmem>>, vector<1x1x64x16xf32>
    %60 = vector.shape_cast %59 : vector<1x1x64x16xf32> to vector<64x16xf32>
    %cst_59 = arith.constant dense<0.000000e+00> : vector<16x16xf32>
    %61 = tpu.matmul %3, %60, %cst_59 {dimension_numbers = #tpu.dot_dimension_numbers<[1], [0], [0], [1], [0, 0, 1, 1], [], []>} : vector<16x64xf32>, vector<64x16xf32>, vector<16x16xf32> -> vector<16x16xf32>
    %c0_60 = arith.constant 0 : index
    %c9_61 = arith.constant 9 : index
    %c0_62 = arith.constant 0 : index
    %c0_63 = arith.constant 0 : index
    %62 = vector.load %arg17[%c0_60, %c9_61, %c0_62, %c0_63] : memref<1x12x1x16xf32, #tpu.memory_space<vmem>>, vector<1x1x1x16xf32>
    %63 = vector.shape_cast %62 : vector<1x1x1x16xf32> to vector<1x16xf32>
    %64 = vector.broadcast %63 : vector<1x16xf32> to vector<16x16xf32>
    %65 = arith.addf %61, %64 : vector<16x16xf32>
    %cst_64 = arith.constant dense<0.000000e+00> : vector<16x16xf32>
    %66 = tpu.matmul %51, %58, %cst_64 {dimension_numbers = #tpu.dot_dimension_numbers<[1], [1], [0], [0], [0, 0, 1, 0], [], []>} : vector<16x16xf32>, vector<16x16xf32>, vector<16x16xf32> -> vector<16x16xf32>
    %c0_65 = arith.constant 0 : index
    %c0_66 = arith.constant 0 : index
    %67 = vector.load %arg15[%c0_65, %c0_66] : memref<16x16xf32, #tpu.memory_space<vmem>>, vector<16x16xf32>
    %68 = arith.addf %66, %67 : vector<16x16xf32>
    %cst_67 = arith.constant dense<0xFF800000> : vector<16xf32>
    %69 = vector.multi_reduction <maximumf>, %68, %cst_67 [1] : vector<16x16xf32> to vector<16xf32>
    %70 = vector.shape_cast %69 : vector<16xf32> to vector<16x1xf32>
    %71 = vector.broadcast %70 : vector<16x1xf32> to vector<16x16xf32>
    %72 = arith.subf %68, %71 : vector<16x16xf32>
    %73 = math.exp %72 : vector<16x16xf32>
    %cst_68 = arith.constant dense<0.000000e+00> : vector<16xf32>
    %74 = vector.multi_reduction <add>, %73, %cst_68 [1] : vector<16x16xf32> to vector<16xf32>
    %75 = vector.shape_cast %74 : vector<16xf32> to vector<16x1xf32>
    %76 = vector.broadcast %75 : vector<16x1xf32> to vector<16x16xf32>
    %77 = arith.divf %73, %76 : vector<16x16xf32>
    %cst_69 = arith.constant dense<0.000000e+00> : vector<16x16xf32>
    %78 = tpu.matmul %77, %65, %cst_69 {dimension_numbers = #tpu.dot_dimension_numbers<[1], [0], [0], [1], [0, 0, 1, 1], [], []>} : vector<16x16xf32>, vector<16x16xf32>, vector<16x16xf32> -> vector<16x16xf32>
    %c0_70 = arith.constant 0 : index
    %c1_71 = arith.constant 1 : index
    %c0_72 = arith.constant 0 : index
    %c0_73 = arith.constant 0 : index
    %79 = vector.load %arg18[%c0_70, %c1_71, %c0_72, %c0_73] : memref<1x4x16x64xf32, #tpu.memory_space<vmem>>, vector<1x1x16x64xf32>
    %80 = vector.shape_cast %79 : vector<1x1x16x64xf32> to vector<16x64xf32>
    %cst_74 = arith.constant dense<0.000000e+00> : vector<16x64xf32>
    %81 = tpu.matmul %78, %80, %cst_74 {dimension_numbers = #tpu.dot_dimension_numbers<[1], [0], [0], [1], [0, 0, 1, 1], [], []>} : vector<16x16xf32>, vector<16x64xf32>, vector<16x64xf32> -> vector<16x64xf32>
    %82 = arith.addf %44, %81 : vector<16x64xf32>
    %c0_75 = arith.constant 0 : index
    %c2 = arith.constant 2 : index
    %c0_76 = arith.constant 0 : index
    %c0_77 = arith.constant 0 : index
    %83 = vector.load %arg16[%c0_75, %c2, %c0_76, %c0_77] : memref<1x12x64x16xf32, #tpu.memory_space<vmem>>, vector<1x1x64x16xf32>
    %84 = vector.shape_cast %83 : vector<1x1x64x16xf32> to vector<64x16xf32>
    %cst_78 = arith.constant dense<0.000000e+00> : vector<16x16xf32>
    %85 = tpu.matmul %3, %84, %cst_78 {dimension_numbers = #tpu.dot_dimension_numbers<[1], [0], [0], [1], [0, 0, 1, 1], [], []>} : vector<16x64xf32>, vector<64x16xf32>, vector<16x16xf32> -> vector<16x16xf32>
    %c0_79 = arith.constant 0 : index
    %c2_80 = arith.constant 2 : index
    %c0_81 = arith.constant 0 : index
    %c0_82 = arith.constant 0 : index
    %86 = vector.load %arg17[%c0_79, %c2_80, %c0_81, %c0_82] : memref<1x12x1x16xf32, #tpu.memory_space<vmem>>, vector<1x1x1x16xf32>
    %87 = vector.shape_cast %86 : vector<1x1x1x16xf32> to vector<1x16xf32>
    %88 = vector.broadcast %87 : vector<1x16xf32> to vector<16x16xf32>
    %89 = arith.addf %85, %88 : vector<16x16xf32>
    %c0_83 = arith.constant 0 : index
    %c6 = arith.constant 6 : index
    %c0_84 = arith.constant 0 : index
    %c0_85 = arith.constant 0 : index
    %90 = vector.load %arg16[%c0_83, %c6, %c0_84, %c0_85] : memref<1x12x64x16xf32, #tpu.memory_space<vmem>>, vector<1x1x64x16xf32>
    %91 = vector.shape_cast %90 : vector<1x1x64x16xf32> to vector<64x16xf32>
    %cst_86 = arith.constant dense<0.000000e+00> : vector<16x16xf32>
    %92 = tpu.matmul %3, %91, %cst_86 {dimension_numbers = #tpu.dot_dimension_numbers<[1], [0], [0], [1], [0, 0, 1, 1], [], []>} : vector<16x64xf32>, vector<64x16xf32>, vector<16x16xf32> -> vector<16x16xf32>
    %c0_87 = arith.constant 0 : index
    %c6_88 = arith.constant 6 : index
    %c0_89 = arith.constant 0 : index
    %c0_90 = arith.constant 0 : index
    %93 = vector.load %arg17[%c0_87, %c6_88, %c0_89, %c0_90] : memref<1x12x1x16xf32, #tpu.memory_space<vmem>>, vector<1x1x1x16xf32>
    %94 = vector.shape_cast %93 : vector<1x1x1x16xf32> to vector<1x16xf32>
    %95 = vector.broadcast %94 : vector<1x16xf32> to vector<16x16xf32>
    %96 = arith.addf %92, %95 : vector<16x16xf32>
    %c0_91 = arith.constant 0 : index
    %c10 = arith.constant 10 : index
    %c0_92 = arith.constant 0 : index
    %c0_93 = arith.constant 0 : index
    %97 = vector.load %arg16[%c0_91, %c10, %c0_92, %c0_93] : memref<1x12x64x16xf32, #tpu.memory_space<vmem>>, vector<1x1x64x16xf32>
    %98 = vector.shape_cast %97 : vector<1x1x64x16xf32> to vector<64x16xf32>
    %cst_94 = arith.constant dense<0.000000e+00> : vector<16x16xf32>
    %99 = tpu.matmul %3, %98, %cst_94 {dimension_numbers = #tpu.dot_dimension_numbers<[1], [0], [0], [1], [0, 0, 1, 1], [], []>} : vector<16x64xf32>, vector<64x16xf32>, vector<16x16xf32> -> vector<16x16xf32>
    %c0_95 = arith.constant 0 : index
    %c10_96 = arith.constant 10 : index
    %c0_97 = arith.constant 0 : index
    %c0_98 = arith.constant 0 : index
    %100 = vector.load %arg17[%c0_95, %c10_96, %c0_97, %c0_98] : memref<1x12x1x16xf32, #tpu.memory_space<vmem>>, vector<1x1x1x16xf32>
    %101 = vector.shape_cast %100 : vector<1x1x1x16xf32> to vector<1x16xf32>
    %102 = vector.broadcast %101 : vector<1x16xf32> to vector<16x16xf32>
    %103 = arith.addf %99, %102 : vector<16x16xf32>
    %cst_99 = arith.constant dense<0.000000e+00> : vector<16x16xf32>
    %104 = tpu.matmul %89, %96, %cst_99 {dimension_numbers = #tpu.dot_dimension_numbers<[1], [1], [0], [0], [0, 0, 1, 0], [], []>} : vector<16x16xf32>, vector<16x16xf32>, vector<16x16xf32> -> vector<16x16xf32>
    %c0_100 = arith.constant 0 : index
    %c0_101 = arith.constant 0 : index
    %105 = vector.load %arg15[%c0_100, %c0_101] : memref<16x16xf32, #tpu.memory_space<vmem>>, vector<16x16xf32>
    %106 = arith.addf %104, %105 : vector<16x16xf32>
    %cst_102 = arith.constant dense<0xFF800000> : vector<16xf32>
    %107 = vector.multi_reduction <maximumf>, %106, %cst_102 [1] : vector<16x16xf32> to vector<16xf32>
    %108 = vector.shape_cast %107 : vector<16xf32> to vector<16x1xf32>
    %109 = vector.broadcast %108 : vector<16x1xf32> to vector<16x16xf32>
    %110 = arith.subf %106, %109 : vector<16x16xf32>
    %111 = math.exp %110 : vector<16x16xf32>
    %cst_103 = arith.constant dense<0.000000e+00> : vector<16xf32>
    %112 = vector.multi_reduction <add>, %111, %cst_103 [1] : vector<16x16xf32> to vector<16xf32>
    %113 = vector.shape_cast %112 : vector<16xf32> to vector<16x1xf32>
    %114 = vector.broadcast %113 : vector<16x1xf32> to vector<16x16xf32>
    %115 = arith.divf %111, %114 : vector<16x16xf32>
    %cst_104 = arith.constant dense<0.000000e+00> : vector<16x16xf32>
    %116 = tpu.matmul %115, %103, %cst_104 {dimension_numbers = #tpu.dot_dimension_numbers<[1], [0], [0], [1], [0, 0, 1, 1], [], []>} : vector<16x16xf32>, vector<16x16xf32>, vector<16x16xf32> -> vector<16x16xf32>
    %c0_105 = arith.constant 0 : index
    %c2_106 = arith.constant 2 : index
    %c0_107 = arith.constant 0 : index
    %c0_108 = arith.constant 0 : index
    %117 = vector.load %arg18[%c0_105, %c2_106, %c0_107, %c0_108] : memref<1x4x16x64xf32, #tpu.memory_space<vmem>>, vector<1x1x16x64xf32>
    %118 = vector.shape_cast %117 : vector<1x1x16x64xf32> to vector<16x64xf32>
    %cst_109 = arith.constant dense<0.000000e+00> : vector<16x64xf32>
    %119 = tpu.matmul %116, %118, %cst_109 {dimension_numbers = #tpu.dot_dimension_numbers<[1], [0], [0], [1], [0, 0, 1, 1], [], []>} : vector<16x16xf32>, vector<16x64xf32>, vector<16x64xf32> -> vector<16x64xf32>
    %120 = arith.addf %82, %119 : vector<16x64xf32>
    %c0_110 = arith.constant 0 : index
    %c3 = arith.constant 3 : index
    %c0_111 = arith.constant 0 : index
    %c0_112 = arith.constant 0 : index
    %121 = vector.load %arg16[%c0_110, %c3, %c0_111, %c0_112] : memref<1x12x64x16xf32, #tpu.memory_space<vmem>>, vector<1x1x64x16xf32>
    %122 = vector.shape_cast %121 : vector<1x1x64x16xf32> to vector<64x16xf32>
    %cst_113 = arith.constant dense<0.000000e+00> : vector<16x16xf32>
    %123 = tpu.matmul %3, %122, %cst_113 {dimension_numbers = #tpu.dot_dimension_numbers<[1], [0], [0], [1], [0, 0, 1, 1], [], []>} : vector<16x64xf32>, vector<64x16xf32>, vector<16x16xf32> -> vector<16x16xf32>
    %c0_114 = arith.constant 0 : index
    %c3_115 = arith.constant 3 : index
    %c0_116 = arith.constant 0 : index
    %c0_117 = arith.constant 0 : index
    %124 = vector.load %arg17[%c0_114, %c3_115, %c0_116, %c0_117] : memref<1x12x1x16xf32, #tpu.memory_space<vmem>>, vector<1x1x1x16xf32>
    %125 = vector.shape_cast %124 : vector<1x1x1x16xf32> to vector<1x16xf32>
    %126 = vector.broadcast %125 : vector<1x16xf32> to vector<16x16xf32>
    %127 = arith.addf %123, %126 : vector<16x16xf32>
    %c0_118 = arith.constant 0 : index
    %c7 = arith.constant 7 : index
    %c0_119 = arith.constant 0 : index
    %c0_120 = arith.constant 0 : index
    %128 = vector.load %arg16[%c0_118, %c7, %c0_119, %c0_120] : memref<1x12x64x16xf32, #tpu.memory_space<vmem>>, vector<1x1x64x16xf32>
    %129 = vector.shape_cast %128 : vector<1x1x64x16xf32> to vector<64x16xf32>
    %cst_121 = arith.constant dense<0.000000e+00> : vector<16x16xf32>
    %130 = tpu.matmul %3, %129, %cst_121 {dimension_numbers = #tpu.dot_dimension_numbers<[1], [0], [0], [1], [0, 0, 1, 1], [], []>} : vector<16x64xf32>, vector<64x16xf32>, vector<16x16xf32> -> vector<16x16xf32>
    %c0_122 = arith.constant 0 : index
    %c7_123 = arith.constant 7 : index
    %c0_124 = arith.constant 0 : index
    %c0_125 = arith.constant 0 : index
    %131 = vector.load %arg17[%c0_122, %c7_123, %c0_124, %c0_125] : memref<1x12x1x16xf32, #tpu.memory_space<vmem>>, vector<1x1x1x16xf32>
    %132 = vector.shape_cast %131 : vector<1x1x1x16xf32> to vector<1x16xf32>
    %133 = vector.broadcast %132 : vector<1x16xf32> to vector<16x16xf32>
    %134 = arith.addf %130, %133 : vector<16x16xf32>
    %c0_126 = arith.constant 0 : index
    %c11 = arith.constant 11 : index
    %c0_127 = arith.constant 0 : index
    %c0_128 = arith.constant 0 : index
    %135 = vector.load %arg16[%c0_126, %c11, %c0_127, %c0_128] : memref<1x12x64x16xf32, #tpu.memory_space<vmem>>, vector<1x1x64x16xf32>
    %136 = vector.shape_cast %135 : vector<1x1x64x16xf32> to vector<64x16xf32>
    %cst_129 = arith.constant dense<0.000000e+00> : vector<16x16xf32>
    %137 = tpu.matmul %3, %136, %cst_129 {dimension_numbers = #tpu.dot_dimension_numbers<[1], [0], [0], [1], [0, 0, 1, 1], [], []>} : vector<16x64xf32>, vector<64x16xf32>, vector<16x16xf32> -> vector<16x16xf32>
    %c0_130 = arith.constant 0 : index
    %c11_131 = arith.constant 11 : index
    %c0_132 = arith.constant 0 : index
    %c0_133 = arith.constant 0 : index
    %138 = vector.load %arg17[%c0_130, %c11_131, %c0_132, %c0_133] : memref<1x12x1x16xf32, #tpu.memory_space<vmem>>, vector<1x1x1x16xf32>
    %139 = vector.shape_cast %138 : vector<1x1x1x16xf32> to vector<1x16xf32>
    %140 = vector.broadcast %139 : vector<1x16xf32> to vector<16x16xf32>
    %141 = arith.addf %137, %140 : vector<16x16xf32>
    %cst_134 = arith.constant dense<0.000000e+00> : vector<16x16xf32>
    %142 = tpu.matmul %127, %134, %cst_134 {dimension_numbers = #tpu.dot_dimension_numbers<[1], [1], [0], [0], [0, 0, 1, 0], [], []>} : vector<16x16xf32>, vector<16x16xf32>, vector<16x16xf32> -> vector<16x16xf32>
    %c0_135 = arith.constant 0 : index
    %c0_136 = arith.constant 0 : index
    %143 = vector.load %arg15[%c0_135, %c0_136] : memref<16x16xf32, #tpu.memory_space<vmem>>, vector<16x16xf32>
    %144 = arith.addf %142, %143 : vector<16x16xf32>
    %cst_137 = arith.constant dense<0xFF800000> : vector<16xf32>
    %145 = vector.multi_reduction <maximumf>, %144, %cst_137 [1] : vector<16x16xf32> to vector<16xf32>
    %146 = vector.shape_cast %145 : vector<16xf32> to vector<16x1xf32>
    %147 = vector.broadcast %146 : vector<16x1xf32> to vector<16x16xf32>
    %148 = arith.subf %144, %147 : vector<16x16xf32>
    %149 = math.exp %148 : vector<16x16xf32>
    %cst_138 = arith.constant dense<0.000000e+00> : vector<16xf32>
    %150 = vector.multi_reduction <add>, %149, %cst_138 [1] : vector<16x16xf32> to vector<16xf32>
    %151 = vector.shape_cast %150 : vector<16xf32> to vector<16x1xf32>
    %152 = vector.broadcast %151 : vector<16x1xf32> to vector<16x16xf32>
    %153 = arith.divf %149, %152 : vector<16x16xf32>
    %cst_139 = arith.constant dense<0.000000e+00> : vector<16x16xf32>
    %154 = tpu.matmul %153, %141, %cst_139 {dimension_numbers = #tpu.dot_dimension_numbers<[1], [0], [0], [1], [0, 0, 1, 1], [], []>} : vector<16x16xf32>, vector<16x16xf32>, vector<16x16xf32> -> vector<16x16xf32>
    %c0_140 = arith.constant 0 : index
    %c3_141 = arith.constant 3 : index
    %c0_142 = arith.constant 0 : index
    %c0_143 = arith.constant 0 : index
    %155 = vector.load %arg18[%c0_140, %c3_141, %c0_142, %c0_143] : memref<1x4x16x64xf32, #tpu.memory_space<vmem>>, vector<1x1x16x64xf32>
    %156 = vector.shape_cast %155 : vector<1x1x16x64xf32> to vector<16x64xf32>
    %cst_144 = arith.constant dense<0.000000e+00> : vector<16x64xf32>
    %157 = tpu.matmul %154, %156, %cst_144 {dimension_numbers = #tpu.dot_dimension_numbers<[1], [0], [0], [1], [0, 0, 1, 1], [], []>} : vector<16x16xf32>, vector<16x64xf32>, vector<16x64xf32> -> vector<16x64xf32>
    %158 = arith.addf %120, %157 : vector<16x64xf32>
    %159 = arith.addf %3, %158 : vector<16x64xf32>
    %c0_145 = arith.constant 0 : index
    %c1_146 = arith.constant 1 : index
    %c0_147 = arith.constant 0 : index
    %160 = vector.load %arg19[%c0_145, %c1_146, %c0_147] : memref<1x8x64xf32, #tpu.memory_space<vmem>>, vector<1x1x64xf32>
    %161 = vector.shape_cast %160 : vector<1x1x64xf32> to vector<1x64xf32>
    %c0_148 = arith.constant 0 : index
    %c2_149 = arith.constant 2 : index
    %c0_150 = arith.constant 0 : index
    %162 = vector.load %arg19[%c0_148, %c2_149, %c0_150] : memref<1x8x64xf32, #tpu.memory_space<vmem>>, vector<1x1x64xf32>
    %163 = vector.shape_cast %162 : vector<1x1x64xf32> to vector<1x64xf32>
    %cst_151 = arith.constant dense<0.000000e+00> : vector<16xf32>
    %164 = vector.multi_reduction <add>, %159, %cst_151 [1] : vector<16x64xf32> to vector<16xf32>
    %165 = vector.shape_cast %164 : vector<16xf32> to vector<16x1xf32>
    %cst_152 = arith.constant 6.400000e+01 : f32
    %166 = vector.broadcast %cst_152 : f32 to vector<16x1xf32>
    %167 = arith.divf %165, %166 : vector<16x1xf32>
    %168 = vector.broadcast %167 : vector<16x1xf32> to vector<16x64xf32>
    %169 = arith.subf %159, %168 : vector<16x64xf32>
    %170 = arith.mulf %169, %169 : vector<16x64xf32>
    %cst_153 = arith.constant dense<0.000000e+00> : vector<16xf32>
    %171 = vector.multi_reduction <add>, %170, %cst_153 [1] : vector<16x64xf32> to vector<16xf32>
    %172 = vector.shape_cast %171 : vector<16xf32> to vector<16x1xf32>
    %cst_154 = arith.constant 6.400000e+01 : f32
    %173 = vector.broadcast %cst_154 : f32 to vector<16x1xf32>
    %174 = arith.divf %172, %173 : vector<16x1xf32>
    %cst_155 = arith.constant 9.99999974E-6 : f32
    %175 = vector.broadcast %cst_155 : f32 to vector<16x1xf32>
    %176 = arith.addf %174, %175 : vector<16x1xf32>
    %177 = math.rsqrt %176 : vector<16x1xf32>
    %178 = vector.broadcast %177 : vector<16x1xf32> to vector<16x64xf32>
    %179 = arith.mulf %169, %178 : vector<16x64xf32>
    %180 = vector.broadcast %161 : vector<1x64xf32> to vector<16x64xf32>
    %181 = arith.mulf %179, %180 : vector<16x64xf32>
    %182 = vector.broadcast %163 : vector<1x64xf32> to vector<16x64xf32>
    %183 = arith.addf %181, %182 : vector<16x64xf32>
    %184 = arith.truncf %183 : vector<16x64xf32> to vector<16x64xbf16>
    %c0_156 = arith.constant 0 : index
    %c0_157 = arith.constant 0 : index
    %c0_158 = arith.constant 0 : index
    %185 = vector.load %arg21[%c0_156, %c0_157, %c0_158] : memref<1x64x2048xbf16, #tpu.memory_space<vmem>>, vector<1x64x2048xbf16>
    %186 = vector.shape_cast %185 : vector<1x64x2048xbf16> to vector<64x2048xbf16>
    %cst_159 = arith.constant dense<0.000000e+00> : vector<16x2048xf32>
    %187 = tpu.matmul %184, %186, %cst_159 {dimension_numbers = #tpu.dot_dimension_numbers<[1], [0], [0], [1], [0, 0, 1, 1], [], []>} : vector<16x64xbf16>, vector<64x2048xbf16>, vector<16x2048xf32> -> vector<16x2048xf32>
    %c0_160 = arith.constant 0 : index
    %c0_161 = arith.constant 0 : index
    %c0_162 = arith.constant 0 : index
    %188 = vector.load %arg20[%c0_160, %c0_161, %c0_162] : memref<1x1x2048xf32, #tpu.memory_space<vmem>>, vector<1x1x2048xf32>
    %189 = vector.shape_cast %188 : vector<1x1x2048xf32> to vector<1x2048xf32>
    %190 = vector.broadcast %189 : vector<1x2048xf32> to vector<16x2048xf32>
    %191 = arith.addf %187, %190 : vector<16x2048xf32>
    %cst_163 = arith.constant 0.000000e+00 : f32
    %192 = vector.broadcast %cst_163 : f32 to vector<16x2048xf32>
    %193 = arith.maximumf %191, %192 : vector<16x2048xf32>
    %194 = arith.truncf %193 : vector<16x2048xf32> to vector<16x2048xbf16>
    %c0_164 = arith.constant 0 : index
    %c0_165 = arith.constant 0 : index
    %c0_166 = arith.constant 0 : index
    %195 = vector.load %arg22[%c0_164, %c0_165, %c0_166] : memref<1x2048x64xbf16, #tpu.memory_space<vmem>>, vector<1x2048x64xbf16>
    %196 = vector.shape_cast %195 : vector<1x2048x64xbf16> to vector<2048x64xbf16>
    %cst_167 = arith.constant dense<0.000000e+00> : vector<16x64xf32>
    %197 = tpu.matmul %194, %196, %cst_167 {dimension_numbers = #tpu.dot_dimension_numbers<[1], [0], [0], [1], [0, 0, 1, 1], [], []>} : vector<16x2048xbf16>, vector<2048x64xbf16>, vector<16x64xf32> -> vector<16x64xf32>
    %c0_168 = arith.constant 0 : index
    %c3_169 = arith.constant 3 : index
    %c0_170 = arith.constant 0 : index
    %198 = vector.load %arg19[%c0_168, %c3_169, %c0_170] : memref<1x8x64xf32, #tpu.memory_space<vmem>>, vector<1x1x64xf32>
    %199 = vector.shape_cast %198 : vector<1x1x64xf32> to vector<1x64xf32>
    %200 = vector.broadcast %199 : vector<1x64xf32> to vector<16x64xf32>
    %201 = arith.addf %197, %200 : vector<16x64xf32>
    %202 = arith.addf %183, %201 : vector<16x64xf32>
    %c0_171 = arith.constant 0 : index
    %c4_172 = arith.constant 4 : index
    %c0_173 = arith.constant 0 : index
    %203 = vector.load %arg19[%c0_171, %c4_172, %c0_173] : memref<1x8x64xf32, #tpu.memory_space<vmem>>, vector<1x1x64xf32>
    %204 = vector.shape_cast %203 : vector<1x1x64xf32> to vector<1x64xf32>
    %c0_174 = arith.constant 0 : index
    %c5_175 = arith.constant 5 : index
    %c0_176 = arith.constant 0 : index
    %205 = vector.load %arg19[%c0_174, %c5_175, %c0_176] : memref<1x8x64xf32, #tpu.memory_space<vmem>>, vector<1x1x64xf32>
    %206 = vector.shape_cast %205 : vector<1x1x64xf32> to vector<1x64xf32>
    %cst_177 = arith.constant dense<0.000000e+00> : vector<16xf32>
    %207 = vector.multi_reduction <add>, %202, %cst_177 [1] : vector<16x64xf32> to vector<16xf32>
    %208 = vector.shape_cast %207 : vector<16xf32> to vector<16x1xf32>
    %cst_178 = arith.constant 6.400000e+01 : f32
    %209 = vector.broadcast %cst_178 : f32 to vector<16x1xf32>
    %210 = arith.divf %208, %209 : vector<16x1xf32>
    %211 = vector.broadcast %210 : vector<16x1xf32> to vector<16x64xf32>
    %212 = arith.subf %202, %211 : vector<16x64xf32>
    %213 = arith.mulf %212, %212 : vector<16x64xf32>
    %cst_179 = arith.constant dense<0.000000e+00> : vector<16xf32>
    %214 = vector.multi_reduction <add>, %213, %cst_179 [1] : vector<16x64xf32> to vector<16xf32>
    %215 = vector.shape_cast %214 : vector<16xf32> to vector<16x1xf32>
    %cst_180 = arith.constant 6.400000e+01 : f32
    %216 = vector.broadcast %cst_180 : f32 to vector<16x1xf32>
    %217 = arith.divf %215, %216 : vector<16x1xf32>
    %cst_181 = arith.constant 9.99999974E-6 : f32
    %218 = vector.broadcast %cst_181 : f32 to vector<16x1xf32>
    %219 = arith.addf %217, %218 : vector<16x1xf32>
    %220 = math.rsqrt %219 : vector<16x1xf32>
    %221 = vector.broadcast %220 : vector<16x1xf32> to vector<16x64xf32>
    %222 = arith.mulf %212, %221 : vector<16x64xf32>
    %223 = vector.broadcast %204 : vector<1x64xf32> to vector<16x64xf32>
    %224 = arith.mulf %222, %223 : vector<16x64xf32>
    %225 = vector.broadcast %206 : vector<1x64xf32> to vector<16x64xf32>
    %226 = arith.addf %224, %225 : vector<16x64xf32>
    %c0_182 = arith.constant 0 : index
    %c0_183 = arith.constant 0 : index
    %227 = vector.load %arg24[%c0_182, %c0_183] : memref<16x64xf32, #tpu.memory_space<vmem>>, vector<16x64xf32>
    tpu.vector_store %arg24[%c0_182, %c0_183], %226 {strides = array<i32>} : memref<16x64xf32, #tpu.memory_space<vmem>>, vector<16x64xf32>,
    %c1_i32 = arith.constant 1 : i32
    %228 = arith.cmpi eq, %arg0, %c1_i32 : i32
    %229 = arith.extui %228 : i1 to i32
    %c0_i32_184 = arith.constant 0 : i32
    %230 = arith.cmpi ne, %229, %c0_i32_184 : i32
    scf.if %230 {
      %c0_185 = arith.constant 0 : index
      %c0_186 = arith.constant 0 : index
      %231 = vector.load %arg6[%c0_185, %c0_186] : memref<64x64xf32, #tpu.memory_space<vmem>>, vector<64x64xf32>
      %cst_187 = arith.constant dense<0.000000e+00> : vector<16x64xf32>
      %232 = tpu.matmul %226, %231, %cst_187 {dimension_numbers = #tpu.dot_dimension_numbers<[1], [0], [0], [1], [0, 0, 1, 1], [], []>} : vector<16x64xf32>, vector<64x64xf32>, vector<16x64xf32> -> vector<16x64xf32>
      %c0_188 = arith.constant 0 : index
      %c0_189 = arith.constant 0 : index
      %233 = vector.load %arg7[%c0_188, %c0_189] : memref<1x64xf32, #tpu.memory_space<vmem>>, vector<1x64xf32>
      %234 = vector.broadcast %233 : vector<1x64xf32> to vector<16x64xf32>
      %235 = arith.addf %232, %234 : vector<16x64xf32>
      %cst_190 = arith.constant 0.000000e+00 : f32
      %236 = vector.broadcast %cst_190 : f32 to vector<16x64xf32>
      %237 = arith.maximumf %235, %236 : vector<16x64xf32>
      %c0_191 = arith.constant 0 : index
      %c0_192 = arith.constant 0 : index
      %238 = vector.load %arg8[%c0_191, %c0_192] : memref<64x16xf32, #tpu.memory_space<vmem>>, vector<64x16xf32>
      %cst_193 = arith.constant dense<0.000000e+00> : vector<16x16xf32>
      %239 = tpu.matmul %237, %238, %cst_193 {dimension_numbers = #tpu.dot_dimension_numbers<[1], [0], [0], [1], [0, 0, 1, 1], [], []>} : vector<16x64xf32>, vector<64x16xf32>, vector<16x16xf32> -> vector<16x16xf32>
      %c0_194 = arith.constant 0 : index
      %c0_195 = arith.constant 0 : index
      %240 = vector.load %arg9[%c0_194, %c0_195] : memref<1x16xf32, #tpu.memory_space<vmem>>, vector<1x16xf32>
      %241 = vector.broadcast %240 : vector<1x16xf32> to vector<16x16xf32>
      %242 = arith.addf %239, %241 : vector<16x16xf32>
      %cst_196 = arith.constant 0.000000e+00 : f32
      %243 = vector.broadcast %cst_196 : f32 to vector<16x16xf32>
      %244 = arith.maximumf %242, %243 : vector<16x16xf32>
      %c0_197 = arith.constant 0 : index
      %c0_198 = arith.constant 0 : index
      %245 = vector.load %arg12[%c0_197, %c0_198] : memref<16x128xf32, #tpu.memory_space<vmem>>, vector<16x128xf32>
      %cst_199 = arith.constant dense<0.000000e+00> : vector<16x128xf32>
      %246 = tpu.matmul %244, %245, %cst_199 {dimension_numbers = #tpu.dot_dimension_numbers<[1], [0], [0], [1], [0, 0, 1, 1], [], []>} : vector<16x16xf32>, vector<16x128xf32>, vector<16x128xf32> -> vector<16x128xf32>
      %c0_200 = arith.constant 0 : index
      %c0_201 = arith.constant 0 : index
      %247 = vector.load %arg13[%c0_200, %c0_201] : memref<16x128xf32, #tpu.memory_space<vmem>>, vector<16x128xf32>
      %248 = arith.mulf %246, %247 : vector<16x128xf32>
      %c0_202 = arith.constant 0 : index
      %c0_203 = arith.constant 0 : index
      %249 = vector.load %arg10[%c0_202, %c0_203] : memref<128x4xf32, #tpu.memory_space<vmem>>, vector<128x4xf32>
      %cst_204 = arith.constant dense<0.000000e+00> : vector<16x4xf32>
      %250 = tpu.matmul %248, %249, %cst_204 {dimension_numbers = #tpu.dot_dimension_numbers<[1], [0], [0], [1], [0, 0, 1, 1], [], []>} : vector<16x128xf32>, vector<128x4xf32>, vector<16x4xf32> -> vector<16x4xf32>
      %c0_205 = arith.constant 0 : index
      %c0_206 = arith.constant 0 : index
      %251 = vector.load %arg14[%c0_205, %c0_206] : memref<2x16xf32, #tpu.memory_space<vmem>>, vector<2x16xf32>
      %cst_207 = arith.constant dense<0.000000e+00> : vector<2x4xf32>
      %252 = tpu.matmul %251, %250, %cst_207 {dimension_numbers = #tpu.dot_dimension_numbers<[1], [0], [0], [1], [0, 0, 1, 1], [], []>} : vector<2x16xf32>, vector<16x4xf32>, vector<2x4xf32> -> vector<2x4xf32>
      %c0_208 = arith.constant 0 : index
      %c0_209 = arith.constant 0 : index
      %253 = vector.load %arg11[%c0_208, %c0_209] : memref<1x4xf32, #tpu.memory_space<vmem>>, vector<1x4xf32>
      %254 = vector.broadcast %253 : vector<1x4xf32> to vector<2x4xf32>
      %255 = arith.addf %252, %254 : vector<2x4xf32>
      %c0_210 = arith.constant 0 : index
      %c0_211 = arith.constant 0 : index
      %256 = vector.load %arg23[%c0_210, %c0_211] : memref<2x4xf32, #tpu.memory_space<vmem>>, vector<2x4xf32>
      tpu.vector_store %arg23[%c0_210, %c0_211], %255 {strides = array<i32>} : memref<2x4xf32, #tpu.memory_space<vmem>>, vector<2x4xf32>,
    } else {
    }
    return
  }
  func.func @transform_0(%arg0: i32) -> (i32, i32) {
    %c0_i32 = arith.constant 0 : i32
    %c0_i32_0 = arith.constant 0 : i32
    %c0_i32_1 = arith.constant 0 : i32
    return %c0_i32, %c0_i32_0 : i32, i32
  }
  func.func @transform_1(%arg0: i32) -> (i32, i32) {
    %c0_i32 = arith.constant 0 : i32
    %c0_i32_0 = arith.constant 0 : i32
    %c0_i32_1 = arith.constant 0 : i32
    return %c0_i32, %c0_i32_0 : i32, i32
  }
  func.func @transform_2(%arg0: i32) -> (i32, i32) {
    %c0_i32 = arith.constant 0 : i32
    %c0_i32_0 = arith.constant 0 : i32
    %c0_i32_1 = arith.constant 0 : i32
    return %c0_i32, %c0_i32_0 : i32, i32
  }
  func.func @transform_3(%arg0: i32) -> (i32, i32) {
    %c0_i32 = arith.constant 0 : i32
    %c0_i32_0 = arith.constant 0 : i32
    %c0_i32_1 = arith.constant 0 : i32
    return %c0_i32, %c0_i32_0 : i32, i32
  }
  func.func @transform_4(%arg0: i32) -> (i32, i32) {
    %c0_i32 = arith.constant 0 : i32
    %c0_i32_0 = arith.constant 0 : i32
    %c0_i32_1 = arith.constant 0 : i32
    return %c0_i32, %c0_i32_0 : i32, i32
  }
  func.func @transform_5(%arg0: i32) -> (i32, i32) {
    %c0_i32 = arith.constant 0 : i32
    %c0_i32_0 = arith.constant 0 : i32
    %c0_i32_1 = arith.constant 0 : i32
    return %c0_i32, %c0_i32_0 : i32, i32
  }
  func.func @transform_6(%arg0: i32) -> (i32, i32) {
    %c0_i32 = arith.constant 0 : i32
    %c0_i32_0 = arith.constant 0 : i32
    %c0_i32_1 = arith.constant 0 : i32
    return %c0_i32, %c0_i32_0 : i32, i32
  }
  func.func @transform_7(%arg0: i32) -> (i32, i32) {
    %c0_i32 = arith.constant 0 : i32
    %c0_i32_0 = arith.constant 0 : i32
    %c0_i32_1 = arith.constant 0 : i32
    return %c0_i32, %c0_i32_0 : i32, i32
  }
  func.func @transform_8(%arg0: i32) -> (i32, i32) {
    %c0_i32 = arith.constant 0 : i32
    %c0_i32_0 = arith.constant 0 : i32
    %c0_i32_1 = arith.constant 0 : i32
    return %c0_i32, %c0_i32_0 : i32, i32
  }
  func.func @transform_9(%arg0: i32) -> (i32, i32) {
    %c0_i32 = arith.constant 0 : i32
    %c0_i32_0 = arith.constant 0 : i32
    %c0_i32_1 = arith.constant 0 : i32
    return %c0_i32, %c0_i32_0 : i32, i32
  }
  func.func @transform_10(%arg0: i32) -> (i32, i32) {
    %c0_i32 = arith.constant 0 : i32
    %c0_i32_0 = arith.constant 0 : i32
    %c0_i32_1 = arith.constant 0 : i32
    return %c0_i32, %c0_i32_0 : i32, i32
  }
  func.func @transform_11(%arg0: i32) -> (i32, i32) {
    %c0_i32 = arith.constant 0 : i32
    %c0_i32_0 = arith.constant 0 : i32
    %c0_i32_1 = arith.constant 0 : i32
    return %c0_i32, %c0_i32_0 : i32, i32
  }
  func.func @transform_12(%arg0: i32) -> (i32, i32) {
    %c0_i32 = arith.constant 0 : i32
    %c0_i32_0 = arith.constant 0 : i32
    %c0_i32_1 = arith.constant 0 : i32
    return %c0_i32, %c0_i32_0 : i32, i32
  }
  func.func @transform_13(%arg0: i32) -> (i32, i32) {
    %c0_i32 = arith.constant 0 : i32
    %c0_i32_0 = arith.constant 0 : i32
    %c0_i32_1 = arith.constant 0 : i32
    return %c0_i32, %c0_i32_0 : i32, i32
  }
  func.func @transform_14(%arg0: i32) -> (i32, i32) {
    %c0_i32 = arith.constant 0 : i32
    %c0_i32_0 = arith.constant 0 : i32
    %c0_i32_1 = arith.constant 0 : i32
    return %c0_i32, %c0_i32_0 : i32, i32
  }
  func.func @transform_15(%arg0: i32) -> (i32, i32, i32, i32) {
    %c0_i32 = arith.constant 0 : i32
    %c0_i32_0 = arith.constant 0 : i32
    %c0_i32_1 = arith.constant 0 : i32
    %c0_i32_2 = arith.constant 0 : i32
    return %arg0, %c0_i32, %c0_i32_0, %c0_i32_1 : i32, i32, i32, i32
  }
  func.func @transform_16(%arg0: i32) -> (i32, i32, i32, i32) {
    %c0_i32 = arith.constant 0 : i32
    %c0_i32_0 = arith.constant 0 : i32
    %c0_i32_1 = arith.constant 0 : i32
    %c0_i32_2 = arith.constant 0 : i32
    return %arg0, %c0_i32, %c0_i32_0, %c0_i32_1 : i32, i32, i32, i32
  }
  func.func @transform_17(%arg0: i32) -> (i32, i32, i32, i32) {
    %c0_i32 = arith.constant 0 : i32
    %c0_i32_0 = arith.constant 0 : i32
    %c0_i32_1 = arith.constant 0 : i32
    %c0_i32_2 = arith.constant 0 : i32
    return %arg0, %c0_i32, %c0_i32_0, %c0_i32_1 : i32, i32, i32, i32
  }
  func.func @transform_18(%arg0: i32) -> (i32, i32, i32) {
    %c0_i32 = arith.constant 0 : i32
    %c0_i32_0 = arith.constant 0 : i32
    %c0_i32_1 = arith.constant 0 : i32
    return %arg0, %c0_i32, %c0_i32_0 : i32, i32, i32
  }
  func.func @transform_19(%arg0: i32) -> (i32, i32, i32) {
    %c0_i32 = arith.constant 0 : i32
    %c0_i32_0 = arith.constant 0 : i32
    %c0_i32_1 = arith.constant 0 : i32
    return %arg0, %c0_i32, %c0_i32_0 : i32, i32, i32
  }
  func.func @transform_20(%arg0: i32) -> (i32, i32, i32) {
    %c0_i32 = arith.constant 0 : i32
    %c0_i32_0 = arith.constant 0 : i32
    %c0_i32_1 = arith.constant 0 : i32
    return %arg0, %c0_i32, %c0_i32_0 : i32, i32, i32
  }
  func.func @transform_21(%arg0: i32) -> (i32, i32, i32) {
    %c0_i32 = arith.constant 0 : i32
    %c0_i32_0 = arith.constant 0 : i32
    %c0_i32_1 = arith.constant 0 : i32
    return %arg0, %c0_i32, %c0_i32_0 : i32, i32, i32
  }
  func.func @transform_22(%arg0: i32) -> (i32, i32) {
    %c0_i32 = arith.constant 0 : i32
    %c0_i32_0 = arith.constant 0 : i32
    %c0_i32_1 = arith.constant 0 : i32
    return %c0_i32, %c0_i32_0 : i32, i32
  }
}

</mosaic_0001>

<bundles_post_ra>
// kernel: tile.24
= control target key start
LH: loop header
LB: loop body
LE: loop exit
PB: predicated region body
PF: predicated region fallthrough
CT: control target
= control target key end

     0   :  { %vm4_vm0 = vcmask 1047556   ;;  %s209_s14 = smov 96   ;;  %s210_s19 = smov 112   ;;  %vm6_vm1 = vcmask 130048   ;;  %vm25_vm2 = vcmask 1048448   ;;  %vm46_vm3 = vcmask 917248   ;;  %s388_s0 = inlined_call_operand.vmem [shape: f32[16,8,16], index: 0, kind: input, shape index: {}]   ;;  %s389_s1 = inlined_call_operand.vmem [shape: f32[16,128], index: 1, kind: output, shape index: {}]  }
   0x1   :  { %v172_v0 = vld [vmem:[%s388_s0 + $0x6] ss:$8 sm:$0xf]   ;;  %v167_v3 = vld [vmem:[%s388_s0 + $0x7] ss:$8 sm:$0xf]  }
   0x2   :  { %v173_v1 = vld [vmem:[%s388_s0 + $0x6] ss:$8 sm:$0xf0]   ;;  %v168_v4 = vld [vmem:[%s388_s0 + $0x7] ss:$8 sm:$0xf0]  }
   0x3   :  { %v43_v2 = vsel %vm4_vm0, %v173_v1, %v172_v0  ;;  %v22_v5 = vsel %vm4_vm0, %v168_v4, %v167_v3  ;;  %v174_v6 = vld [vmem:[%s388_s0 + $0x46] ss:$8 sm:$0xf]   ;;  %v169_v9 = vld [vmem:[%s388_s0 + $0x47] ss:$8 sm:$0xf]  }
   0x4   :  { %44 = vrot.lane.b32.xlu1 %v43_v2, %s209_s14  ;;  %v175_v7 = vld [vmem:[%s388_s0 + $0x46] ss:$8 sm:$0xf0]   ;;  %23 = vrot.lane.b32.xlu0 %v22_v5, %s210_s19  ;;  %v170_v10 = vld [vmem:[%s388_s0 + $0x47] ss:$8 sm:$0xf0]  }
   0x5   :  { %v53_v8 = vsel %vm4_vm0, %v175_v7, %v174_v6  ;;  %v32_v11 = vsel %vm4_vm0, %v170_v10, %v169_v9  ;;  %v179_v12 = vld [vmem:[%s388_s0 + $0x45] ss:$8 sm:$0xf]   ;;  %v184_v18 = vld [vmem:[%s388_s0 + $0x44] ss:$8 sm:$0xf]  }
   0x6   :  { %v180_v13 = vld [vmem:[%s388_s0 + $0x45] ss:$8 sm:$0xf0]   ;;  %v185_v19 = vld [vmem:[%s388_s0 + $0x44] ss:$8 sm:$0xf0]  }
   0x7   :  { %v177_v14 = vld [vmem:[%s388_s0 + $0x5] ss:$8 sm:$0xf]   ;;  %v74_v16 = vsel %vm4_vm0, %v180_v13, %v179_v12  ;;  %v182_v20 = vld [vmem:[%s388_s0 + $0x4] ss:$8 sm:$0xf]   ;;  %v95_v22 = vsel %vm4_vm0, %v185_v19, %v184_v18 }
   0x8   :  { %54 = vrot.lane.b32.xlu1 %v53_v8, %s209_s14  ;;  %v178_v15 = vld [vmem:[%s388_s0 + $0x5] ss:$8 sm:$0xf0]   ;;  %33 = vrot.lane.b32.xlu0 %v32_v11, %s210_s19  ;;  %v183_v21 = vld [vmem:[%s388_s0 + $0x4] ss:$8 sm:$0xf0]  }
   0x9   :  { %v64_v17 = vsel %vm4_vm0, %v178_v15, %v177_v14  ;;  %s211_s11 = smov 80   ;;  %v85_v23 = vsel %vm4_vm0, %v183_v21, %v182_v20  ;;  %v189_v24 = vld [vmem:[%s388_s0 + $0x43] ss:$8 sm:$0xf]   ;;  %s212_s20 = smov 64   ;;  %vm67_vm4 = vcmask 786048  }
   0xa   :  { %v190_v25 = vld [vmem:[%s388_s0 + $0x43] ss:$8 sm:$0xf0]   ;;  %v194_v28 = vld [vmem:[%s388_s0 + $0x42] ss:$8 sm:$0xf]  }
   0xb   :  { %v187_v26 = vld [vmem:[%s388_s0 + $0x3] ss:$8 sm:$0xf]   ;;  %v195_v29 = vld [vmem:[%s388_s0 + $0x42] ss:$8 sm:$0xf0]   ;;  %v116_v30 = vsel %vm4_vm0, %v190_v25, %v189_v24 }
   0xc   :  { %75 = vrot.lane.b32.xlu1 %v74_v16, %s211_s11  ;;  %65 = vrot.lane.b32.xlu0 %v64_v17, %s211_s11  ;;  %v188_v27 = vld [vmem:[%s388_s0 + $0x3] ss:$8 sm:$0xf0]   ;;  %v192_v31 = vld [vmem:[%s388_s0 + $0x2] ss:$8 sm:$0xf]   ;;  %v137_v40 = vsel %vm4_vm0, %v195_v29, %v194_v28 }
   0xd   :  { %v2_v32 = vld [vmem:[%s388_s0] ss:$8 sm:$0xf]   ;;  %v106_v33 = vsel %vm4_vm0, %v188_v27, %v187_v26  ;;  %v193_v36 = vld [vmem:[%s388_s0 + $0x2] ss:$8 sm:$0xf0]  }
   0xe   :  { %v3_v34 = vld [vmem:[%s388_s0] ss:$8 sm:$0xf0]   ;;  %s213_s8 = smov 48   ;;  %v127_v41 = vsel %vm4_vm0, %v193_v36, %v192_v31  ;;  %s215_s21 = smov 16   ;;  %vm88_vm5 = vcmask 654848  }
   0xf   :  { %v164_v35 = vld [vmem:[%s388_s0 + $0x40] ss:$8 sm:$0xf]   ;;  %v5_v37 = vsel %vm4_vm0, %v3_v34, %v2_v32  ;;  %v199_v42 = vld [vmem:[%s388_s0 + $0x41] ss:$8 sm:$0xf]  }
  0x10   :  { %96 = vrot.lane.b32.xlu1 %v95_v22, %s212_s20  ;;  %86 = vrot.lane.b32.xlu0 %v85_v23, %s212_s20  ;;  %v165_v38 = vld [vmem:[%s388_s0 + $0x40] ss:$8 sm:$0xf0]   ;;  %7 = vst.msk [vmem:[%s389_s1] sm:$0xff] %vm6_vm1, %v5_v37   ;;  %vm109_vm6 = vcmask 523648   ;;  %vm130_vm7 = vcmask 392448  }
  0x11   :  { %v13_v39 = vsel %vm4_vm0, %v165_v38, %v164_v35  ;;  %v200_v43 = vld [vmem:[%s388_s0 + $0x41] ss:$8 sm:$0xf0]   ;;  %vm151_vm8 = vcmask 261248  }
  0x12   :  { %166 = vst.msk [vmem:[%s389_s1 + $0x8] sm:$0xff] %vm6_vm1, %v13_v39   ;;  %v197_v44 = vld [vmem:[%s388_s0 + $0x1] ss:$8 sm:$0xf]   ;;  %v158_v46 = vsel %vm4_vm0, %v200_v43, %v199_v42 }
  0x13   :  { %v198_v45 = vld [vmem:[%s388_s0 + $0x1] ss:$8 sm:$0xf0]   ;;  %s214_s0 = smov 32  }
  0x14   :  { %117 = vrot.lane.b32.xlu1 %v116_v30, %s213_s8  ;;  %107 = vrot.lane.b32.xlu0 %v106_v33, %s213_s8  ;;  %v148_v47 = vsel %vm4_vm0, %v198_v45, %v197_v44 }
  0x18   :  { %138 = vrot.lane.b32.xlu1 %v137_v40, %s214_s0  ;;  %128 = vrot.lane.b32.xlu0 %v127_v41, %s214_s0 }
  0x1c   :  { %159 = vrot.lane.b32.xlu1 %v158_v46, %s215_s21  ;;  %149 = vrot.lane.b32.xlu0 %v148_v47, %s215_s21 }
  0x76   :  { %v45_v48 = vpop.permute.xlu1 %44   ;;  %v24_v49 = vpop.permute.xlu0 %23  }
  0x77   :  { %26 = vst.msk [vmem:[%s389_s1] sm:$0xff] %vm25_vm2, %v24_v49  }
  0x78   :  { %47 = vst.msk [vmem:[%s389_s1] sm:$0xff] %vm46_vm3, %v45_v48  }
  0x7a   :  { %v55_v50 = vpop.permute.xlu1 %54   ;;  %v34_v51 = vpop.permute.xlu0 %33  }
  0x7b   :  { %171 = vst.msk [vmem:[%s389_s1 + $0x8] sm:$0xff] %vm25_vm2, %v34_v51  }
  0x7c   :  { %176 = vst.msk [vmem:[%s389_s1 + $0x8] sm:$0xff] %vm46_vm3, %v55_v50  }
  0x7e   :  { %v76_v52 = vpop.permute.xlu1 %75   ;;  %v66_v53 = vpop.permute.xlu0 %65  }
  0x7f   :  { %181 = vst.msk [vmem:[%s389_s1 + $0x8] sm:$0xff] %vm67_vm4, %v76_v52   ;;  %68 = vst.msk [vmem:[%s389_s1] sm:$0xff] %vm67_vm4, %v66_v53  }
  0x82   :  { %v97_v54 = vpop.permute.xlu1 %96   ;;  %v87_v55 = vpop.permute.xlu0 %86  }
  0x83   :  { %186 = vst.msk [vmem:[%s389_s1 + $0x8] sm:$0xff] %vm88_vm5, %v97_v54   ;;  %89 = vst.msk [vmem:[%s389_s1] sm:$0xff] %vm88_vm5, %v87_v55  }
  0x86   :  { %v118_v56 = vpop.permute.xlu1 %117   ;;  %v108_v57 = vpop.permute.xlu0 %107  }
  0x87   :  { %191 = vst.msk [vmem:[%s389_s1 + $0x8] sm:$0xff] %vm109_vm6, %v118_v56   ;;  %110 = vst.msk [vmem:[%s389_s1] sm:$0xff] %vm109_vm6, %v108_v57  }
  0x8a   :  { %v139_v58 = vpop.permute.xlu1 %138   ;;  %v129_v59 = vpop.permute.xlu0 %128  }
  0x8b   :  { %196 = vst.msk [vmem:[%s389_s1 + $0x8] sm:$0xff] %vm130_vm7, %v139_v58   ;;  %131 = vst.msk [vmem:[%s389_s1] sm:$0xff] %vm130_vm7, %v129_v59  }
  0x8e   :  { %v160_v60 = vpop.permute.xlu1 %159   ;;  %v150_v61 = vpop.permute.xlu0 %149  }
  0x8f   :  { %201 = vst.msk [vmem:[%s389_s1 + $0x8] sm:$0xff] %vm151_vm8, %v160_v60   ;;  %152 = vst.msk [vmem:[%s389_s1] sm:$0xff] %vm151_vm8, %v150_v61  }

// kernel: tfmodel_forward.1
= control target key start
LH: loop header
LB: loop body
LE: loop exit
PB: predicated region body
PF: predicated region fallthrough
CT: control target
= control target key end

     0   :  { %s8496_s0 = inlined_call_operand.vmem [shape: f32[16,5], index: 0, kind: input, shape index: {}]   ;;  %s8497_s1 = inlined_call_operand.vmem [shape: f32[5,32], index: 1, kind: input, shape index: {}]   ;;  %s8498_s2 = inlined_call_operand.vmem [shape: f32[1,32], index: 2, kind: input, shape index: {}]   ;;  %s8499_s3 = inlined_call_operand.vmem [shape: f32[32,64], index: 3, kind: input, shape index: {}]   ;;  %s8500_s4 = inlined_call_operand.vmem [shape: f32[16,64], index: 4, kind: input, shape index: {}]   ;;  %s8501_s5 = inlined_call_operand.vmem [shape: f32[64,64], index: 5, kind: input, shape index: {}]   ;;  %s8502_s6 = inlined_call_operand.vmem [shape: f32[1,64], index: 6, kind: input, shape index: {}]   ;;  %s8503_s7 = inlined_call_operand.vmem [shape: f32[64,16], index: 7, kind: input, shape index: {}]   ;;  %s8504_s8 = inlined_call_operand.vmem [shape: f32[1,16], index: 8, kind: input, shape index: {}]   ;;  %s8505_s9 = inlined_call_operand.vmem [shape: f32[128,4], index: 9, kind: input, shape index: {}]   ;;  %s8506_s10 = inlined_call_operand.vmem [shape: f32[1,4], index: 10, kind: input, shape index: {}]   ;;  %s8507_s11 = inlined_call_operand.vmem [shape: f32[16,128], index: 11, kind: input, shape index: {}]   ;;  %s8508_s12 = inlined_call_operand.vmem [shape: f32[16,128], index: 12, kind: input, shape index: {}]   ;;  %s8509_s13 = inlined_call_operand.vmem [shape: f32[2,16], index: 13, kind: input, shape index: {}]   ;;  %s8510_s14 = inlined_call_operand.vmem [shape: f32[16,16], index: 14, kind: input, shape index: {}]   ;;  %s8511_s15 = inlined_call_operand.vmem [shape: f32[2,12,64,16], index: 15, kind: input, shape index: {}]   ;;  %s8512_s16 = inlined_call_operand.vmem [shape: f32[2,12,1,16], index: 16, kind: input, shape index: {}]   ;;  %s8513_s17 = inlined_call_operand.vmem [shape: f32[2,4,16,64], index: 17, kind: input, shape index: {}]   ;;  %s8514_s18 = inlined_call_operand.vmem [shape: f32[2,8,64], index: 18, kind: input, shape index: {}]   ;;  %s8515_s19 = inlined_call_operand.vmem [shape: f32[2,1,2048], index: 19, kind: input, shape index: {}]   ;;  %s8516_s20 = inlined_call_operand.vmem [shape: bf16[2,64,2048], index: 20, kind: input, shape index: {}]   ;;  %s8517_s21 = inlined_call_operand.vmem [shape: bf16[2,2048,64], index: 21, kind: input, shape index: {}]   ;;  %s8518_s22 = inlined_call_operand.hbm [shape: f32[2,4], index: 22, kind: output, shape index: {}]  }
   0x1   :  { %8525 = sst [smem:[#allocation7_spill]] %s8496_s0 }
   0x2   :  { %8526 = sst [smem:[#allocation8_spill]] %s8497_s1 }
   0x3   :  { %8527 = sst [smem:[#allocation9_spill]] %s8498_s2 }
   0x4   :  { %8528 = sst [smem:[#allocation10_spill]] %s8499_s3 }
   0x5   :  { %8529 = sst [smem:[#allocation11_spill]] %s8500_s4 }
   0x6   :  { %8530 = sst [smem:[#allocation12_spill]] %s8501_s5 }
   0x7   :  { %8531 = sst [smem:[#allocation13_spill]] %s8502_s6 }
   0x8   :  { %8532 = sst [smem:[#allocation14_spill]] %s8506_s10 }
   0x9   :  { %8533 = sst [smem:[#allocation15_spill]] %s8508_s12 }
   0xa   :  { %8534 = sst [smem:[#allocation16_spill]] %s8509_s13 }
   0xb   :  { %8535 = sst [smem:[#allocation17_spill]] %s8511_s15 }
   0xc   :  { %8536 = sst [smem:[#allocation18_spill]] %s8513_s17 }
   0xd   :  { %8537 = sst [smem:[#allocation19_spill]] %s8518_s22 }
   0xe   :  { %27 = vsyncpa [#allocation4], 0  ;;  %s7659_s3 = smov 0  }
   0xf LB: > { %8538 = sst [smem:[#allocation6_spill]] %s7538_s3  ;;  %s7665_s28 = sadd.s32 4294967295, %s7538_s3   ;;  %s7538_s3 = sphi %s7659_s3, %s33_s3  }
  0x10   : > { %p6087_p0 = scmp.ge.s32.totalorder %s7538_s3, 1  ;;  %p665_p1 = scmp.lt.s32.totalorder %s7538_s3, 3 }
  0x12   : > { %p666_p2 = pnand %p6087_p0, %p665_p1 }
  0x13   : > { %p749_p3 = scmp.lt.s32.totalorder (!%p666_p2), %s7665_s28, 1  ;;  %s8539_s17 = sld [smem:[#allocation18_spill]] (!%p666_p2) }
  0x14   : > { %669 = sbr.rel (%p666_p2) target bundleno = 6500 (0x1964), region = 108  ;;  %s8540_s15 = sld [smem:[#allocation17_spill]] (!%p666_p2) }
  0x15   : > { %p6097_p4 = scmp.ne.s32.totalorder (!%p666_p2), %s7665_s28, 0 }
  0x19   : > { %s750_s29 = scalar_select %p749_p3, %s7665_s28, 1 }
  0x1a   : > { %s8542_s1 = sld [smem:[#allocation7_spill]] (!%p6097_p4) }
  0x1b   : > { %s7314_s30 = smul.u32 768, %s750_s29  ;;  %s6498_s4 = sshll.u32 %s750_s29, 6 }
  0x1c   : > { %s7315_s0 = smul.u32 12, %s750_s29  ;;  %s7674_s5 = scalar_lea.vmem %s8539_s17, %s6498_s4 }
  0x1d   : > { %s7679_s25 = scalar_lea.vmem %s8540_s15, %s7314_s30  ;;  %s6091_s26 = sshll.u32 %s750_s29, 3 }
  0x1e   : > { %s7684_s3 = scalar_lea.vmem %s8512_s16, %s7315_s0  ;;  %s7689_s13 = scalar_lea.vmem %s8514_s18, %s6091_s26 }
  0x1f   : > { %s6092_s12 = sshll.u32 %s750_s29, 4  ;;  %s6499_s23 = sshll.u32 %s750_s29, 9 }
  0x20   : > { %s7694_s17 = scalar_lea.vmem %s8515_s19, %s6092_s12  ;;  %s7699_s6 = scalar_lea.vmem %s8516_s20, %s6499_s23 }
  0x21   : > { %s6500_s2 = sshll.u32 %s750_s29, 10  ;;  %785 = sbr.rel (%p6097_p4) target bundleno = 441 (0x1b9), region = 112 }
  0x22   : > { %s7704_s15 = scalar_lea.vmem %s8517_s21, %s6500_s2  ;;  %s8541_s26 = sld [smem:[#allocation8_spill]] (!%p6097_p4) }
  0x23   : > { %s8543_s2 = sld [smem:[#allocation10_spill]] (!%p6097_p4) }
  0x24   : > { %s8544_s29 = sld [smem:[#allocation9_spill]] (!%p6097_p4) }
  0x25   : > { %s8545_s0 = sld [smem:[#allocation11_spill]] (!%p6097_p4) }
  0x26   : > { %vm803_vm0 = vcmask 1044480   ;;  %v786_v1 = vld [vmem:[%s8542_s1] sm:$0xff]  ;;  %vm796_vm1 = vcmask 39936   ;;  %v787_v2 = vld [vmem:[%s8542_s1 + $0x8] sm:$0xff]  ;;  %vm890_vm2 = vcmask 261120   ;;  %vm972_vm3 = vcmask 523264  }
  0x27   : > { %6901 = vmatprep.mubr.msk.f32.mxu0 %vm796_vm1, %v786_v1 }
  0x28   : > { %v788_v0 = vld [vmem:[%s8541_s26] sm:$0x1f] }
  0x29   : > { %6899 = vmatprep.subr.msk.mxu0 %vm803_vm0, %v788_v0  ;;  %v887_v3 = vld [vmem:[%s8543_s2 + $0x18] sm:$0xff]  ;;  %v886_v4 = vld [vmem:[%s8543_s2 + $0x10] sm:$0xff]  ;;  %v885_v5 = vld [vmem:[%s8543_s2 + $0x8] sm:$0xff] }
  0x2a   : > { %6900 = vmatpush3.msk.msra.mxu0 %vm803_vm0, %v788_v0  ;;  %6904 = vmatprep.subr.mxu1 %v887_v3  ;;  %v884_v6 = vld [vmem:[%s8543_s2] sm:$0xff] }
  0x2b   : > { %6902 = vmatmul.mubr.msk.f32.vlgmr.msra.gmra.mxu0 %vm796_vm1, %v787_v2  ;;  %6905 = vmatpush3.msra.mxu1 %v887_v3  ;;  %v6098_v7 = vld [vmem:[%s8544_s29] ss:$0 sm:$0xff]  ;;  %v889_v14 = vld [vmem:[%s8545_s0 + $0x8] sm:$0xff] }
  0x2c   : > { %6906 = vmatprep.subr.mxu1 %v886_v4  ;;  %v888_v16 = vld [vmem:[%s8545_s0] sm:$0xff] }
  0x2d   : > { %6907 = vmatpush3.msra.mxu1 %v886_v4 }
  0x2e   : > { %6908 = vmatprep.subr.mxu1 %v885_v5 }
  0x2f   : > { %6909 = vmatpush3.msra.mxu1 %v885_v5 }
  0x30   : > { %6910 = vmatprep.subr.mxu1 %v884_v6 }
  0x31   : > { %6911 = vmatpush3.msra.mxu1 %v884_v6 }
  0xeb   : > { %v6903_v8 = vpop.f32.mrf.mxu0 }
  0xec   : > { %v879_v9 = vadd.f32 %v6903_v8, %v6098_v7 }
  0xed   : > { %v873_v10 = vpop.f32.mrf.mxu0 }
  0xee   : > { %v874_v11 = vadd.f32 %v6098_v7, %v873_v10  ;;  %v883_v13 = vmax.f32 %v879_v9, 0.0 }
  0xf0   : > { %v882_v12 = vmax.f32 %v874_v11, 0.0 }
  0xf2   : > { %6912 = vmatprep.mubr.msk.f32.mxu1 %vm890_vm2, %v882_v12 }
  0xf3   : > { %6913 = vmatmul.mubr.msk.f32.vlgmr.msra.gmra.mxu1 %vm890_vm2, %v883_v13 }
 0x1b3   : > { %v6914_v15 = vpop.f32.mrf.mxu1 }
 0x1b4   : > { %v969_v17 = vadd.f32 %v6914_v15, %v889_v14 }
 0x1b5   : > { %v963_v18 = vpop.f32.mrf.mxu1 }
 0x1b6   : > { %974 = vst.msk [vmem:[#allocation2 + $0x8] sm:$0xff] %vm972_vm3, %v969_v17  ;;  %v964_v19 = vadd.f32 %v963_v18, %v888_v16 }
 0x1b8   : > { %973 = vst.msk [vmem:[#allocation2] sm:$0xff] %vm972_vm3, %v964_v19 }
 0x1b9 PF: > { %v6114_v20 = vld [vmem:[%s7679_s25 + $0x138] sm:$0xff]  ;;  %v6113_v21 = vld [vmem:[%s7679_s25 + $0x130] sm:$0xff]  ;;  %v6112_v24 = vld [vmem:[%s7679_s25 + $0x128] sm:$0xff]  ;;  %vm993_vm4 = vcmask 523264   ;;  %vm1261_vm5 = vcmask 130048   ;;  %p6483_p5 = scmp.ne.s32.totalorder %s7665_s28, 1 }
 0x1ba   : > { %v985_v22 = vld [vmem:[%s7679_s25 + $0x38] sm:$0xff]  ;;  %6934 = vmatprep.subr.mxu1 %v6114_v20  ;;  %v984_v23 = vld [vmem:[%s7679_s25 + $0x30] sm:$0xff]  ;;  %v983_v25 = vld [vmem:[%s7679_s25 + $0x28] sm:$0xff]  ;;  %s8549_s22 = sld [smem:[#allocation15_spill]] (!%p6483_p5) }
 0x1bb   : > { %6915 = vmatprep.subr.mxu0 %v985_v22  ;;  %6935 = vmatpush3.msra.mxu1 %v6114_v20  ;;  %v6111_v26 = vld [vmem:[%s7679_s25 + $0x120] sm:$0xff]  ;;  %v6110_v28 = vld [vmem:[%s7679_s25 + $0x118] sm:$0xff]  ;;  %v6109_v30 = vld [vmem:[%s7679_s25 + $0x110] sm:$0xff] }
 0x1bc   : > { %6916 = vmatpush3.msra.mxu0 %v985_v22  ;;  %6936 = vmatprep.subr.mxu1 %v6113_v21  ;;  %v982_v27 = vld [vmem:[%s7679_s25 + $0x20] sm:$0xff]  ;;  %v981_v29 = vld [vmem:[%s7679_s25 + $0x18] sm:$0xff]  ;;  %v980_v31 = vld [vmem:[%s7679_s25 + $0x10] sm:$0xff] }
 0x1bd   : > { %6917 = vmatprep.subr.mxu0 %v984_v23  ;;  %6937 = vmatpush3.msra.mxu1 %v6113_v21  ;;  %v6108_v32 = vld [vmem:[%s7679_s25 + $0x108] sm:$0xff]  ;;  %v6107_v35 = vld [vmem:[%s7679_s25 + $0x100] sm:$0xff]  ;;  %v6126_v48 = vld [vmem:[%s7679_s25 + $0x238] sm:$0xff] }
 0x1be   : > { %6918 = vmatpush3.msra.mxu0 %v984_v23  ;;  %6938 = vmatprep.subr.mxu1 %v6112_v24  ;;  %v979_v33 = vld [vmem:[%s7679_s25 + $0x8] sm:$0xff]  ;;  %v978_v36 = vld [vmem:[%s7679_s25] sm:$0xff]  ;;  %v6125_v49 = vld [vmem:[%s7679_s25 + $0x230] sm:$0xff] }
 0x1bf   : > { %6919 = vmatprep.subr.mxu0 %v983_v25  ;;  %6939 = vmatpush3.msra.mxu1 %v6112_v24  ;;  %v7751_v34 = vld [vmem:[#allocation2] sm:$0xff]  ;;  %v7755_v37 = vld [vmem:[#allocation2 + $0x8] sm:$0xff]  ;;  %v6122_v52 = vld [vmem:[%s7679_s25 + $0x218] sm:$0xff] }
 0x1c0   : > { %6920 = vmatpush3.msra.mxu0 %v983_v25  ;;  %6940 = vmatprep.subr.mxu1 %v6111_v26  ;;  %v6116_v38 = vld [vmem:[%s7684_s3 + $0x4] ss:$0 sm:$0xff]  ;;  %v6104_v43 = vld [vmem:[%s7684_s3] ss:$0 sm:$0xff]  ;;  %v6124_v50 = vld [vmem:[%s7679_s25 + $0x228] sm:$0xff] }
 0x1c1   : > { %6921 = vmatprep.subr.mxu0 %v982_v27  ;;  %6941 = vmatpush3.msra.mxu1 %v6111_v26  ;;  %v6123_v51 = vld [vmem:[%s7679_s25 + $0x220] sm:$0xff]  ;;  %v6121_v53 = vld [vmem:[%s7679_s25 + $0x210] sm:$0xff]  ;;  %v6120_v54 = vld [vmem:[%s7679_s25 + $0x208] sm:$0xff] }
 0x1c2   : > { %6922 = vmatpush3.msra.mxu0 %v982_v27  ;;  %6942 = vmatprep.subr.mxu1 %v6110_v28  ;;  %v6119_v55 = vld [vmem:[%s7679_s25 + $0x200] sm:$0xff]  ;;  %v7795_v58 = vld [vmem:[%s8510_s14 + $0x8] sm:$0xff]  ;;  %v6159_v23 = vld [vmem:[%s7679_s25 + $0x178] sm:$0xff] }
 0x1c3   : > { %6923 = vmatprep.subr.mxu0 %v981_v29  ;;  %6943 = vmatpush3.msra.mxu1 %v6110_v28  ;;  %v7790_v57 = vld [vmem:[%s8510_s14] sm:$0xff]  ;;  %v6128_v11 = vld [vmem:[%s7684_s3 + $0x8] ss:$0 sm:$0xff]  ;;  %v6147_v24 = vld [vmem:[%s7679_s25 + $0x78] sm:$0xff] }
 0x1c4   : > { %6924 = vmatpush3.msra.mxu0 %v981_v29  ;;  %6944 = vmatprep.subr.mxu1 %v6109_v30  ;;  %v1453_v15 = vld [vmem:[%s7674_s5 + $0x8] sm:$0xff]  ;;  %v1452_v22 = vld [vmem:[%s7674_s5] sm:$0xff]  ;;  %v6146_v25 = vld [vmem:[%s7679_s25 + $0x70] sm:$0xff] }
 0x1c5   : > { %6925 = vmatprep.subr.mxu0 %v980_v31  ;;  %6945 = vmatpush3.msra.mxu1 %v6109_v30  ;;  %v6145_v26 = vld [vmem:[%s7679_s25 + $0x68] sm:$0xff]  ;;  %v6144_v27 = vld [vmem:[%s7679_s25 + $0x60] sm:$0xff]  ;;  %v6143_v28 = vld [vmem:[%s7679_s25 + $0x58] sm:$0xff] }
 0x1c6   : > { %6926 = vmatpush3.msra.mxu0 %v980_v31  ;;  %6946 = vmatprep.subr.mxu1 %v6108_v32  ;;  %v6142_v29 = vld [vmem:[%s7679_s25 + $0x50] sm:$0xff]  ;;  %v6141_v30 = vld [vmem:[%s7679_s25 + $0x48] sm:$0xff]  ;;  %v6140_v31 = vld [vmem:[%s7679_s25 + $0x40] sm:$0xff] }
 0x1c7   : > { %6927 = vmatprep.subr.mxu0 %v979_v33  ;;  %6947 = vmatpush3.msra.mxu1 %v6108_v32 }
 0x1c8   : > { %6950 = vmatprep.mubr.msk.f32.mxu1 %vm993_vm4, %v7751_v34  ;;  %6948 = vmatprep.subr.mxu1 %v6107_v35 }
 0x1c9   : > { %6928 = vmatpush3.msra.mxu0 %v979_v33  ;;  %6949 = vmatpush3.msra.mxu1 %v6107_v35  ;;  %v6158_v35 = vld [vmem:[%s7679_s25 + $0x170] sm:$0xff] }
 0x1ca   : > { %6929 = vmatprep.subr.mxu0 %v978_v36  ;;  %6951 = vmatmul.mubr.msk.f32.vlgmr.msra.gmra.mxu1 %vm993_vm4, %v7755_v37 }
 0x1cb   : > { %6930 = vmatpush3.msra.mxu0 %v978_v36  ;;  %6931 = vmatprep.mubr.msk.f32.mxu0 %vm993_vm4, %v7751_v34  ;;  %v6157_v36 = vld [vmem:[%s7679_s25 + $0x168] sm:$0xff] }
 0x1cc   : > { %6932 = vmatmul.mubr.msk.f32.vlgmr.msra.gmra.mxu0 %vm993_vm4, %v7755_v37  ;;  %6953 = vmatprep.subr.mxu0 %v6126_v48 }
 0x1cd   : > { %6969 = vmatprep.mubr.msk.f32.mxu0 %vm993_vm4, %v7751_v34  ;;  %6954 = vmatpush3.msra.mxu0 %v6126_v48 }
 0x1ce   : > { %6955 = vmatprep.subr.mxu0 %v6125_v49 }
 0x1cf   : > { %6956 = vmatpush3.msra.mxu0 %v6125_v49 }
 0x1d0   : > { %6957 = vmatprep.subr.mxu0 %v6124_v50 }
 0x1d1   : > { %6958 = vmatpush3.msra.mxu0 %v6124_v50  ;;  %v6161_v50 = vld [vmem:[%s7684_s3 + $0x5] ss:$0 sm:$0xff] }
 0x1d2   : > { %6959 = vmatprep.subr.mxu0 %v6123_v51 }
 0x1d3   : > { %6960 = vmatpush3.msra.mxu0 %v6123_v51 }
 0x1d4   : > { %6961 = vmatprep.subr.mxu0 %v6122_v52 }
 0x1d5   : > { %6962 = vmatpush3.msra.mxu0 %v6122_v52 }
 0x1d6   : > { %6963 = vmatprep.subr.mxu0 %v6121_v53 }
 0x1d7   : > { %6964 = vmatpush3.msra.mxu0 %v6121_v53 }
 0x1d8   : > { %6965 = vmatprep.subr.mxu0 %v6120_v54 }
 0x1d9   : > { %6966 = vmatpush3.msra.mxu0 %v6120_v54 }
 0x1da   : > { %6967 = vmatprep.subr.mxu0 %v6119_v55 }
 0x1db   : > { %6968 = vmatpush3.msra.mxu0 %v6119_v55  ;;  %v6171_v55 = vld [vmem:[%s7679_s25 + $0x278] sm:$0xff] }
 0x1dc   : > { %6970 = vmatmul.mubr.msk.f32.vlgmr.msra.gmra.mxu0 %vm993_vm4, %v7755_v37  ;;  %6993 = vmatprep.subr.mxu0 %v6147_v24 }
 0x1dd   : > { %7009 = vmatprep.mubr.msk.f32.mxu0 %vm993_vm4, %v7751_v34  ;;  %6994 = vmatpush3.msra.mxu0 %v6147_v24 }
 0x1de   : > { %6995 = vmatprep.subr.mxu0 %v6146_v25 }
 0x1df   : > { %6996 = vmatpush3.msra.mxu0 %v6146_v25 }
 0x1e0   : > { %6997 = vmatprep.subr.mxu0 %v6145_v26 }
 0x1e1   : > { %6998 = vmatpush3.msra.mxu0 %v6145_v26 }
 0x1e2   : > { %6999 = vmatprep.subr.mxu0 %v6144_v27 }
 0x1e3   : > { %7000 = vmatpush3.msra.mxu0 %v6144_v27  ;;  %v6182_v27 = vld [vmem:[%s7674_s5 + $0x10] sm:$0xff] }
 0x1e4   : > { %7001 = vmatprep.subr.mxu0 %v6143_v28 }
 0x1e5   : > { %7002 = vmatpush3.msra.mxu0 %v6143_v28  ;;  %v6205_v28 = vld [vmem:[%s7679_s25 + $0x1b8] sm:$0xff] }
 0x1e6   : > { %7003 = vmatprep.subr.mxu0 %v6142_v29 }
 0x1e7   : > { %7004 = vmatpush3.msra.mxu0 %v6142_v29  ;;  %v6193_v29 = vld [vmem:[%s7679_s25 + $0xb8] sm:$0xff] }
 0x1e8   : > { %7005 = vmatprep.subr.mxu0 %v6141_v30 }
 0x1e9   : > { %7006 = vmatpush3.msra.mxu0 %v6141_v30  ;;  %v6192_v30 = vld [vmem:[%s7679_s25 + $0xb0] sm:$0xff] }
 0x1ea   : > { %7007 = vmatprep.subr.mxu0 %v6140_v31 }
 0x1eb   : > { %7008 = vmatpush3.msra.mxu0 %v6140_v31  ;;  %v6191_v31 = vld [vmem:[%s7679_s25 + $0xa8] sm:$0xff] }
 0x1ec   : > { %7010 = vmatmul.mubr.msk.f32.vlgmr.msra.gmra.mxu0 %vm993_vm4, %v7755_v37  ;;  %7031 = vmatprep.subr.mxu0 %v6171_v55 }
 0x1ed   : > { %7047 = vmatprep.mubr.msk.f32.mxu0 %vm993_vm4, %v7751_v34  ;;  %7032 = vmatpush3.msra.mxu0 %v6171_v55 }
 0x28a   : > { %v6952_v39 = vpop.f32.mrf.mxu1 }
 0x28b   : > { %v1164_v40 = vadd.f32 %v6952_v39, %v6116_v38  ;;  %v6155_v39 = vld [vmem:[%s7679_s25 + $0x158] sm:$0xff] }
 0x28c   : > { %v1158_v41 = vpop.f32.mrf.mxu1  ;;  %v6933_v42 = vpop.f32.mrf.mxu0 }
 0x28d   : > { %v1159_v44 = vadd.f32 %v6116_v38, %v1158_v41  ;;  %6972 = vmatprep.subr.msk.mxu1 %vm1261_vm5, %v1164_v40  ;;  %v1072_v47 = vadd.f32 %v6933_v42, %v6104_v43  ;;  %v6156_v38 = vld [vmem:[%s7679_s25 + $0x160] sm:$0xff]  ;;  %v6153_v41 = vld [vmem:[%s7679_s25 + $0x148] sm:$0xff] }
 0x28e   : > { %6973 = vmatpush3.xpose.msk.msra.mxu1 %vm1261_vm5, %v1164_v40  ;;  %v1066_v45 = vpop.f32.mrf.mxu0  ;;  %v6154_v40 = vld [vmem:[%s7679_s25 + $0x150] sm:$0xff]  ;;  %v6152_v42 = vld [vmem:[%s7679_s25 + $0x140] sm:$0xff] }
 0x28f   : > { %v1067_v46 = vadd.f32 %v6104_v43, %v1066_v45  ;;  %6974 = vmatprep.subr.msk.mxu1 %vm1261_vm5, %v1159_v44 }
 0x291   : > { %6976 = vmatprep.mubr.msk.f32.mxu1 %vm1261_vm5, %v1067_v46 }
 0x292   : > { %6975 = vmatpush3.xpose.msk.msra.mxu1 %vm1261_vm5, %v1159_v44  ;;  %v6149_v44 = vld [vmem:[%s7684_s3 + $0x1] ss:$0 sm:$0xff] }
 0x295   : > { %6977 = vmatmul.mubr.msk.f32.vlgmr.msra.gmra.mxu1 %vm1261_vm5, %v1072_v47 }
 0x29c   : > { %v6971_v10 = vpop.f32.mrf.mxu0 }
 0x29d   : > { %v1256_v12 = vadd.f32 %v6971_v10, %v6128_v11 }
 0x29e   : > { %v1250_v13 = vpop.f32.mrf.mxu0 }
 0x29f   : > { %v1251_v14 = vadd.f32 %v6128_v11, %v1250_v13  ;;  %6979 = vmatprep.subr.mxu1 %v1256_v12 }
 0x2a0   : > { %6980 = vmatpush3.msra.mxu1 %v1256_v12 }
 0x2a1   : > { %6981 = vmatprep.subr.mxu1 %v1251_v14 }
 0x2a2   : > { %6982 = vmatpush3.msra.mxu1 %v1251_v14 }
 0x2a3   : > { %6986 = vmatprep.subr.mxu1 %v1453_v15 }
 0x2ac   : > { %v7011_v43 = vpop.f32.mrf.mxu0 }
 0x2ad   : > { %v1630_v45 = vadd.f32 %v7011_v43, %v6149_v44  ;;  %v6204_v43 = vld [vmem:[%s7679_s25 + $0x1b0] sm:$0xff] }
 0x2ae   : > { %v1624_v46 = vpop.f32.mrf.mxu0 }
 0x2af   : > { %v1625_v47 = vadd.f32 %v6149_v44, %v1624_v46  ;;  %v6203_v44 = vld [vmem:[%s7679_s25 + $0x1a8] sm:$0xff]  ;;  %v6201_v46 = vld [vmem:[%s7679_s25 + $0x198] sm:$0xff] }
 0x355   : > { %v6978_v56 = vpop.f32.mrf.mxu1 }
 0x356   : > { %v1346_v61 = vadd.f32 %v6978_v56, %v7795_v58  ;;  %v6170_v56 = vld [vmem:[%s7679_s25 + $0x270] sm:$0xff] }
 0x357   : > { %v1340_v59 = vpop.f32.mrf.mxu1  ;;  %7033 = vmatprep.subr.mxu0 %v6170_v56 }
 0x358   : > { %v1341_v60 = vadd.f32 %v1340_v59, %v7790_v57  ;;  %v1352_v63 = vsel %vm1261_vm5, %v1346_v61, -inf  ;;  %v6169_v59 = vld [vmem:[%s7679_s25 + $0x268] sm:$0xff]  ;;  %7034 = vmatpush3.msra.mxu0 %v6170_v56 }
 0x359   : > { %7035 = vmatprep.subr.mxu0 %v6169_v59 }
 0x35a   : > { %v1349_v62 = vsel %vm1261_vm5, %v1341_v60, -inf  ;;  %7036 = vmatpush3.msra.mxu0 %v6169_v59  ;;  %v6139_v59 = vld [vmem:[%s7689_s13] ss:$0 sm:$0xff] }
 0x35b   : > { %1350 = vmax.xlane.f32.xlu0 %v1349_v62  ;;  %v6166_v62 = vld [vmem:[%s7679_s25 + $0x250] sm:$0xff] }
 0x35f   : > { %1353 = vmax.xlane.f32.xlu0 %v1352_v63  ;;  %v6165_v63 = vld [vmem:[%s7679_s25 + $0x248] sm:$0xff] }
 0x3e4   : > { %v1351_v0 = vpop.xlane.xlu0 %1350 }
 0x3e5   : > { %v1355_v1 = vsub.f32 %v1341_v60, %v1351_v0  ;;  %v6168_v60 = vld [vmem:[%s7679_s25 + $0x260] sm:$0xff] }
 0x3e6   : > { %7037 = vmatprep.subr.mxu0 %v6168_v60  ;;  %v6164_v0 = vld [vmem:[%s7679_s25 + $0x240] sm:$0xff] }
 0x3e7   : > { %v1357_v2 = vmul.f32 1.442695, %v1355_v1  ;;  %7038 = vmatpush3.msra.mxu0 %v6168_v60 }
 0x3e8   : > { %v1354_v3 = vpop.xlane.xlu0 %1353 }
 0x3e9   : > { %7462 = vpow2.f32 %v1357_v2  ;;  %v1356_v4 = vsub.f32 %v1346_v61, %v1354_v3  ;;  %v6167_v61 = vld [vmem:[%s7679_s25 + $0x258] sm:$0xff] }
 0x3ea   : > { %7039 = vmatprep.subr.mxu0 %v6167_v61 }
 0x3eb   : > { %v1359_v5 = vmul.f32 1.442695, %v1356_v4  ;;  %7040 = vmatpush3.msra.mxu0 %v6167_v61 }
 0x3ec   : > { %7041 = vmatprep.subr.mxu0 %v6166_v62 }
 0x3ed   : > { %7464 = vpow2.f32 %v1359_v5  ;;  %7042 = vmatpush3.msra.mxu0 %v6166_v62 }
 0x3ee   : > { %7043 = vmatprep.subr.mxu0 %v6165_v63 }
 0x3ef   : > { %7044 = vmatpush3.msra.mxu0 %v6165_v63 }
 0x3f0   : > { %7045 = vmatprep.subr.mxu0 %v6164_v0 }
 0x3f1   : > { %7046 = vmatpush3.msra.mxu0 %v6164_v0 }
 0x3f2   : > { %7048 = vmatmul.mubr.msk.f32.vlgmr.msra.gmra.mxu0 %vm993_vm4, %v7755_v37  ;;  %7071 = vmatprep.subr.mxu0 %v6193_v29 }
 0x3f3   : > { %7087 = vmatprep.mubr.msk.f32.mxu0 %vm993_vm4, %v7751_v34  ;;  %7072 = vmatpush3.msra.mxu0 %v6193_v29 }
 0x3f4   : > { %7073 = vmatprep.subr.mxu0 %v6192_v30 }
 0x3f5   : > { %7074 = vmatpush3.msra.mxu0 %v6192_v30 }
 0x3f6   : > { %v7463_v6 = vpop.eup %7462  ;;  %7075 = vmatprep.subr.mxu0 %v6191_v31 }
 0x3f7   : > { %v1361_v7 = vsel %vm1261_vm5, %v7463_v6, 0.0  ;;  %7076 = vmatpush3.msra.mxu0 %v6191_v31 }
 0x3f8   : > { %1362 = vadd.xlane.f32.xlu1 %v1361_v7 }
 0x3fa   : > { %v7465_v8 = vpop.eup %7464 }
 0x3fb   : > { %v1364_v9 = vsel %vm1261_vm5, %v7465_v8, 0.0 }
 0x3fc   : > { %1365 = vadd.xlane.f32.xlu1 %v1364_v9 }
 0x481   : > { %v1363_v16 = vpop.xlane.xlu1 %1362 }
 0x482   : > { %7466 = vrcp.f32 %v1363_v16  ;;  %v6173_v16 = vld [vmem:[%s7684_s3 + $0x9] ss:$0 sm:$0xff] }
 0x485   : > { %v1366_v17 = vpop.xlane.xlu1 %1365 }
 0x486   : > { %7468 = vrcp.f32 %v1366_v17 }
 0x48f   : > { %v7467_v18 = vpop.eup %7466 }
 0x490   : > { %v1368_v19 = vmul.f32 %v7467_v18, %v7463_v6 }
 0x492   : > { %6983 = vmatprep.mubr.msk.f32.mxu1 %vm1261_vm5, %v1368_v19 }
 0x493   : > { %v7469_v20 = vpop.eup %7468 }
 0x494   : > { %v1370_v21 = vmul.f32 %v7469_v20, %v7465_v8  ;;  %v6183_v20 = vld [vmem:[%s7674_s5 + $0x18] sm:$0xff] }
 0x496   : > { %6984 = vmatmul.mubr.msk.f32.vlgmr.msra.gmra.mxu1 %vm1261_vm5, %v1370_v21 }
 0x497   : > { %6987 = vmatpush3.msra.mxu1 %v1453_v15 }
 0x498   : > { %6988 = vmatprep.subr.mxu1 %v1452_v22 }
 0x499   : > { %6989 = vmatpush3.msra.mxu1 %v1452_v22 }
 0x49a   : > { %7012 = vmatprep.subr.mxu1 %v6159_v23 }
 0x4b2   : > { %v7049_v15 = vpop.f32.mrf.mxu0 }
 0x4b3   : > { %v1814_v17 = vadd.f32 %v7049_v15, %v6173_v16 }
 0x4b4   : > { %v1808_v18 = vpop.f32.mrf.mxu0 }
 0x4b5   : > { %v1809_v19 = vadd.f32 %v6173_v16, %v1808_v18 }
 0x556   : > { %v6985_v32 = vpop.f32.mrf.mxu1 }
 0x558   : > { %v1443_v33 = vpop.f32.mrf.mxu1 }
 0x559   : > { %6990 = vmatprep.mubr.msk.f32.mxu1 %vm1261_vm5, %v1443_v33  ;;  %v6189_v33 = vld [vmem:[%s7679_s25 + $0x98] sm:$0xff] }
 0x55a   : > { %6991 = vmatmul.mubr.msk.f32.vlgmr.msra.gmra.mxu1 %vm1261_vm5, %v6985_v32  ;;  %v6190_v32 = vld [vmem:[%s7679_s25 + $0xa0] sm:$0xff] }
 0x55b   : > { %7013 = vmatpush3.msra.mxu1 %v6159_v23  ;;  %7028 = vmatprep.mubr.msk.f32.mxu1 %vm993_vm4, %v7751_v34 }
 0x55c   : > { %7014 = vmatprep.subr.mxu1 %v6158_v35  ;;  %7077 = vmatprep.subr.mxu0 %v6190_v32 }
 0x55d   : > { %7015 = vmatpush3.msra.mxu1 %v6158_v35  ;;  %7078 = vmatpush3.msra.mxu0 %v6190_v32  ;;  %v6188_v35 = vld [vmem:[%s7679_s25 + $0x90] sm:$0xff]  ;;  %v6229_v32 = vld [vmem:[%s7674_s5 + $0x28] sm:$0xff] }
 0x55e   : > { %7016 = vmatprep.subr.mxu1 %v6157_v36  ;;  %7079 = vmatprep.subr.mxu0 %v6189_v33 }
 0x55f   : > { %7017 = vmatpush3.msra.mxu1 %v6157_v36  ;;  %7080 = vmatpush3.msra.mxu0 %v6189_v33  ;;  %v6187_v36 = vld [vmem:[%s7679_s25 + $0x88] sm:$0xff] }
 0x560   : > { %7018 = vmatprep.subr.mxu1 %v6156_v38  ;;  %7081 = vmatprep.subr.mxu0 %v6188_v35 }
 0x561   : > { %7019 = vmatpush3.msra.mxu1 %v6156_v38  ;;  %7082 = vmatpush3.msra.mxu0 %v6188_v35  ;;  %v6186_v38 = vld [vmem:[%s7679_s25 + $0x80] sm:$0xff] }
 0x562   : > { %7020 = vmatprep.subr.mxu1 %v6155_v39  ;;  %7083 = vmatprep.subr.mxu0 %v6187_v36 }
 0x563   : > { %7021 = vmatpush3.msra.mxu1 %v6155_v39  ;;  %7084 = vmatpush3.msra.mxu0 %v6187_v36  ;;  %v7878_v39 = vld [vmem:[#allocation2 + $0x8] sm:$0xff] }
 0x564   : > { %7022 = vmatprep.subr.mxu1 %v6154_v40  ;;  %7085 = vmatprep.subr.mxu0 %v6186_v38 }
 0x565   : > { %7023 = vmatpush3.msra.mxu1 %v6154_v40  ;;  %7086 = vmatpush3.msra.mxu0 %v6186_v38  ;;  %v7882_v40 = vld [vmem:[#allocation2] sm:$0xff] }
 0x566   : > { %7024 = vmatprep.subr.mxu1 %v6153_v41  ;;  %7088 = vmatmul.mubr.msk.f32.vlgmr.msra.gmra.mxu0 %vm993_vm4, %v7878_v39 }
 0x567   : > { %7025 = vmatpush3.msra.mxu1 %v6153_v41  ;;  %7125 = vmatprep.mubr.msk.f32.mxu0 %vm993_vm4, %v7882_v40 }
 0x568   : > { %7026 = vmatprep.subr.mxu1 %v6152_v42 }
 0x569   : > { %7027 = vmatpush3.msra.mxu1 %v6152_v42 }
 0x56a   : > { %7029 = vmatmul.mubr.msk.f32.vlgmr.msra.gmra.mxu1 %vm993_vm4, %v7755_v37 }
 0x56b   : > { %7054 = vmatprep.mubr.msk.f32.mxu1 %vm1261_vm5, %v1625_v47  ;;  %v6200_v47 = vld [vmem:[%s7679_s25 + $0x190] sm:$0xff] }
 0x61a   : > { %v7836_v48 = vpop.f32.mrf.mxu1 }
 0x61b   : > { %v1540_v60 = vadd.f32 %v7836_v48, %v6139_v59  ;;  %v6217_v48 = vld [vmem:[%s7679_s25 + $0x2b8] sm:$0xff] }
 0x61c   : > { %v7838_v49 = vpop.f32.mrf.mxu1  ;;  %7109 = vmatprep.subr.mxu0 %v6217_v48 }
 0x61d   : > { %v1539_v62 = vadd.f32 %v6139_v59, %v7838_v49  ;;  %v6216_v49 = vld [vmem:[%s7679_s25 + $0x2b0] sm:$0xff]  ;;  %7110 = vmatpush3.msra.mxu0 %v6217_v48 }
 0x61e   : > { %7111 = vmatprep.subr.mxu0 %v6216_v49  ;;  %v6250_v59 = vld [vmem:[%s7679_s25 + $0x1f0] sm:$0xff] }
 0x61f   : > { %7112 = vmatpush3.msra.mxu0 %v6216_v49 }
 0x62a   : > { %v7030_v51 = vpop.f32.mrf.mxu1 }
 0x62b   : > { %v1722_v52 = vadd.f32 %v7030_v51, %v6161_v50  ;;  %v6198_v51 = vld [vmem:[%s7679_s25 + $0x180] sm:$0xff] }
 0x62c   : > { %v1716_v53 = vpop.f32.mrf.mxu1 }
 0x62d   : > { %v1717_v54 = vadd.f32 %v6161_v50, %v1716_v53  ;;  %7050 = vmatprep.subr.msk.mxu1 %vm1261_vm5, %v1722_v52  ;;  %v6199_v50 = vld [vmem:[%s7679_s25 + $0x188] sm:$0xff]  ;;  %v6195_v53 = vld [vmem:[%s7684_s3 + $0x2] ss:$0 sm:$0xff] }
 0x62e   : > { %7051 = vmatpush3.xpose.msk.msra.mxu1 %vm1261_vm5, %v1722_v52  ;;  %v7089_v52 = vpop.f32.mrf.mxu0 }
 0x62f   : > { %7052 = vmatprep.subr.msk.mxu1 %vm1261_vm5, %v1717_v54 }
 0x630   : > { %v2176_v55 = vpop.f32.mrf.mxu0 }
 0x631   : > { %v2177_v56 = vadd.f32 %v6195_v53, %v2176_v55 }
 0x632   : > { %7053 = vmatpush3.xpose.msk.msra.mxu1 %vm1261_vm5, %v1717_v54  ;;  %v2182_v54 = vadd.f32 %v7089_v52, %v6195_v53  ;;  %v6234_v52 = vld [vmem:[%s7679_s25 + $0xd0] sm:$0xff]  ;;  %v6233_v53 = vld [vmem:[%s7679_s25 + $0xc8] sm:$0xff] }
 0x633   : > { %7057 = vmatprep.subr.mxu1 %v1814_v17 }
 0x635   : > { %7055 = vmatmul.mubr.msk.f32.vlgmr.msra.gmra.mxu1 %vm1261_vm5, %v1630_v45  ;;  %v6202_v45 = vld [vmem:[%s7679_s25 + $0x1a0] sm:$0xff] }
 0x636   : > { %7058 = vmatpush3.msra.mxu1 %v1814_v17 }
 0x637   : > { %7059 = vmatprep.subr.mxu1 %v1809_v19 }
 0x638   : > { %7060 = vmatpush3.msra.mxu1 %v1809_v19 }
 0x639   : > { %7064 = vmatprep.subr.mxu1 %v6183_v20 }
 0x6f5   : > { %v7056_v1 = vpop.f32.mrf.mxu1 }
 0x6f6   : > { %v1901_v2 = vadd.f32 %v7056_v1, %v7795_v58 }
 0x6f7   : > { %v1895_v3 = vpop.f32.mrf.mxu1 }
 0x6f8   : > { %v1896_v4 = vadd.f32 %v1895_v3, %v7790_v57  ;;  %v1907_v5 = vsel %vm1261_vm5, %v1901_v2, -inf }
 0x6f9   : > { %1908 = vmax.xlane.f32.xlu1 %v1907_v5 }
 0x6fa   : > { %v1904_v6 = vsel %vm1261_vm5, %v1896_v4, -inf }
 0x6fb   : > { %1905 = vmax.xlane.f32.xlu0 %v1904_v6 }
 0x782   : > { %v1909_v7 = vpop.xlane.xlu1 %1908 }
 0x783   : > { %v1911_v8 = vsub.f32 %v1901_v2, %v1909_v7  ;;  %v6207_v2 = vld [vmem:[%s7684_s3 + $0x6] ss:$0 sm:$0xff]  ;;  %v6215_v7 = vld [vmem:[%s7679_s25 + $0x2a8] sm:$0xff] }
 0x784   : > { %v1906_v9 = vpop.xlane.xlu0 %1905  ;;  %7113 = vmatprep.subr.mxu0 %v6215_v7 }
 0x785   : > { %v1914_v37 = vmul.f32 1.442695, %v1911_v8  ;;  %v1910_v10 = vsub.f32 %v1896_v4, %v1906_v9  ;;  %v6214_v8 = vld [vmem:[%s7679_s25 + $0x2a0] sm:$0xff]  ;;  %7114 = vmatpush3.msra.mxu0 %v6215_v7  ;;  %v6213_v9 = vld [vmem:[%s7679_s25 + $0x298] sm:$0xff] }
 0x786   : > { %7115 = vmatprep.subr.mxu0 %v6214_v8 }
 0x787   : > { %7470 = vpow2.f32 %v1914_v37  ;;  %v1912_v34 = vmul.f32 1.442695, %v1910_v10  ;;  %7116 = vmatpush3.msra.mxu0 %v6214_v8  ;;  %v6212_v37 = vld [vmem:[%s7679_s25 + $0x290] sm:$0xff]  ;;  %v6211_v10 = vld [vmem:[%s7679_s25 + $0x288] sm:$0xff] }
 0x788   : > { %7117 = vmatprep.subr.mxu0 %v6213_v9 }
 0x789   : > { %7472 = vpow2.f32 %v1912_v34  ;;  %7118 = vmatpush3.msra.mxu0 %v6213_v9  ;;  %v6210_v34 = vld [vmem:[%s7679_s25 + $0x280] sm:$0xff] }
 0x78a   : > { %7119 = vmatprep.subr.mxu0 %v6212_v37 }
 0x78b   : > { %7120 = vmatpush3.msra.mxu0 %v6212_v37 }
 0x78c   : > { %7121 = vmatprep.subr.mxu0 %v6211_v10 }
 0x78d   : > { %7122 = vmatpush3.msra.mxu0 %v6211_v10  ;;  %v6253_v10 = vld [vmem:[%s7684_s3 + $0x7] ss:$0 sm:$0xff] }
 0x78e   : > { %7123 = vmatprep.subr.mxu0 %v6210_v34 }
 0x78f   : > { %7124 = vmatpush3.msra.mxu0 %v6210_v34 }
 0x790   : > { %7126 = vmatmul.mubr.msk.f32.vlgmr.msra.gmra.mxu0 %vm993_vm4, %v7878_v39 }
 0x791   : > { %7165 = vmatprep.mubr.msk.f32.mxu0 %vm993_vm4, %v7882_v40 }
 0x794   : > { %v7471_v11 = vpop.eup %7470 }
 0x795   : > { %v1919_v12 = vsel %vm1261_vm5, %v7471_v11, 0.0 }
 0x796   : > { %v7473_v13 = vpop.eup %7472  ;;  %1920 = vadd.xlane.f32.xlu1 %v1919_v12 }
 0x797   : > { %v1916_v14 = vsel %vm1261_vm5, %v7473_v13, 0.0 }
 0x798   : > { %1917 = vadd.xlane.f32.xlu0 %v1916_v14 }
 0x81f   : > { %v1921_v21 = vpop.xlane.xlu1 %1920 }
 0x820   : > { %7474 = vrcp.f32 %v1921_v21 }
 0x821   : > { %v1918_v22 = vpop.xlane.xlu0 %1917 }
 0x822   : > { %7476 = vrcp.f32 %v1918_v22 }
 0x82d   : > { %v7475_v23 = vpop.eup %7474 }
 0x82e   : > { %v1925_v26 = vmul.f32 %v7475_v23, %v7471_v11 }
 0x82f   : > { %v7477_v24 = vpop.eup %7476 }
 0x830   : > { %v1923_v25 = vmul.f32 %v7477_v24, %v7473_v13 }
 0x832   : > { %7061 = vmatprep.mubr.msk.f32.mxu1 %vm1261_vm5, %v1923_v25 }
 0x833   : > { %7062 = vmatmul.mubr.msk.f32.vlgmr.msra.gmra.mxu1 %vm1261_vm5, %v1925_v26 }
 0x834   : > { %7065 = vmatpush3.msra.mxu1 %v6183_v20 }
 0x835   : > { %7066 = vmatprep.subr.mxu1 %v6182_v27 }
 0x836   : > { %7067 = vmatpush3.msra.mxu1 %v6182_v27 }
 0x837   : > { %7090 = vmatprep.subr.mxu1 %v6205_v28 }
 0x850   : > { %v7127_v27 = vpop.f32.mrf.mxu0 }
 0x852   : > { %v2360_v30 = vpop.f32.mrf.mxu0 }
 0x8f3   : > { %v7063_v41 = vpop.f32.mrf.mxu1 }
 0x8f5   : > { %v1998_v42 = vpop.f32.mrf.mxu1 }
 0x8f6   : > { %7068 = vmatprep.mubr.msk.f32.mxu1 %vm1261_vm5, %v1998_v42 }
 0x8f7   : > { %7069 = vmatmul.mubr.msk.f32.vlgmr.msra.gmra.mxu1 %vm1261_vm5, %v7063_v41 }
 0x8f8   : > { %7091 = vmatpush3.msra.mxu1 %v6205_v28  ;;  %7106 = vmatprep.mubr.msk.f32.mxu1 %vm993_vm4, %v7882_v40  ;;  %v6219_v28 = vld [vmem:[%s7684_s3 + $0xa] ss:$0 sm:$0xff] }
 0x8f9   : > { %7092 = vmatprep.subr.mxu1 %v6204_v43  ;;  %v2366_v29 = vadd.f32 %v7127_v27, %v6219_v28  ;;  %v2361_v31 = vadd.f32 %v6219_v28, %v2360_v30 }
 0x8fa   : > { %7093 = vmatpush3.msra.mxu1 %v6204_v43  ;;  %v6228_v43 = vld [vmem:[%s7674_s5 + $0x20] sm:$0xff] }
 0x8fb   : > { %7094 = vmatprep.subr.mxu1 %v6203_v44 }
 0x8fc   : > { %7095 = vmatpush3.msra.mxu1 %v6203_v44  ;;  %v6251_v44 = vld [vmem:[%s7679_s25 + $0x1f8] sm:$0xff] }
 0x8fd   : > { %7096 = vmatprep.subr.mxu1 %v6202_v45 }
 0x8fe   : > { %7097 = vmatpush3.msra.mxu1 %v6202_v45  ;;  %v6239_v45 = vld [vmem:[%s7679_s25 + $0xf8] sm:$0xff] }
 0x8ff   : > { %7098 = vmatprep.subr.mxu1 %v6201_v46  ;;  %7149 = vmatprep.subr.mxu0 %v6239_v45 }
 0x900   : > { %7099 = vmatpush3.msra.mxu1 %v6201_v46  ;;  %7150 = vmatpush3.msra.mxu0 %v6239_v45  ;;  %v6238_v46 = vld [vmem:[%s7679_s25 + $0xf0] sm:$0xff] }
 0x901   : > { %7100 = vmatprep.subr.mxu1 %v6200_v47  ;;  %7151 = vmatprep.subr.mxu0 %v6238_v46 }
 0x902   : > { %7101 = vmatpush3.msra.mxu1 %v6200_v47  ;;  %7152 = vmatpush3.msra.mxu0 %v6238_v46  ;;  %v6237_v47 = vld [vmem:[%s7679_s25 + $0xe8] sm:$0xff] }
 0x903   : > { %7102 = vmatprep.subr.mxu1 %v6199_v50  ;;  %7153 = vmatprep.subr.mxu0 %v6237_v47 }
 0x904   : > { %7103 = vmatpush3.msra.mxu1 %v6199_v50  ;;  %7154 = vmatpush3.msra.mxu0 %v6237_v47  ;;  %v6236_v50 = vld [vmem:[%s7679_s25 + $0xe0] sm:$0xff] }
 0x905   : > { %7104 = vmatprep.subr.mxu1 %v6198_v51  ;;  %7155 = vmatprep.subr.mxu0 %v6236_v50 }
 0x906   : > { %7105 = vmatpush3.msra.mxu1 %v6198_v51  ;;  %7156 = vmatpush3.msra.mxu0 %v6236_v50  ;;  %v6235_v51 = vld [vmem:[%s7679_s25 + $0xd8] sm:$0xff] }
 0x907   : > { %7107 = vmatmul.mubr.msk.f32.vlgmr.msra.gmra.mxu1 %vm993_vm4, %v7878_v39  ;;  %7157 = vmatprep.subr.mxu0 %v6235_v51 }
 0x908   : > { %7132 = vmatprep.mubr.msk.f32.mxu1 %vm1261_vm5, %v2177_v56  ;;  %7158 = vmatpush3.msra.mxu0 %v6235_v51 }
 0x909   : > { %7159 = vmatprep.subr.mxu0 %v6234_v52 }
 0x90a   : > { %7160 = vmatpush3.msra.mxu0 %v6234_v52  ;;  %v6274_v52 = vld [vmem:[%s7674_s5 + $0x30] sm:$0xff] }
 0x90b   : > { %7161 = vmatprep.subr.mxu0 %v6233_v53 }
 0x90c   : > { %7162 = vmatpush3.msra.mxu0 %v6233_v53 }
 0x9b7   : > { %v7070_v61 = vpop.f32.mrf.mxu1 }
 0x9b8   : > { %v7904_v63 = vadd.f32 %v7070_v61, %v1540_v60  ;;  %v6249_v60 = vld [vmem:[%s7679_s25 + $0x1e8] sm:$0xff]  ;;  %v6248_v61 = vld [vmem:[%s7679_s25 + $0x1e0] sm:$0xff] }
 0x9b9   : > { %v2082_v0 = vpop.f32.mrf.mxu1 }
 0x9ba   : > { %v7906_v1 = vadd.f32 %v2082_v0, %v1539_v62  ;;  %v6247_v62 = vld [vmem:[%s7679_s25 + $0x1d8] sm:$0xff]  ;;  %v6246_v0 = vld [vmem:[%s7679_s25 + $0x1d0] sm:$0xff] }
 0x9c7   : > { %v7108_v3 = vpop.f32.mrf.mxu1 }
 0x9c8   : > { %v2274_v4 = vadd.f32 %v7108_v3, %v6207_v2  ;;  %v6244_v3 = vld [vmem:[%s7679_s25 + $0x1c0] sm:$0xff] }
 0x9c9   : > { %v2268_v5 = vpop.f32.mrf.mxu1 }
 0x9ca   : > { %v2269_v6 = vadd.f32 %v6207_v2, %v2268_v5  ;;  %7128 = vmatprep.subr.msk.mxu1 %vm1261_vm5, %v2274_v4  ;;  %v6245_v2 = vld [vmem:[%s7679_s25 + $0x1c8] sm:$0xff]  ;;  %v6241_v5 = vld [vmem:[%s7684_s3 + $0x3] ss:$0 sm:$0xff] }
 0x9cb   : > { %7129 = vmatpush3.xpose.msk.msra.mxu1 %vm1261_vm5, %v2274_v4 }
 0x9cc   : > { %7130 = vmatprep.subr.msk.mxu1 %vm1261_vm5, %v2269_v6 }
 0x9cf   : > { %7131 = vmatpush3.xpose.msk.msra.mxu1 %vm1261_vm5, %v2269_v6 }
 0x9d0   : > { %7135 = vmatprep.subr.mxu1 %v2366_v29 }
 0x9d2   : > { %7133 = vmatmul.mubr.msk.f32.vlgmr.msra.gmra.mxu1 %vm1261_vm5, %v2182_v54  ;;  %v6232_v54 = vld [vmem:[%s7679_s25 + $0xc0] sm:$0xff] }
 0x9d3   : > { %7136 = vmatpush3.msra.mxu1 %v2366_v29  ;;  %7163 = vmatprep.subr.mxu0 %v6232_v54 }
 0x9d4   : > { %7137 = vmatprep.subr.mxu1 %v2361_v31  ;;  %7164 = vmatpush3.msra.mxu0 %v6232_v54 }
 0x9d5   : > { %7138 = vmatpush3.msra.mxu1 %v2361_v31  ;;  %7166 = vmatmul.mubr.msk.f32.vlgmr.msra.gmra.mxu0 %vm993_vm4, %v7878_v39 }
 0x9d6   : > { %7142 = vmatprep.subr.mxu1 %v6229_v32  ;;  %7203 = vmatprep.mubr.msk.f32.mxu0 %vm993_vm4, %v7882_v40 }
 0xa92   : > { %v7134_v11 = vpop.f32.mrf.mxu1 }
 0xa93   : > { %v2453_v12 = vadd.f32 %v7134_v11, %v7795_v58 }
 0xa94   : > { %v2447_v13 = vpop.f32.mrf.mxu1 }
 0xa95   : > { %v2448_v14 = vadd.f32 %v2447_v13, %v7790_v57  ;;  %v2459_v15 = vsel %vm1261_vm5, %v2453_v12, -inf  ;;  %v7167_v4 = vpop.f32.mrf.mxu0 }
 0xa96   : > { %2460 = vmax.xlane.f32.xlu1 %v2459_v15  ;;  %v2734_v6 = vadd.f32 %v7167_v4, %v6241_v5  ;;  %v6260_v15 = vld [vmem:[%s7679_s25 + $0x2e0] sm:$0xff] }
 0xa97   : > { %v2456_v16 = vsel %vm1261_vm5, %v2448_v14, -inf  ;;  %v2728_v48 = vpop.f32.mrf.mxu0 }
 0xa98   : > { %2457 = vmax.xlane.f32.xlu0 %v2456_v16  ;;  %v2729_v49 = vadd.f32 %v6241_v5, %v2728_v48  ;;  %v6259_v16 = vld [vmem:[%s7679_s25 + $0x2d8] sm:$0xff] }
 0xb1f   : > { %v2461_v17 = vpop.xlane.xlu1 %2460 }
 0xb20   : > { %v2463_v18 = vsub.f32 %v2453_v12, %v2461_v17  ;;  %v6258_v17 = vld [vmem:[%s7679_s25 + $0x2d0] sm:$0xff] }
 0xb21   : > { %v2458_v19 = vpop.xlane.xlu0 %2457 }
 0xb22   : > { %v2466_v20 = vmul.f32 1.442695, %v2463_v18  ;;  %v2462_v21 = vsub.f32 %v2448_v14, %v2458_v19  ;;  %v6261_v14 = vld [vmem:[%s7679_s25 + $0x2e8] sm:$0xff]  ;;  %v6256_v19 = vld [vmem:[%s7679_s25 + $0x2c0] sm:$0xff] }
 0xb23   : > { %v6257_v18 = vld [vmem:[%s7679_s25 + $0x2c8] sm:$0xff] }
 0xb24   : > { %7478 = vpow2.f32 %v2466_v20  ;;  %v2464_v22 = vmul.f32 1.442695, %v2462_v21 }
 0xb26   : > { %7480 = vpow2.f32 %v2464_v22 }
 0xb31   : > { %v7479_v23 = vpop.eup %7478 }
 0xb32   : > { %v2471_v24 = vsel %vm1261_vm5, %v7479_v23, 0.0 }
 0xb33   : > { %v7481_v25 = vpop.eup %7480  ;;  %2472 = vadd.xlane.f32.xlu1 %v2471_v24 }
 0xb34   : > { %v2468_v26 = vsel %vm1261_vm5, %v7481_v25, 0.0 }
 0xb35   : > { %2469 = vadd.xlane.f32.xlu0 %v2468_v26 }
 0xbbc   : > { %v2473_v33 = vpop.xlane.xlu1 %2472 }
 0xbbd   : > { %7482 = vrcp.f32 %v2473_v33 }
 0xbbe   : > { %v2470_v35 = vpop.xlane.xlu0 %2469 }
 0xbbf   : > { %7484 = vrcp.f32 %v2470_v35 }
 0xbca   : > { %v7483_v36 = vpop.eup %7482 }
 0xbcb   : > { %v2477_v42 = vmul.f32 %v7483_v36, %v7479_v23  ;;  %v6265_v36 = vld [vmem:[%s7684_s3 + $0xb] ss:$0 sm:$0xff]  ;;  %s8546_s3 = sld [smem:[#allocation12_spill]] (!%p6483_p5) }
 0xbcc   : > { %v7485_v38 = vpop.eup %7484 }
 0xbcd   : > { %v2475_v41 = vmul.f32 %v7485_v38, %v7481_v25 }
 0xbcf   : > { %7139 = vmatprep.mubr.msk.f32.mxu1 %vm1261_vm5, %v2475_v41 }
 0xbd0   : > { %7140 = vmatmul.mubr.msk.f32.vlgmr.msra.gmra.mxu1 %vm1261_vm5, %v2477_v42 }
 0xbd1   : > { %7143 = vmatpush3.msra.mxu1 %v6229_v32 }
 0xbd2   : > { %7144 = vmatprep.subr.mxu1 %v6228_v43 }
 0xbd3   : > { %7145 = vmatpush3.msra.mxu1 %v6228_v43  ;;  %v6275_v43 = vld [vmem:[%s7674_s5 + $0x38] sm:$0xff]  ;;  %s8547_s5 = smov (!%p6483_p5), %s8546_s3 }
 0xbd4   : > { %7168 = vmatprep.subr.mxu1 %v6251_v44 }
 0xc90   : > { %v7141_v55 = vpop.f32.mrf.mxu1 }
 0xc92   : > { %v2550_v56 = vpop.f32.mrf.mxu1 }
 0xc93   : > { %7146 = vmatprep.mubr.msk.f32.mxu1 %vm1261_vm5, %v2550_v56 }
 0xc94   : > { %7147 = vmatmul.mubr.msk.f32.vlgmr.msra.gmra.mxu1 %vm1261_vm5, %v7141_v55 }
 0xc95   : > { %7169 = vmatpush3.msra.mxu1 %v6251_v44  ;;  %7184 = vmatprep.mubr.msk.f32.mxu1 %vm993_vm4, %v7882_v40 }
 0xc96   : > { %7170 = vmatprep.subr.mxu1 %v6250_v59 }
 0xc97   : > { %7171 = vmatpush3.msra.mxu1 %v6250_v59 }
 0xc98   : > { %7172 = vmatprep.subr.mxu1 %v6249_v60 }
 0xc99   : > { %7173 = vmatpush3.msra.mxu1 %v6249_v60 }
 0xc9a   : > { %7174 = vmatprep.subr.mxu1 %v6248_v61 }
 0xc9b   : > { %7175 = vmatpush3.msra.mxu1 %v6248_v61 }
 0xc9c   : > { %7176 = vmatprep.subr.mxu1 %v6247_v62 }
 0xc9d   : > { %7177 = vmatpush3.msra.mxu1 %v6247_v62 }
 0xc9e   : > { %7178 = vmatprep.subr.mxu1 %v6246_v0 }
 0xc9f   : > { %7179 = vmatpush3.msra.mxu1 %v6246_v0 }
 0xca0   : > { %7180 = vmatprep.subr.mxu1 %v6245_v2 }
 0xca1   : > { %7181 = vmatpush3.msra.mxu1 %v6245_v2 }
 0xca2   : > { %7182 = vmatprep.subr.mxu1 %v6244_v3 }
 0xca3   : > { %7183 = vmatpush3.msra.mxu1 %v6244_v3 }
 0xca4   : > { %7185 = vmatmul.mubr.msk.f32.vlgmr.msra.gmra.mxu1 %vm993_vm4, %v7878_v39 }
 0xca5   : > { %7210 = vmatprep.mubr.msk.f32.mxu1 %vm1261_vm5, %v2729_v49 }
 0xd54   : > { %v7148_v7 = vpop.f32.mrf.mxu1 }
 0xd55   : > { %v7966_v8 = vadd.f32 %v7148_v7, %v7904_v63  ;;  %v6263_v63 = vld [vmem:[%s7679_s25 + $0x2f8] sm:$0xff] }
 0xd56   : > { %v2634_v9 = vpop.f32.mrf.mxu1  ;;  %7187 = vmatprep.subr.mxu0 %v6263_v63 }
 0xd57   : > { %v7969_v37 = vadd.f32 %v2634_v9, %v7906_v1  ;;  %v6262_v1 = vld [vmem:[%s7679_s25 + $0x2f0] sm:$0xff]  ;;  %7188 = vmatpush3.msra.mxu0 %v6263_v63  ;;  %v3289_v9 = vld [vmem:[%s7699_s6 + $0x180] sm:$0xff]  ;;  %s8548_s25 = sld [smem:[#allocation13_spill]] (!%p6483_p5) }
 0xd58   : > { %7189 = vmatprep.subr.mxu0 %v6262_v1 }
 0xd59   : > { %7190 = vmatpush3.msra.mxu0 %v6262_v1  ;;  %v3273_v1 = vld [vmem:[%s7699_s6 + $0x100] sm:$0xff] }
 0xd5a   : > { %7191 = vmatprep.subr.mxu0 %v6261_v14 }
 0xd5b   : > { %7192 = vmatpush3.msra.mxu0 %v6261_v14  ;;  %v3281_v14 = vld [vmem:[%s7699_s6 + $0x140] sm:$0xff] }
 0xd5c   : > { %7193 = vmatprep.subr.mxu0 %v6260_v15 }
 0xd5d   : > { %7194 = vmatpush3.msra.mxu0 %v6260_v15  ;;  %v3274_v15 = vld [vmem:[%s7699_s6 + $0x108] sm:$0xff] }
 0xd5e   : > { %7195 = vmatprep.subr.mxu0 %v6259_v16 }
 0xd5f   : > { %7196 = vmatpush3.msra.mxu0 %v6259_v16  ;;  %v6313_v16 = vcombine.high %v3273_v1, %v3281_v14 }
 0xd60   : > { %7197 = vmatprep.subr.mxu0 %v6258_v17 }
 0xd61   : > { %7198 = vmatpush3.msra.mxu0 %v6258_v17  ;;  %v3282_v17 = vld [vmem:[%s7699_s6 + $0x148] sm:$0xff] }
 0xd62   : > { %7199 = vmatprep.subr.mxu0 %v6257_v18 }
 0xd63   : > { %7200 = vmatpush3.msra.mxu0 %v6257_v18  ;;  %v6312_v18 = vcombine.low %v3273_v1, %v3281_v14  ;;  %v3243_v1 = vld [vmem:[%s7699_s6 + $0x10] sm:$0xff] }
 0xd64   : > { %v7186_v34 = vpop.f32.mrf.mxu1  ;;  %7201 = vmatprep.subr.mxu0 %v6256_v19  ;;  %v3251_v14 = vld [vmem:[%s7699_s6 + $0x50] sm:$0xff] }
 0xd65   : > { %v2826_v11 = vadd.f32 %v7186_v34, %v6253_v10  ;;  %7202 = vmatpush3.msra.mxu0 %v6256_v19  ;;  %v6314_v19 = vcombine.low %v3274_v15, %v3282_v17 }
 0xd66   : > { %v2820_v12 = vpop.f32.mrf.mxu1  ;;  %7204 = vmatmul.mubr.msk.f32.vlgmr.msra.gmra.mxu0 %vm993_vm4, %v7878_v39 }
 0xd67   : > { %v2821_v13 = vadd.f32 %v6253_v10, %v2820_v12  ;;  %7206 = vmatprep.subr.msk.mxu1 %vm1261_vm5, %v2826_v11  ;;  %v3290_v10 = vld [vmem:[%s7699_s6 + $0x188] sm:$0xff] }
 0xd68   : > { %7207 = vmatpush3.xpose.msk.msra.mxu1 %vm1261_vm5, %v2826_v11  ;;  %v3298_v11 = vld [vmem:[%s7699_s6 + $0x1c8] sm:$0xff] }
 0xd69   : > { %7208 = vmatprep.subr.msk.mxu1 %vm1261_vm5, %v2821_v13  ;;  %v6331_v63 = vcombine.high %v3290_v10, %v3298_v11 }
 0xd6c   : > { %7209 = vmatpush3.xpose.msk.msra.mxu1 %vm1261_vm5, %v2821_v13  ;;  %v6330_v13 = vcombine.low %v3290_v10, %v3298_v11  ;;  %v3260_v10 = vld [vmem:[%s7699_s6 + $0x98] sm:$0xff] }
 0xd6f   : > { %7211 = vmatmul.mubr.msk.f32.vlgmr.msra.gmra.mxu1 %vm1261_vm5, %v2734_v6 }
 0xe26   : > { %v7205_v35 = vpop.f32.mrf.mxu0 }
 0xe27   : > { %v2918_v38 = vadd.f32 %v7205_v35, %v6265_v36 }
 0xe28   : > { %v2912_v41 = vpop.f32.mrf.mxu0 }
 0xe29   : > { %v2913_v42 = vadd.f32 %v6265_v36, %v2912_v41  ;;  %7213 = vmatprep.subr.mxu1 %v2918_v38  ;;  %v3291_v36 = vld [vmem:[%s7699_s6 + $0x190] sm:$0xff]  ;;  %v3292_v41 = vld [vmem:[%s7699_s6 + $0x198] sm:$0xff] }
 0xe2a   : > { %7214 = vmatpush3.msra.mxu1 %v2918_v38  ;;  %v3299_v38 = vld [vmem:[%s7699_s6 + $0x1d0] sm:$0xff] }
 0xe2b   : > { %7215 = vmatprep.subr.mxu1 %v2913_v42 }
 0xe2c   : > { %7216 = vmatpush3.msra.mxu1 %v2913_v42  ;;  %v6333_v42 = vcombine.high %v3291_v36, %v3299_v38 }
 0xe2d   : > { %7220 = vmatprep.subr.mxu1 %v6275_v43 }
 0xe2f   : > { %v7212_v20 = vpop.f32.mrf.mxu1 }
 0xe30   : > { %v3005_v21 = vadd.f32 %v7212_v20, %v7795_v58  ;;  %v6315_v20 = vcombine.high %v3274_v15, %v3282_v17  ;;  %v3244_v15 = vld [vmem:[%s7699_s6 + $0x18] sm:$0xff] }
 0xe31   : > { %v2999_v22 = vpop.f32.mrf.mxu1 }
 0xe32   : > { %v3000_v23 = vadd.f32 %v2999_v22, %v7790_v57  ;;  %v3011_v24 = vsel %vm1261_vm5, %v3005_v21, -inf  ;;  %v3265_v22 = vld [vmem:[%s7699_s6 + $0xc0] sm:$0xff] }
 0xe33   : > { %3012 = vmax.xlane.f32.xlu1 %v3011_v24 }
 0xe34   : > { %v3008_v25 = vsel %vm1261_vm5, %v3000_v23, -inf }
 0xe35   : > { %3009 = vmax.xlane.f32.xlu0 %v3008_v25  ;;  %v3266_v25 = vld [vmem:[%s7699_s6 + $0xc8] sm:$0xff] }
 0xebc   : > { %v3013_v26 = vpop.xlane.xlu1 %3012 }
 0xebd   : > { %v3015_v27 = vsub.f32 %v3005_v21, %v3013_v26  ;;  %v3257_v21 = vld [vmem:[%s7699_s6 + $0x80] sm:$0xff] }
 0xebe   : > { %v3010_v28 = vpop.xlane.xlu0 %3009  ;;  %v6297_v24 = vcombine.high %v3257_v21, %v3265_v22  ;;  %v6296_v26 = vcombine.low %v3257_v21, %v3265_v22  ;;  %v3293_v21 = vld [vmem:[%s7699_s6 + $0x1a0] sm:$0xff] }
 0xebf   : > { %v3018_v29 = vmul.f32 1.442695, %v3015_v27  ;;  %v3014_v30 = vsub.f32 %v3000_v23, %v3010_v28  ;;  %v3258_v23 = vld [vmem:[%s7699_s6 + $0x88] sm:$0xff]  ;;  %v3301_v22 = vld [vmem:[%s7699_s6 + $0x1e0] sm:$0xff] }
 0xec0   : > { %v6298_v27 = vcombine.low %v3258_v23, %v3266_v25  ;;  %v6299_v28 = vcombine.high %v3258_v23, %v3266_v25  ;;  %v3294_v23 = vld [vmem:[%s7699_s6 + $0x1a8] sm:$0xff]  ;;  %v6284_v25 = vcombine.low %v3243_v1, %v3251_v14 }
 0xec1   : > { %7486 = vpow2.f32 %v3018_v29  ;;  %v3016_v31 = vmul.f32 1.442695, %v3014_v30  ;;  %v3241_v29 = vld [vmem:[%s7699_s6] sm:$0xff] }
 0xec2   : > { %v3249_v30 = vld [vmem:[%s7699_s6 + $0x40] sm:$0xff] }
 0xec3   : > { %7488 = vpow2.f32 %v3016_v31  ;;  %v3242_v31 = vld [vmem:[%s7699_s6 + $0x8] sm:$0xff] }
 0xece   : > { %v7487_v58 = vpop.eup %7486 }
 0xecf   : > { %v3023_v32 = vsel %vm1261_vm5, %v7487_v58, 0.0 }
 0xed0   : > { %v7489_v57 = vpop.eup %7488  ;;  %3024 = vadd.xlane.f32.xlu1 %v3023_v32  ;;  %v3250_v32 = vld [vmem:[%s7699_s6 + $0x48] sm:$0xff] }
 0xed1   : > { %v3020_v33 = vsel %vm1261_vm5, %v7489_v57, 0.0  ;;  %v6283_v35 = vcombine.high %v3242_v31, %v3250_v32 }
 0xed2   : > { %3021 = vadd.xlane.f32.xlu0 %v3020_v33  ;;  %v6282_v33 = vcombine.low %v3242_v31, %v3250_v32  ;;  %v3278_v31 = vld [vmem:[%s7699_s6 + $0x128] sm:$0xff]  ;;  %v6336_v32 = vcombine.low %v3293_v21, %v3301_v22 }
 0xf59   : > { %v3025_v44 = vpop.xlane.xlu1 %3024 }
 0xf5a   : > { %7490 = vrcp.f32 %v3025_v44  ;;  %v6332_v44 = vcombine.low %v3291_v36, %v3299_v38  ;;  %v3261_v36 = vld [vmem:[%s7699_s6 + $0xa0] sm:$0xff] }
 0xf5b   : > { %v3022_v45 = vpop.xlane.xlu0 %3021  ;;  %v3269_v38 = vld [vmem:[%s7699_s6 + $0xe0] sm:$0xff] }
 0xf5c   : > { %7492 = vrcp.f32 %v3022_v45 }
 0xf67   : > { %v7491_v46 = vpop.eup %7490 }
 0xf68   : > { %v3029_v51 = vmul.f32 %v7491_v46, %v7487_v58  ;;  %v6281_v58 = vcombine.high %v3241_v29, %v3249_v30 }
 0xf69   : > { %v7493_v47 = vpop.eup %7492 }
 0xf6a   : > { %v3027_v50 = vmul.f32 %v7493_v47, %v7489_v57  ;;  %v6280_v57 = vcombine.low %v3241_v29, %v3249_v30  ;;  %v7540_v47 = vmov 0   ;;  %v3277_v29 = vld [vmem:[%s7699_s6 + $0x120] sm:$0xff] }
 0xf6b   : > { %3744 = vmatprep.mubr.bf16.mxu0 %v7540_v47  ;;  %v3285_v30 = vld [vmem:[%s7699_s6 + $0x160] sm:$0xff] }
 0xf6c   : > { %7217 = vmatprep.mubr.msk.f32.mxu1 %vm1261_vm5, %v3027_v50 }
 0xf6d   : > { %7218 = vmatmul.mubr.msk.f32.vlgmr.msra.gmra.mxu1 %vm1261_vm5, %v3029_v51 }
 0xf6e   : > { %7221 = vmatpush3.msra.mxu1 %v6275_v43  ;;  %v3300_v43 = vld [vmem:[%s7699_s6 + $0x1d8] sm:$0xff] }
 0xf6f   : > { %7222 = vmatprep.subr.mxu1 %v6274_v52  ;;  %v6334_v45 = vcombine.low %v3292_v41, %v3300_v43  ;;  %v6335_v46 = vcombine.high %v3292_v41, %v3300_v43  ;;  %v3262_v41 = vld [vmem:[%s7699_s6 + $0xa8] sm:$0xff]  ;;  %v6320_v43 = vcombine.low %v3277_v29, %v3285_v30 }
 0xf70   : > { %7223 = vmatpush3.msra.mxu1 %v6274_v52 }
 0xf71   : > { %3763 = vmatprep.subr.bf16.mxu1 %v6331_v63 }
0x102d   : > { %v7219_v53 = vpop.f32.mrf.mxu1 }
0x102f   : > { %v3102_v54 = vpop.f32.mrf.mxu1 }
0x1030   : > { %7224 = vmatprep.mubr.msk.f32.mxu1 %vm1261_vm5, %v3102_v54 }
0x1031   : > { %7225 = vmatmul.mubr.msk.f32.vlgmr.msra.gmra.mxu1 %vm1261_vm5, %v7219_v53 }
0x1032   : > { %3764 = vmatpush1.bf16.msra.mxu1 %v6330_v13  ;;  %3787 = vmatprep.mubr.bf16.mxu1 %v7540_v47 }
0x1033   : > { %3765 = vmatprep.subr.bf16.mxu1 %v6315_v20 }
0x1036   : > { %3766 = vmatpush1.bf16.msra.mxu1 %v6314_v19  ;;  %v6285_v19 = vcombine.high %v3243_v1, %v3251_v14 }
0x1037   : > { %3767 = vmatprep.subr.bf16.mxu1 %v6299_v28 }
0x103a   : > { %3768 = vmatpush1.bf16.msra.mxu1 %v6298_v27  ;;  %v6337_v27 = vcombine.high %v3293_v21, %v3301_v22 }
0x103b   : > { %3769 = vmatprep.subr.bf16.mxu1 %v6283_v35 }
0x103e   : > { %3770 = vmatpush1.bf16.msra.mxu1 %v6282_v33  ;;  %v6321_v33 = vcombine.high %v3277_v29, %v3285_v30  ;;  %v7337_v29 = vld [vmem:[%s7704_s15 + $0xb8] sm:$0xff]   ;;  %v7338_v30 = vld [vmem:[%s7704_s15 + $0x70] sm:$0xff]  }
0x103f   : > { %3849 = vmatprep.subr.bf16.mxu1 %v6335_v46 }
0x10f1   : > { %v7226_v55 = vpop.f32.mrf.mxu1 }
0x10f2   : > { %v3196_v56 = vadd.f32 %v7226_v55, %v7966_v8 }
0x10f3   : > { %v3186_v59 = vpop.f32.mrf.mxu1 }
0x10f4   : > { %v3195_v60 = vadd.f32 %v3186_v59, %v7969_v37  ;;  %v3198_v61 = vadd.f32 %v7878_v39, %v3196_v56  ;;  %v3297_v37 = vld [vmem:[%s7699_s6 + $0x1c0] sm:$0xff] }
0x10f5   : > { %v6329_v34 = vcombine.high %v3289_v9, %v3297_v37  ;;  %v6328_v12 = vcombine.low %v3289_v9, %v3297_v37  ;;  %v6278_v59 = vld [vmem:[%s7689_s13 + $0x1] ss:$0 sm:$0xff]  ;;  %v3259_v37 = vld [vmem:[%s7699_s6 + $0x90] sm:$0xff] }
0x10f6   : > { %v3204_v62 = vsel %vm993_vm4, %v3198_v61, 0.0  ;;  %v3197_v0 = vadd.f32 %v7882_v40, %v3195_v60 }
0x10f7   : > { %3205 = vadd.xlane.f32.xlu1 %v3204_v62  ;;  %3720 = vmatprep.subr.bf16.mxu0 %v6329_v34  ;;  %v3268_v34 = vld [vmem:[%s7699_s6 + $0xd8] sm:$0xff] }
0x10f8   : > { %v3201_v2 = vsel %vm993_vm4, %v3197_v0, 0.0  ;;  %3721 = vmatpush1.bf16.msra.mxu0 %v6328_v12  ;;  %v6303_v63 = vcombine.high %v3260_v10, %v3268_v34 }
0x10f9   : > { %3202 = vadd.xlane.f32.xlu0 %v3201_v2  ;;  %3722 = vmatprep.subr.bf16.mxu0 %v6313_v16  ;;  %v6279_v2 = vld [vmem:[%s7689_s13 + $0x2] ss:$0 sm:$0xff]  ;;  %v3252_v16 = vld [vmem:[%s7699_s6 + $0x58] sm:$0xff] }
0x10fa   : > { %v6287_v20 = vcombine.high %v3244_v15, %v3252_v16 }
0x10fc   : > { %3723 = vmatpush1.bf16.msra.mxu0 %v6312_v18  ;;  %v6302_v18 = vcombine.low %v3260_v10, %v3268_v34 }
0x10fd   : > { %3724 = vmatprep.subr.bf16.mxu0 %v6297_v24  ;;  %v3302_v24 = vld [vmem:[%s7699_s6 + $0x1e8] sm:$0xff] }
0x10fe   : > { %v6339_v28 = vcombine.high %v3294_v23, %v3302_v24 }
0x1100   : > { %3725 = vmatpush1.bf16.msra.mxu0 %v6296_v26  ;;  %v6286_v26 = vcombine.low %v3244_v15, %v3252_v16 }
0x1101   : > { %3726 = vmatprep.subr.bf16.mxu0 %v6281_v58  ;;  %v3286_v58 = vld [vmem:[%s7699_s6 + $0x168] sm:$0xff] }
0x1102   : > { %v6323_v35 = vcombine.high %v3278_v31, %v3286_v58 }
0x1104   : > { %3727 = vmatpush1.bf16.msra.mxu0 %v6280_v57  ;;  %v6338_v57 = vcombine.low %v3294_v23, %v3302_v24 }
0x1105   : > { %3806 = vmatprep.subr.bf16.mxu0 %v6333_v42  ;;  %v3270_v42 = vld [vmem:[%s7699_s6 + $0xe8] sm:$0xff] }
0x1106   : > { %v6307_v46 = vcombine.high %v3262_v41, %v3270_v42 }
0x1180   : > { %v3206_v3 = vpop.xlane.xlu1 %3205 }
0x1181   : > { %v3209_v4 = vmul.f32 0.015625, %v3206_v3 }
0x1182   : > { %v3203_v5 = vpop.xlane.xlu0 %3202 }
0x1183   : > { %v8006_v6 = vsub.f32 %v3198_v61, %v3209_v4  ;;  %v3208_v48 = vmul.f32 0.015625, %v3203_v5  ;;  %v3275_v4 = vld [vmem:[%s7699_s6 + $0x110] sm:$0xff] }
0x1184   : > { %v3283_v5 = vld [vmem:[%s7699_s6 + $0x150] sm:$0xff] }
0x1185   : > { %v8008_v49 = vsub.f32 %v3197_v0, %v3208_v48  ;;  %v3213_v39 = vmul.f32 %v8006_v6, %v8006_v6  ;;  %v3276_v48 = vld [vmem:[%s7699_s6 + $0x118] sm:$0xff]  ;;  %v6316_v11 = vcombine.low %v3275_v4, %v3283_v5 }
0x1187   : > { %v3217_v40 = vsel %vm993_vm4, %v3213_v39, 0.0  ;;  %v3212_v7 = vmul.f32 %v8008_v49, %v8008_v49  ;;  %v3284_v39 = vld [vmem:[%s7699_s6 + $0x158] sm:$0xff] }
0x1188   : > { %3218 = vadd.xlane.f32.xlu1 %v3217_v40  ;;  %v6319_v9 = vcombine.high %v3276_v48, %v3284_v39  ;;  %v6318_v12 = vcombine.low %v3276_v48, %v3284_v39  ;;  %v3279_v48 = vld [vmem:[%s7699_s6 + $0x130] sm:$0xff] }
0x1189   : > { %v3214_v8 = vsel %vm993_vm4, %v3212_v7, 0.0  ;;  %v3287_v39 = vld [vmem:[%s7699_s6 + $0x170] sm:$0xff] }
0x118a   : > { %3215 = vadd.xlane.f32.xlu0 %v3214_v8  ;;  %v6317_v8 = vcombine.high %v3275_v4, %v3283_v5  ;;  %v6325_v10 = vcombine.high %v3279_v48, %v3287_v39  ;;  %v6324_v1 = vcombine.low %v3279_v48, %v3287_v39  ;;  %v8154_v39 = vld [vmem:[%s7694_s17 + $0x8] sm:$0xff] }
0x1211   : > { %v3219_v50 = vpop.xlane.xlu1 %3218 }
0x1212   : > { %v3221_v51 = vmul.f32 0.015625, %v3219_v50  ;;  %v3245_v50 = vld [vmem:[%s7699_s6 + $0x20] sm:$0xff] }
0x1213   : > { %v3216_v52 = vpop.xlane.xlu0 %3215 }
0x1214   : > { %v3223_v53 = vadd.f32 1e-05, %v3221_v51  ;;  %v3220_v54 = vmul.f32 0.015625, %v3216_v52  ;;  %v3253_v51 = vld [vmem:[%s7699_s6 + $0x60] sm:$0xff]  ;;  %v3246_v52 = vld [vmem:[%s7699_s6 + $0x28] sm:$0xff] }
0x1216   : > { %7494 = vrsqrt.f32 %v3223_v53  ;;  %v3222_v55 = vadd.f32 1e-05, %v3220_v54  ;;  %v3254_v53 = vld [vmem:[%s7699_s6 + $0x68] sm:$0xff]  ;;  %v6304_v54 = vcombine.low %v3261_v36, %v3269_v38 }
0x1218   : > { %7496 = vrsqrt.f32 %v3222_v55  ;;  %v6306_v55 = vcombine.low %v3262_v41, %v3270_v42  ;;  %v7348_v41 = vld [vmem:[%s7704_s15 + $0x20] sm:$0xff]  }
0x1219   : > { %v7349_v42 = vld [vmem:[%s7704_s15 + $0xa0] sm:$0xff]  }
0x1223   : > { %v7495_v56 = vpop.eup %7494 }
0x1224   : > { %v3227_v60 = vmul.f32 %v7495_v56, %v8006_v6  ;;  %v6289_v56 = vcombine.high %v3245_v50, %v3253_v51 }
0x1225   : > { %v7497_v61 = vpop.eup %7496 }
0x1226   : > { %v3233_v62 = vmul.f32 %v6278_v59, %v3227_v60  ;;  %v3226_v0 = vmul.f32 %v7497_v61, %v8008_v49  ;;  %v3267_v49 = vld [vmem:[%s7699_s6 + $0xd0] sm:$0xff] }
0x1227   : > { %v6301_v13 = vcombine.high %v3259_v37, %v3267_v49  ;;  %v6300_v17 = vcombine.low %v3259_v37, %v3267_v49  ;;  %v3295_v60 = vld [vmem:[%s7699_s6 + $0x1b0] sm:$0xff] }
0x1228   : > { %v3232_v3 = vmul.f32 %v6278_v59, %v3226_v0  ;;  %v8046_v40 = vadd.f32 %v6279_v2, %v3233_v62  ;;  %v6291_v59 = vcombine.high %v3246_v52, %v3254_v53  ;;  %v3303_v61 = vld [vmem:[%s7699_s6 + $0x1f0] sm:$0xff]  ;;  %v3296_v62 = vld [vmem:[%s7699_s6 + $0x1b8] sm:$0xff] }
0x1229   : > { %v3304_v0 = vld [vmem:[%s7699_s6 + $0x1f8] sm:$0xff]  ;;  %v6341_v4 = vcombine.high %v3295_v60, %v3303_v61  ;;  %v6340_v37 = vcombine.low %v3295_v60, %v3303_v61  ;;  %v7362_v60 = vld [vmem:[%s7704_s15 + $0x40] sm:$0xff]  }
0x122a   : > { %v8048_v7 = vadd.f32 %v6279_v2, %v3232_v3  ;;  %v6288_v2 = vcombine.low %v3245_v50, %v3253_v51  ;;  %v6290_v3 = vcombine.low %v3246_v52, %v3254_v53  ;;  %v6343_v5 = vcombine.high %v3296_v62, %v3304_v0  ;;  %v7354_v50 = vld [vmem:[%s7704_s15 + $0x50] sm:$0xff]   ;;  %v7363_v61 = vld [vmem:[%s7704_s15 + $0xc0] sm:$0xff]  }
0x122b   : > { %v6342_v49 = vcombine.low %v3296_v62, %v3304_v0  ;;  %v7355_v51 = vld [vmem:[%s7704_s15 + $0xd0] sm:$0xff]   ;;  %v7364_v62 = vld [vmem:[%s7704_s15] sm:$0xff]  }
0x122c   : > { %v8052_v6 = vpack.c.bf16 %v8046_v40, %v8048_v7  ;;  %v7356_v52 = vld [vmem:[%s7704_s15 + $0x10] sm:$0xff]   ;;  %v7365_v0 = vld [vmem:[%s7704_s15 + $0x80] sm:$0xff]  }
0x122d   : > { %v7357_v53 = vld [vmem:[%s7704_s15 + $0x90] sm:$0xff]  }
0x122e   : > { %6344 = vmatmul.mubr.msk.bf16.vlgmr.msra.gmra.mxu0 %vm993_vm4, %v8052_v6  ;;  %6345 = vmatmul.mubr.msk.bf16.vlgmr.msra.gmra.mxu1 %vm993_vm4, %v8052_v6 }
0x122f   : > { %3807 = vmatpush1.bf16.msra.mxu0 %v6332_v44  ;;  %3850 = vmatpush1.bf16.msra.mxu1 %v6334_v45  ;;  %v6322_v44 = vcombine.low %v3278_v31, %v3286_v58  ;;  %v6305_v45 = vcombine.high %v3261_v36, %v3269_v38  ;;  %v7339_v31 = vld [vmem:[%s7704_s15 + $0xf0] sm:$0xff]   ;;  %v7345_v36 = vld [vmem:[%s7704_s15 + $0xa8] sm:$0xff]   ;;  %v7347_v38 = vld [vmem:[%s7704_s15 + $0xe0] sm:$0xff]  }
0x1230   : > { %3808 = vmatprep.subr.bf16.mxu0 %v6317_v8  ;;  %3851 = vmatprep.subr.bf16.mxu1 %v6319_v9  ;;  %v3280_v8 = vld [vmem:[%s7699_s6 + $0x138] sm:$0xff]  ;;  %v7340_v58 = vld [vmem:[%s7704_s15 + $0x30] sm:$0xff]  }
0x1231   : > { %3830 = vmatprep.mubr.bf16.mxu0 %v7540_v47  ;;  %3873 = vmatprep.mubr.bf16.mxu1 %v7540_v47  ;;  %v3288_v9 = vld [vmem:[%s7699_s6 + $0x178] sm:$0xff] }
0x1232   : > { %v6327_v34 = vcombine.high %v3280_v8, %v3288_v9  ;;  %v6326_v14 = vcombine.low %v3280_v8, %v3288_v9 }
0x1233   : > { %3809 = vmatpush1.bf16.msra.mxu0 %v6316_v11  ;;  %3852 = vmatpush1.bf16.msra.mxu1 %v6318_v12  ;;  %v3263_v11 = vld [vmem:[%s7699_s6 + $0xb0] sm:$0xff] }
0x1234   : > { %3810 = vmatprep.subr.bf16.mxu0 %v6301_v13  ;;  %3853 = vmatprep.subr.bf16.mxu1 %v6303_v63  ;;  %v3271_v12 = vld [vmem:[%s7699_s6 + $0xf0] sm:$0xff]  ;;  %v3264_v13 = vld [vmem:[%s7699_s6 + $0xb8] sm:$0xff] }
0x1235   : > { %v3272_v63 = vld [vmem:[%s7699_s6 + $0xf8] sm:$0xff]  ;;  %v6309_v15 = vcombine.high %v3263_v11, %v3271_v12  ;;  %v6308_v21 = vcombine.low %v3263_v11, %v3271_v12 }
0x1236   : > { %v6311_v16 = vcombine.high %v3264_v13, %v3272_v63  ;;  %v6310_v22 = vcombine.low %v3264_v13, %v3272_v63 }
0x1237   : > { %3811 = vmatpush1.bf16.msra.mxu0 %v6300_v17  ;;  %3854 = vmatpush1.bf16.msra.mxu1 %v6302_v18  ;;  %v3247_v17 = vld [vmem:[%s7699_s6 + $0x30] sm:$0xff] }
0x1238   : > { %3812 = vmatprep.subr.bf16.mxu0 %v6285_v19  ;;  %3855 = vmatprep.subr.bf16.mxu1 %v6287_v20  ;;  %v3255_v18 = vld [vmem:[%s7699_s6 + $0x70] sm:$0xff]  ;;  %v3248_v19 = vld [vmem:[%s7699_s6 + $0x38] sm:$0xff] }
0x1239   : > { %v3256_v20 = vld [vmem:[%s7699_s6 + $0x78] sm:$0xff]  ;;  %v6293_v23 = vcombine.high %v3247_v17, %v3255_v18  ;;  %s8551_s6 = sld [smem:[#allocation14_spill]] (!%p6483_p5) }
0x123a   : > { %v6295_v24 = vcombine.high %v3248_v19, %v3256_v20 }
0x123b   : > { %3813 = vmatpush1.bf16.msra.mxu0 %v6284_v25  ;;  %3856 = vmatpush1.bf16.msra.mxu1 %v6286_v26  ;;  %v6292_v25 = vcombine.low %v3247_v17, %v3255_v18  ;;  %v6294_v26 = vcombine.low %v3248_v19, %v3256_v20 }
0x123c   : > { %3892 = vmatprep.subr.bf16.mxu0 %v6337_v27  ;;  %3935 = vmatprep.subr.bf16.mxu1 %v6339_v28  ;;  %v7335_v27 = vld [vmem:[%s7704_s15 + $0xf8] sm:$0xff]  }
0x123d   : > { %v7336_v28 = vld [vmem:[%s7704_s15 + $0x38] sm:$0xff]  }
0x123e   : > { %6346 = vmatmul.mubr.msk.bf16.vlgmr.msra.gmra.mxu0 %vm993_vm4, %v8052_v6  ;;  %6347 = vmatmul.mubr.msk.bf16.vlgmr.msra.gmra.mxu1 %vm993_vm4, %v8052_v6 }
0x123f   : > { %3893 = vmatpush1.bf16.msra.mxu0 %v6336_v32  ;;  %3936 = vmatpush1.bf16.msra.mxu1 %v6338_v57  ;;  %v7341_v32 = vld [vmem:[%s7704_s15 + $0xb0] sm:$0xff]   ;;  %v7342_v57 = vld [vmem:[%s7704_s15 + $0x68] sm:$0xff]  }
0x1240   : > { %3894 = vmatprep.subr.bf16.mxu0 %v6321_v33  ;;  %3937 = vmatprep.subr.bf16.mxu1 %v6323_v35  ;;  %v7343_v33 = vld [vmem:[%s7704_s15 + $0xe8] sm:$0xff]  }
0x1241   : > { %3916 = vmatprep.mubr.bf16.mxu0 %v7540_v47  ;;  %3959 = vmatprep.mubr.bf16.mxu1 %v7540_v47  ;;  %v7344_v35 = vld [vmem:[%s7704_s15 + $0x28] sm:$0xff]  }
0x1243   : > { %3895 = vmatpush1.bf16.msra.mxu0 %v6320_v43  ;;  %3938 = vmatpush1.bf16.msra.mxu1 %v6322_v44  ;;  %v7350_v43 = vld [vmem:[%s7704_s15 + $0x58] sm:$0xff]  }
0x1244   : > { %3896 = vmatprep.subr.bf16.mxu0 %v6305_v45  ;;  %3939 = vmatprep.subr.bf16.mxu1 %v6307_v46  ;;  %v7351_v44 = vld [vmem:[%s7704_s15 + $0xd8] sm:$0xff]  }
0x1245   : > { %v7352_v45 = vld [vmem:[%s7704_s15 + $0x18] sm:$0xff]  }
0x1246   : > { %v7353_v46 = vld [vmem:[%s7704_s15 + $0x98] sm:$0xff]  }
0x1247   : > { %3897 = vmatpush1.bf16.msra.mxu0 %v6304_v54  ;;  %3940 = vmatpush1.bf16.msra.mxu1 %v6306_v55  ;;  %v7358_v54 = vld [vmem:[%s7704_s15 + $0x48] sm:$0xff]  }
0x1248   : > { %3898 = vmatprep.subr.bf16.mxu0 %v6289_v56  ;;  %3941 = vmatprep.subr.bf16.mxu1 %v6291_v59  ;;  %v7359_v55 = vld [vmem:[%s7704_s15 + $0xc8] sm:$0xff]  }
0x1249   : > { %v7360_v56 = vld [vmem:[%s7704_s15 + $0x8] sm:$0xff]  }
0x124a   : > { %v7361_v59 = vld [vmem:[%s7704_s15 + $0x88] sm:$0xff]  }
0x124b   : > { %3899 = vmatpush1.bf16.msra.mxu0 %v6288_v2  ;;  %3942 = vmatpush1.bf16.msra.mxu1 %v6290_v3  ;;  %v7366_v2 = vld [vmem:[%s7704_s15 + $0x178] sm:$0xff]  }
0x124c   : > { %3978 = vmatprep.subr.bf16.mxu0 %v6341_v4  ;;  %4021 = vmatprep.subr.bf16.mxu1 %v6343_v5  ;;  %v7367_v3 = vld [vmem:[%s7704_s15 + $0x1f8] sm:$0xff]   ;;  %v3309_v4 = vlaneseq }
0x124e   : > { %6348 = vmatmul.mubr.msk.bf16.vlgmr.msra.gmra.mxu0 %vm993_vm4, %v8052_v6  ;;  %6349 = vmatmul.mubr.msk.bf16.vlgmr.msra.gmra.mxu1 %vm993_vm4, %v8052_v6  ;;  %v8150_v5 = vshrl.u32 %v3309_v4, 7  ;;  %v7378_v4 = vld [vmem:[%s7704_s15 + $0x160] sm:$0xff]  }
0x124f   : > { %3979 = vmatpush1.bf16.msra.mxu0 %v6340_v37  ;;  %4022 = vmatpush1.bf16.msra.mxu1 %v6342_v49 }
0x1250   : > { %3980 = vmatprep.subr.bf16.mxu0 %v6325_v10  ;;  %4023 = vmatprep.subr.bf16.mxu1 %v6327_v34  ;;  %v3335_v48 = vsub.s32 6, %v8150_v5  ;;  %v3315_v9 = vsub.s32 1, %v8150_v5  ;;  %v3323_v37 = vsub.s32 3, %v8150_v5  ;;  %v3311_v49 = vsub.s32 0, %v8150_v5  ;;  %v8166_v34 = vld [vmem:[%s7694_s17] sm:$0xff]  ;;  %s8550_s17 = sld [smem:[#allocation16_spill]] (!%p6483_p5) }
0x1251   : > { %4002 = vmatprep.mubr.bf16.mxu0 %v7540_v47  ;;  %4045 = vmatprep.mubr.bf16.mxu1 %v7540_v47  ;;  %v7334_v47 = vld [vmem:[%s7704_s15 + $0x78] sm:$0xff]   ;;  %v3319_v10 = vsub.s32 2, %v8150_v5 }
0x1252   : > { %v8159_v8 = vrot.slane %v8154_v39, %v3335_v48  ;;  %v3316_v13 = vrot.slane %v8166_v34, %v3315_v9  ;;  %v3324_v63 = vrot.slane %v8166_v34, %v3323_v37 }
0x1253   : > { %3981 = vmatpush1.bf16.msra.mxu0 %v6324_v1  ;;  %4024 = vmatpush1.bf16.msra.mxu1 %v6326_v14  ;;  %v3312_v1 = vrot.slane %v8166_v34, %v3311_v49  ;;  %v3320_v14 = vrot.slane %v8166_v34, %v3319_v10 }
0x1254   : > { %3982 = vmatprep.subr.bf16.mxu0 %v6309_v15  ;;  %4025 = vmatprep.subr.bf16.mxu1 %v6311_v16 }
0x1257   : > { %3983 = vmatpush1.bf16.msra.mxu0 %v6308_v21  ;;  %4026 = vmatpush1.bf16.msra.mxu1 %v6310_v22 }
0x1258   : > { %3984 = vmatprep.subr.bf16.mxu0 %v6293_v23  ;;  %4027 = vmatprep.subr.bf16.mxu1 %v6295_v24 }
0x125b   : > { %3985 = vmatpush1.bf16.msra.mxu0 %v6292_v25  ;;  %4028 = vmatpush1.bf16.msra.mxu1 %v6294_v26 }
0x125c   : > { %6678 = vmatprep.subr.bf16.mxu0 %v7334_v47  ;;  %6700 = vmatprep.subr.bf16.mxu1 %v7335_v27 }
0x125e   : > { %6350 = vmatmul.mubr.msk.bf16.vlgmr.msra.gmra.mxu0 %vm993_vm4, %v8052_v6  ;;  %6351 = vmatmul.mubr.msk.bf16.vlgmr.msra.gmra.mxu1 %vm993_vm4, %v8052_v6  ;;  %v7346_v6 = vld [vmem:[%s7704_s15 + $0x60] sm:$0xff]  }
0x125f   : > { %6679 = vmatpush3.bf16.msra.mxu0 %v7336_v28  ;;  %6701 = vmatpush3.bf16.msra.mxu1 %v7337_v29 }
0x1260   : > { %6680 = vmatprep.subr.bf16.mxu0 %v7338_v30  ;;  %6702 = vmatprep.subr.bf16.mxu1 %v7339_v31 }
0x1263   : > { %6681 = vmatpush3.bf16.msra.mxu0 %v7340_v58  ;;  %6703 = vmatpush3.bf16.msra.mxu1 %v7341_v32 }
0x1264   : > { %6682 = vmatprep.subr.bf16.mxu0 %v7342_v57  ;;  %6704 = vmatprep.subr.bf16.mxu1 %v7343_v33 }
0x1267   : > { %6683 = vmatpush3.bf16.msra.mxu0 %v7344_v35  ;;  %6705 = vmatpush3.bf16.msra.mxu1 %v7345_v36 }
0x1268   : > { %6684 = vmatprep.subr.bf16.mxu0 %v7346_v6  ;;  %6706 = vmatprep.subr.bf16.mxu1 %v7347_v38  ;;  %v7368_v6 = vld [vmem:[%s7704_s15 + $0x138] sm:$0xff]  }
0x1269   : > { %v7369_v38 = vld [vmem:[%s7704_s15 + $0x1b8] sm:$0xff]  }
0x126b   : > { %6685 = vmatpush3.bf16.msra.mxu0 %v7348_v41  ;;  %6707 = vmatpush3.bf16.msra.mxu1 %v7349_v42 }
0x126c   : > { %6686 = vmatprep.subr.bf16.mxu0 %v7350_v43  ;;  %6708 = vmatprep.subr.bf16.mxu1 %v7351_v44  ;;  %v7370_v43 = vld [vmem:[%s7704_s15 + $0x170] sm:$0xff]  }
0x126d   : > { %v7371_v44 = vld [vmem:[%s7704_s15 + $0x1f0] sm:$0xff]  }
0x126f   : > { %6687 = vmatpush3.bf16.msra.mxu0 %v7352_v45  ;;  %6709 = vmatpush3.bf16.msra.mxu1 %v7353_v46  ;;  %v3331_v45 = vsub.s32 5, %v8150_v5  ;;  %v3339_v46 = vsub.s32 7, %v8150_v5 }
0x1270   : > { %6688 = vmatprep.subr.bf16.mxu0 %v7354_v50  ;;  %6710 = vmatprep.subr.bf16.mxu1 %v7355_v51  ;;  %v7372_v50 = vld [vmem:[%s7704_s15 + $0x130] sm:$0xff]  }
0x1271   : > { %v7373_v51 = vld [vmem:[%s7704_s15 + $0x1b0] sm:$0xff]  }
0x1273   : > { %6689 = vmatpush3.bf16.msra.mxu0 %v7356_v52  ;;  %6711 = vmatpush3.bf16.msra.mxu1 %v7357_v53 }
0x1274   : > { %6690 = vmatprep.subr.bf16.mxu0 %v7358_v54  ;;  %6712 = vmatprep.subr.bf16.mxu1 %v7359_v55  ;;  %v7374_v54 = vld [vmem:[%s7704_s15 + $0x168] sm:$0xff]  }
0x1275   : > { %v7375_v55 = vld [vmem:[%s7704_s15 + $0x1e8] sm:$0xff]  }
0x1277   : > { %6691 = vmatpush3.bf16.msra.mxu0 %v7360_v56  ;;  %6713 = vmatpush3.bf16.msra.mxu1 %v7361_v59  ;;  %v3332_v56 = vrot.slane %v8166_v34, %v3331_v45  ;;  %v3340_v59 = vrot.slane %v8166_v34, %v3339_v46 }
0x1278   : > { %6692 = vmatprep.subr.bf16.mxu0 %v7362_v60  ;;  %6714 = vmatprep.subr.bf16.mxu1 %v7363_v61 }
0x127b   : > { %6693 = vmatpush3.bf16.msra.mxu0 %v7364_v62  ;;  %6715 = vmatpush3.bf16.msra.mxu1 %v7365_v0  ;;  %v7376_v62 = vld [vmem:[%s7704_s15 + $0x128] sm:$0xff]  }
0x127c   : > { %6722 = vmatprep.subr.bf16.mxu0 %v7366_v2  ;;  %6744 = vmatprep.subr.bf16.mxu1 %v7367_v3  ;;  %v7377_v0 = vld [vmem:[%s7704_s15 + $0x1a8] sm:$0xff]  }
0x12ee   : > { %v3746_v11 = vpop.f32.mrf.mxu0  ;;  %v3789_v12 = vpop.f32.mrf.mxu1 }
0x12ef   : > { %v3747_v23 = vadd.f32 %v3746_v11, %v3312_v1  ;;  %v3790_v24 = vadd.f32 %v3789_v12, %v3320_v14  ;;  %v7379_v11 = vld [vmem:[%s7704_s15 + $0x1e0] sm:$0xff]  }
0x12f0   : > { %v3748_v15 = vpop.f32.mrf.mxu0  ;;  %v3791_v16 = vpop.f32.mrf.mxu1 }
0x12f1   : > { %v3749_v19 = vadd.f32 %v3748_v15, %v3316_v13  ;;  %v3792_v20 = vadd.f32 %v3791_v16, %v3324_v63  ;;  %v4056_v57 = vmax.f32 %v3747_v23, 0.0  ;;  %v4058_v33 = vmax.f32 %v3790_v24, 0.0  ;;  %v7380_v16 = vld [vmem:[%s7704_s15 + $0x120] sm:$0xff]  }
0x12f2   : > { %v3750_v17 = vpop.f32.mrf.mxu0  ;;  %v3793_v18 = vpop.f32.mrf.mxu1 }
0x12f3   : > { %v3751_v21 = vadd.f32 %v3750_v17, %v3312_v1  ;;  %v3794_v22 = vadd.f32 %v3793_v18, %v3320_v14  ;;  %v4057_v30 = vmax.f32 %v3749_v19, 0.0  ;;  %v4059_v31 = vmax.f32 %v3792_v20, 0.0  ;;  %v7381_v17 = vld [vmem:[%s7704_s15 + $0x1a0] sm:$0xff]   ;;  %v7382_v18 = vld [vmem:[%s7704_s15 + $0x158] sm:$0xff]  }
0x12f4   : > { %v3752_v25 = vpop.f32.mrf.mxu0  ;;  %v3795_v26 = vpop.f32.mrf.mxu1  ;;  %v7383_v19 = vld [vmem:[%s7704_s15 + $0x1d8] sm:$0xff]  }
0x12f5   : > { %v3753_v47 = vadd.f32 %v3752_v25, %v3316_v13  ;;  %v3796_v27 = vadd.f32 %v3795_v26, %v3324_v63  ;;  %v4072_v28 = vmax.f32 %v3751_v21, 0.0  ;;  %v4074_v29 = vmax.f32 %v3794_v22, 0.0  ;;  %v7384_v26 = vld [vmem:[%s7704_s15 + $0x118] sm:$0xff]  }
0x12f7   : > { %v4073_v58 = vmax.f32 %v3753_v47, 0.0  ;;  %v4075_v32 = vmax.f32 %v3796_v27, 0.0  ;;  %v4088_v41 = vpack.c.bf16 %v4072_v28, %v4056_v57  ;;  %v4090_v42 = vpack.c.bf16 %v4074_v29, %v4058_v33  ;;  %v7385_v47 = vld [vmem:[%s7704_s15 + $0x198] sm:$0xff]   ;;  %v7386_v27 = vld [vmem:[%s7704_s15 + $0x150] sm:$0xff]   ;;  %v7390_v57 = vld [vmem:[%s7704_s15 + $0x148] sm:$0xff]  }
0x12f8   : > { %v7387_v28 = vld [vmem:[%s7704_s15 + $0x1d0] sm:$0xff]   ;;  %v3327_v29 = vsub.s32 4, %v8150_v5  ;;  %v7391_v33 = vld [vmem:[%s7704_s15 + $0x1c8] sm:$0xff]  }
0x12f9   : > { %v4089_v35 = vpack.c.bf16 %v4073_v58, %v4057_v30  ;;  %v4091_v36 = vpack.c.bf16 %v4075_v32, %v4059_v31  ;;  %v7388_v30 = vld [vmem:[%s7704_s15 + $0x110] sm:$0xff]  }
0x12fa   : > { %v7389_v31 = vld [vmem:[%s7704_s15 + $0x190] sm:$0xff]  }
0x12fb   : > { %5165 = vmatprep.mubr.bf16.mxu0 %v4089_v35  ;;  %5206 = vmatprep.mubr.bf16.mxu1 %v4091_v36  ;;  %v3328_v35 = vrot.slane %v8166_v34, %v3327_v29  ;;  %v3336_v36 = vrot.slane %v8166_v34, %v3335_v48  ;;  %v7394_v34 = vld [vmem:[%s7704_s15 + $0x140] sm:$0xff]  }
0x12fc   : > { %5166 = vmatmul.mubr.bf16.vlgmr.msra.gmra.mxu0 %v4088_v41  ;;  %5207 = vmatmul.mubr.bf16.vlgmr.msra.gmra.mxu1 %v4090_v42  ;;  %v3348_v41 = vrot.slane %v8154_v39, %v3315_v9  ;;  %v7392_v42 = vld [vmem:[%s7704_s15 + $0x108] sm:$0xff]   ;;  %v7395_v9 = vld [vmem:[%s7704_s15 + $0x1c0] sm:$0xff]  }
0x12fd   : > { %6723 = vmatpush3.bf16.msra.mxu0 %v7368_v6  ;;  %6745 = vmatpush3.bf16.msra.mxu1 %v7369_v38 }
0x12fe   : > { %v8188_v52 = vpop.f32.mrf.mxu0  ;;  %v8190_v53 = vpop.f32.mrf.mxu1  ;;  %6724 = vmatprep.subr.bf16.mxu0 %v7370_v43  ;;  %6746 = vmatprep.subr.bf16.mxu1 %v7371_v44  ;;  %v7393_v43 = vld [vmem:[%s7704_s15 + $0x188] sm:$0xff]  }
0x1300   : > { %v3834_v60 = vpop.f32.mrf.mxu0  ;;  %v3877_v61 = vpop.f32.mrf.mxu1 }
0x1301   : > { %6725 = vmatpush3.bf16.msra.mxu0 %v7372_v50  ;;  %6747 = vmatpush3.bf16.msra.mxu1 %v7373_v51  ;;  %v3835_v12 = vadd.f32 %v3834_v60, %v3332_v56  ;;  %v3878_v13 = vadd.f32 %v3877_v61, %v3340_v59  ;;  %v3356_v51 = vrot.slane %v8154_v39, %v3323_v37 }
0x1302   : > { %v3836_v2 = vpop.f32.mrf.mxu0  ;;  %v3879_v3 = vpop.f32.mrf.mxu1  ;;  %6726 = vmatprep.subr.bf16.mxu0 %v7374_v54  ;;  %6748 = vmatprep.subr.bf16.mxu1 %v7375_v55  ;;  %v3833_v55 = vadd.f32 %v8188_v52, %v3328_v35  ;;  %v7398_v52 = vld [vmem:[%s7704_s15 + $0x278] sm:$0xff]  }
0x1303   : > { %v4061_v20 = vmax.f32 %v3835_v12, 0.0  ;;  %v4063_v21 = vmax.f32 %v3878_v13, 0.0  ;;  %v3837_v44 = vadd.f32 %v3836_v2, %v3328_v35  ;;  %v3880_v50 = vadd.f32 %v3879_v3, %v3336_v36  ;;  %v7397_v2 = vld [vmem:[%s7704_s15 + $0x180] sm:$0xff]   ;;  %v7399_v12 = vld [vmem:[%s7704_s15 + $0x2f8] sm:$0xff]  }
0x1304   : > { %v3838_v63 = vpop.f32.mrf.mxu0  ;;  %v3881_v1 = vpop.f32.mrf.mxu1  ;;  %v4060_v13 = vmax.f32 %v3833_v55, 0.0 }
0x1305   : > { %v3839_v14 = vadd.f32 %v3838_v63, %v3332_v56  ;;  %v3882_v15 = vadd.f32 %v3881_v1, %v3340_v59  ;;  %6727 = vmatpush3.bf16.msra.mxu0 %v7376_v62  ;;  %6749 = vmatpush3.bf16.msra.mxu1 %v7377_v0  ;;  %v3876_v56 = vadd.f32 %v8190_v53, %v3336_v36  ;;  %v7396_v0 = vld [vmem:[%s7704_s15 + $0x100] sm:$0xff]   ;;  %v4076_v3 = vmax.f32 %v3837_v44, 0.0  ;;  %v7417_v44 = vld [vmem:[%s7704_s15 + $0x298] sm:$0xff]  }
0x1306   : > { %6728 = vmatprep.subr.bf16.mxu0 %v7378_v4  ;;  %6750 = vmatprep.subr.bf16.mxu1 %v7379_v11  ;;  %v4078_v4 = vmax.f32 %v3880_v50, 0.0  ;;  %v7413_v36 = vld [vmem:[%s7704_s15 + $0x2a0] sm:$0xff]   ;;  %v7418_v50 = vld [vmem:[%s7704_s15 + $0x250] sm:$0xff]  }
0x1307   : > { %v4077_v22 = vmax.f32 %v3839_v14, 0.0  ;;  %v4079_v23 = vmax.f32 %v3882_v15, 0.0  ;;  %v4062_v63 = vmax.f32 %v3876_v56, 0.0  ;;  %v7400_v15 = vld [vmem:[%s7704_s15 + $0x238] sm:$0xff]   ;;  %v7421_v56 = vld [vmem:[%s7704_s15 + $0x290] sm:$0xff]  }
0x1309   : > { %v4093_v24 = vpack.c.bf16 %v4077_v22, %v4061_v20  ;;  %v4095_v25 = vpack.c.bf16 %v4079_v23, %v4063_v21  ;;  %6729 = vmatpush3.bf16.msra.mxu0 %v7380_v16  ;;  %6751 = vmatpush3.bf16.msra.mxu1 %v7381_v17  ;;  %v4092_v16 = vpack.c.bf16 %v4076_v3, %v4060_v13  ;;  %v7402_v21 = vld [vmem:[%s7704_s15 + $0x270] sm:$0xff]  }
0x130a   : > { %6730 = vmatprep.subr.bf16.mxu0 %v7382_v18  ;;  %6752 = vmatprep.subr.bf16.mxu1 %v7383_v19  ;;  %v4094_v17 = vpack.c.bf16 %v4078_v4, %v4062_v63  ;;  %v7401_v19 = vld [vmem:[%s7704_s15 + $0x2b8] sm:$0xff]   ;;  %v7403_v22 = vld [vmem:[%s7704_s15 + $0x2f0] sm:$0xff]   ;;  %v3364_v3 = vrot.slane %v8154_v39, %v3331_v45  ;;  %v7428_v63 = vld [vmem:[%s7704_s15 + $0x200] sm:$0xff]  }
0x130b   : > { %5247 = vmatprep.mubr.bf16.mxu0 %v4093_v24  ;;  %5288 = vmatprep.mubr.bf16.mxu1 %v4095_v25  ;;  %v7404_v24 = vld [vmem:[%s7704_s15 + $0x230] sm:$0xff]  }
0x130c   : > { %v7405_v25 = vld [vmem:[%s7704_s15 + $0x2b0] sm:$0xff]  }
0x130d   : > { %6731 = vmatpush3.bf16.msra.mxu0 %v7384_v26  ;;  %6753 = vmatpush3.bf16.msra.mxu1 %v7385_v47  ;;  %v7406_v26 = vld [vmem:[%s7704_s15 + $0x268] sm:$0xff]  }
0x130e   : > { %v8215_v58 = vpop.f32.mrf.mxu0  ;;  %v8217_v32 = vpop.f32.mrf.mxu1  ;;  %6732 = vmatprep.subr.bf16.mxu0 %v7386_v27  ;;  %6754 = vmatprep.subr.bf16.mxu1 %v7387_v28  ;;  %v7407_v47 = vld [vmem:[%s7704_s15 + $0x2e8] sm:$0xff]  }
0x130f   : > { %v7408_v27 = vld [vmem:[%s7704_s15 + $0x228] sm:$0xff]  }
0x1310   : > { %v3920_v6 = vpop.f32.mrf.mxu0  ;;  %v3963_v38 = vpop.f32.mrf.mxu1  ;;  %v7409_v28 = vld [vmem:[%s7704_s15 + $0x2a8] sm:$0xff]  }
0x1311   : > { %6733 = vmatpush3.bf16.msra.mxu0 %v7388_v30  ;;  %6755 = vmatpush3.bf16.msra.mxu1 %v7389_v31  ;;  %v3921_v61 = vadd.f32 %v3920_v6, %v3348_v41  ;;  %v3964_v11 = vadd.f32 %v3963_v38, %v3356_v51  ;;  %v7410_v30 = vld [vmem:[%s7704_s15 + $0x260] sm:$0xff]   ;;  %v7414_v6 = vld [vmem:[%s7704_s15 + $0x258] sm:$0xff]  }
0x1312   : > { %v8235_v54 = vpop.f32.mrf.mxu0  ;;  %v8237_v48 = vpop.f32.mrf.mxu1  ;;  %6734 = vmatprep.subr.bf16.mxu0 %v7390_v57  ;;  %6756 = vmatprep.subr.bf16.mxu1 %v7391_v33  ;;  %v7411_v31 = vld [vmem:[%s7704_s15 + $0x2e0] sm:$0xff]   ;;  %v7415_v38 = vld [vmem:[%s7704_s15 + $0x2d8] sm:$0xff]  }
0x1313   : > { %v4065_v14 = vmax.f32 %v3921_v61, 0.0  ;;  %v4067_v18 = vmax.f32 %v3964_v11, 0.0  ;;  %v7412_v33 = vld [vmem:[%s7704_s15 + $0x220] sm:$0xff]   ;;  %v3344_v61 = vrot.slane %v8154_v39, %v3311_v49  ;;  %v7425_v11 = vld [vmem:[%s7704_s15 + $0x288] sm:$0xff]  }
0x1314   : > { %v3924_v59 = vpop.f32.mrf.mxu0  ;;  %v3967_v60 = vpop.f32.mrf.mxu1  ;;  %v7426_v49 = vld [vmem:[%s7704_s15 + $0x240] sm:$0xff]  }
0x1315   : > { %v3925_v37 = vadd.f32 %v3924_v59, %v3348_v41  ;;  %v3968_v62 = vadd.f32 %v3967_v60, %v3356_v51  ;;  %6735 = vmatpush3.bf16.msra.mxu0 %v7392_v42  ;;  %6757 = vmatpush3.bf16.msra.mxu1 %v7393_v43  ;;  %v7416_v42 = vld [vmem:[%s7704_s15 + $0x218] sm:$0xff]   ;;  %v7419_v51 = vld [vmem:[%s7704_s15 + $0x2d0] sm:$0xff]   ;;  %v7422_v59 = vld [vmem:[%s7704_s15 + $0x248] sm:$0xff]  }
0x1316   : > { %6736 = vmatprep.subr.bf16.mxu0 %v7394_v34  ;;  %6758 = vmatprep.subr.bf16.mxu1 %v7395_v9  ;;  %v7420_v9 = vld [vmem:[%s7704_s15 + $0x210] sm:$0xff]   ;;  %v7423_v60 = vld [vmem:[%s7704_s15 + $0x2c8] sm:$0xff]  }
0x1317   : > { %v4081_v53 = vmax.f32 %v3925_v37, 0.0  ;;  %v4083_v1 = vmax.f32 %v3968_v62, 0.0  ;;  %v3352_v37 = vrot.slane %v8154_v39, %v3319_v10  ;;  %v3372_v10 = vrot.slane %v8154_v39, %v3339_v46 }
0x1319   : > { %6737 = vmatpush3.bf16.msra.mxu0 %v7396_v0  ;;  %6759 = vmatpush3.bf16.msra.mxu1 %v7397_v2  ;;  %v4097_v20 = vpack.c.bf16 %v4081_v53, %v4065_v14  ;;  %v4099_v23 = vpack.c.bf16 %v4083_v1, %v4067_v18  ;;  %v7424_v0 = vld [vmem:[%s7704_s15 + $0x208] sm:$0xff]   ;;  %v3923_v2 = vadd.f32 %v8235_v54, %v3344_v61  ;;  %v7427_v54 = vld [vmem:[%s7704_s15 + $0x2c0] sm:$0xff]  }
0x131a   : > { %6766 = vmatprep.subr.bf16.mxu0 %v7398_v52  ;;  %6788 = vmatprep.subr.bf16.mxu1 %v7399_v12  ;;  %v3966_v52 = vadd.f32 %v8237_v48, %v3352_v37  ;;  %v3919_v12 = vadd.f32 %v8215_v58, %v3344_v61  ;;  %v3962_v45 = vadd.f32 %v8217_v32, %v3352_v37  ;;  %v7429_v48 = vld [vmem:[%s7704_s15 + $0x280] sm:$0xff]   ;;  %v7452_v61 = vld [vmem:[%s7704_s15 + $0x310] sm:$0xff]  }
0x131b   : > { %v4080_v1 = vmax.f32 %v3923_v2, 0.0  ;;  %v7453_v37 = vld [vmem:[%s7704_s15 + $0x390] sm:$0xff]   ;;  %v3360_v2 = vrot.slane %v8154_v39, %v3327_v29  ;;  %v7460_v39 = vld [vmem:[%s7704_s15 + $0x300] sm:$0xff]  }
0x131c   : > { %5248 = vmatmul.mubr.bf16.vlgmr.msra.gmra.mxu0 %v4092_v16  ;;  %5289 = vmatmul.mubr.bf16.vlgmr.msra.gmra.mxu1 %v4094_v17  ;;  %v4082_v46 = vmax.f32 %v3966_v52, 0.0  ;;  %v7431_v17 = vld [vmem:[%s7704_s15 + $0x3f8] sm:$0xff]   ;;  %v4064_v58 = vmax.f32 %v3919_v12, 0.0  ;;  %v4066_v32 = vmax.f32 %v3962_v45, 0.0 }
0x131d   : > { %6767 = vmatpush3.bf16.msra.mxu0 %v7400_v15  ;;  %5329 = vmatprep.mubr.bf16.mxu0 %v4097_v20  ;;  %v7430_v15 = vld [vmem:[%s7704_s15 + $0x378] sm:$0xff]  }
0x131e   : > { %6789 = vmatpush3.bf16.msra.mxu1 %v7401_v19  ;;  %5370 = vmatprep.mubr.bf16.mxu1 %v4099_v23  ;;  %v8259_v57 = vpop.f32.mrf.mxu0  ;;  %v8262_v35 = vpop.f32.mrf.mxu1  ;;  %v7432_v20 = vld [vmem:[%s7704_s15 + $0x338] sm:$0xff]  }
0x131f   : > { %6768 = vmatprep.subr.bf16.mxu0 %v7402_v21  ;;  %6790 = vmatprep.subr.bf16.mxu1 %v7403_v22  ;;  %v4096_v21 = vpack.c.bf16 %v4080_v1, %v4064_v58  ;;  %v7433_v23 = vld [vmem:[%s7704_s15 + $0x3b8] sm:$0xff]   ;;  %v4048_v5 = vadd.f32 %v8262_v35, %v8159_v8 }
0x1320   : > { %v4006_v41 = vpop.f32.mrf.mxu0  ;;  %v4049_v43 = vpop.f32.mrf.mxu1 }
0x1321   : > { %6769 = vmatpush3.bf16.msra.mxu0 %v7404_v24  ;;  %v4007_v14 = vadd.f32 %v4006_v41, %v3364_v3  ;;  %v4050_v16 = vadd.f32 %v4049_v43, %v3372_v10  ;;  %v4098_v24 = vpack.c.bf16 %v4082_v46, %v4066_v32  ;;  %v7442_v41 = vld [vmem:[%s7704_s15 + $0x360] sm:$0xff]   ;;  %v4070_v45 = vmax.f32 %v4048_v5, 0.0 }
0x1322   : > { %6791 = vmatpush3.bf16.msra.mxu1 %v7405_v25  ;;  %6770 = vmatprep.subr.bf16.mxu0 %v7406_v26  ;;  %v8271_v34 = vpop.f32.mrf.mxu0  ;;  %v8274_v55 = vpop.f32.mrf.mxu1  ;;  %v7434_v26 = vld [vmem:[%s7704_s15 + $0x370] sm:$0xff]   ;;  %v7444_v43 = vld [vmem:[%s7704_s15 + $0x320] sm:$0xff]  }
0x1323   : > { %6792 = vmatprep.subr.bf16.mxu1 %v7407_v47  ;;  %v4069_v22 = vmax.f32 %v4007_v14, 0.0  ;;  %v4071_v25 = vmax.f32 %v4050_v16, 0.0  ;;  %v4052_v52 = vadd.f32 %v8274_v55, %v8159_v8 }
0x1324   : > { %v4010_v62 = vpop.f32.mrf.mxu0  ;;  %v4053_v4 = vpop.f32.mrf.mxu1 }
0x1325   : > { %6771 = vmatpush3.bf16.msra.mxu0 %v7408_v27  ;;  %v4011_v53 = vadd.f32 %v4010_v62, %v3364_v3  ;;  %v4054_v13 = vadd.f32 %v4053_v4, %v3372_v10  ;;  %v7435_v27 = vld [vmem:[%s7704_s15 + $0x3f0] sm:$0xff]   ;;  %v7454_v62 = vld [vmem:[%s7704_s15 + $0x348] sm:$0xff]   ;;  %v4009_v4 = vadd.f32 %v8271_v34, %v3360_v2  ;;  %v7459_v10 = vld [vmem:[%s7704_s15 + $0x3c0] sm:$0xff]   ;;  %v4086_v12 = vmax.f32 %v4052_v52, 0.0 }
0x1326   : > { %6793 = vmatpush3.bf16.msra.mxu1 %v7409_v28  ;;  %6772 = vmatprep.subr.bf16.mxu0 %v7410_v30  ;;  %v7436_v30 = vld [vmem:[%s7704_s15 + $0x330] sm:$0xff]   ;;  %v7456_v3 = vld [vmem:[%s7704_s15 + $0x308] sm:$0xff]   ;;  %v7461_v34 = vld [vmem:[%s7704_s15 + $0x380] sm:$0xff]  }
0x1327   : > { %6794 = vmatprep.subr.bf16.mxu1 %v7411_v31  ;;  %v4085_v18 = vmax.f32 %v4011_v53, 0.0  ;;  %v4087_v19 = vmax.f32 %v4054_v13, 0.0  ;;  %v7437_v31 = vld [vmem:[%s7704_s15 + $0x3b0] sm:$0xff]   ;;  %v4084_v29 = vmax.f32 %v4009_v4, 0.0  ;;  %v4102_v55 = vpack.c.bf16 %v4086_v12, %v4070_v45 }
0x1329   : > { %6773 = vmatpush3.bf16.msra.mxu0 %v7412_v33  ;;  %v4101_v47 = vpack.c.bf16 %v4085_v18, %v4069_v22  ;;  %v4103_v28 = vpack.c.bf16 %v4087_v19, %v4071_v25  ;;  %v7438_v33 = vld [vmem:[%s7704_s15 + $0x368] sm:$0xff]  }
0x132a   : > { %6795 = vmatpush3.bf16.msra.mxu1 %v7413_v36  ;;  %6774 = vmatprep.subr.bf16.mxu0 %v7414_v6  ;;  %v7439_v36 = vld [vmem:[%s7704_s15 + $0x3e8] sm:$0xff]  }
0x132b   : > { %6796 = vmatprep.subr.bf16.mxu1 %v7415_v38  ;;  %v7440_v6 = vld [vmem:[%s7704_s15 + $0x328] sm:$0xff]  }
0x132c   : > { %v7441_v38 = vld [vmem:[%s7704_s15 + $0x3a8] sm:$0xff]  }
0x132d   : > { %6775 = vmatpush3.bf16.msra.mxu0 %v7416_v42  ;;  %v7443_v42 = vld [vmem:[%s7704_s15 + $0x3e0] sm:$0xff]  }
0x132e   : > { %6797 = vmatpush3.bf16.msra.mxu1 %v7417_v44  ;;  %6776 = vmatprep.subr.bf16.mxu0 %v7418_v50  ;;  %v7445_v44 = vld [vmem:[%s7704_s15 + $0x3a0] sm:$0xff]   ;;  %v7446_v50 = vld [vmem:[%s7704_s15 + $0x358] sm:$0xff]  }
0x132f   : > { %6798 = vmatprep.subr.bf16.mxu1 %v7419_v51  ;;  %v7447_v51 = vld [vmem:[%s7704_s15 + $0x3d8] sm:$0xff]  }
0x1331   : > { %6777 = vmatpush3.bf16.msra.mxu0 %v7420_v9  ;;  %v7448_v9 = vld [vmem:[%s7704_s15 + $0x318] sm:$0xff]  }
0x1332   : > { %6799 = vmatpush3.bf16.msra.mxu1 %v7421_v56  ;;  %6778 = vmatprep.subr.bf16.mxu0 %v7422_v59  ;;  %v7449_v56 = vld [vmem:[%s7704_s15 + $0x398] sm:$0xff]   ;;  %v7450_v59 = vld [vmem:[%s7704_s15 + $0x350] sm:$0xff]  }
0x1333   : > { %6800 = vmatprep.subr.bf16.mxu1 %v7423_v60  ;;  %v7451_v60 = vld [vmem:[%s7704_s15 + $0x3d0] sm:$0xff]  }
0x1335   : > { %6779 = vmatpush3.bf16.msra.mxu0 %v7424_v0  ;;  %v7455_v0 = vld [vmem:[%s7704_s15 + $0x3c8] sm:$0xff]  }
0x1336   : > { %6801 = vmatpush3.bf16.msra.mxu1 %v7425_v11  ;;  %6780 = vmatprep.subr.bf16.mxu0 %v7426_v49  ;;  %v7457_v11 = vld [vmem:[%s7704_s15 + $0x388] sm:$0xff]   ;;  %v7458_v49 = vld [vmem:[%s7704_s15 + $0x340] sm:$0xff]  }
0x1337   : > { %6802 = vmatprep.subr.bf16.mxu1 %v7427_v54  ;;  %v4005_v54 = vadd.f32 %v8259_v57, %v3360_v2 }
0x1339   : > { %6781 = vmatpush3.bf16.msra.mxu0 %v7428_v63  ;;  %v4068_v53 = vmax.f32 %v4005_v54, 0.0 }
0x133a   : > { %6803 = vmatpush3.bf16.msra.mxu1 %v7429_v48  ;;  %6810 = vmatprep.subr.bf16.mxu0 %v7430_v15 }
0x133b   : > { %6832 = vmatprep.subr.bf16.mxu1 %v7431_v17  ;;  %v4100_v13 = vpack.c.bf16 %v4084_v29, %v4068_v53 }
0x133c   : > { %5330 = vmatmul.mubr.bf16.vlgmr.msra.gmra.mxu0 %v4096_v21  ;;  %v6352_v21 = vld [vmem:[%s7689_s13 + $0x3] ss:$0 sm:$0xff] }
0x133d   : > { %5371 = vmatmul.mubr.bf16.vlgmr.msra.gmra.mxu1 %v4098_v24  ;;  %6811 = vmatpush3.bf16.msra.mxu0 %v7432_v20 }
0x133e   : > { %5411 = vmatprep.mubr.bf16.mxu0 %v4101_v47  ;;  %6833 = vmatpush3.bf16.msra.mxu1 %v7433_v23 }
0x133f   : > { %5452 = vmatprep.mubr.bf16.mxu1 %v4103_v28  ;;  %6812 = vmatprep.subr.bf16.mxu0 %v7434_v26 }
0x1340   : > { %6834 = vmatprep.subr.bf16.mxu1 %v7435_v27 }
0x1341   : > { %6813 = vmatpush3.bf16.msra.mxu0 %v7436_v30 }
0x1342   : > { %6835 = vmatpush3.bf16.msra.mxu1 %v7437_v31  ;;  %6814 = vmatprep.subr.bf16.mxu0 %v7438_v33 }
0x1343   : > { %6836 = vmatprep.subr.bf16.mxu1 %v7439_v36 }
0x1345   : > { %6815 = vmatpush3.bf16.msra.mxu0 %v7440_v6 }
0x1346   : > { %6837 = vmatpush3.bf16.msra.mxu1 %v7441_v38  ;;  %6816 = vmatprep.subr.bf16.mxu0 %v7442_v41 }
0x1347   : > { %6838 = vmatprep.subr.bf16.mxu1 %v7443_v42 }
0x1349   : > { %6817 = vmatpush3.bf16.msra.mxu0 %v7444_v43 }
0x134a   : > { %6839 = vmatpush3.bf16.msra.mxu1 %v7445_v44  ;;  %6818 = vmatprep.subr.bf16.mxu0 %v7446_v50 }
0x134b   : > { %6840 = vmatprep.subr.bf16.mxu1 %v7447_v51 }
0x134d   : > { %6819 = vmatpush3.bf16.msra.mxu0 %v7448_v9 }
0x134e   : > { %6841 = vmatpush3.bf16.msra.mxu1 %v7449_v56  ;;  %6820 = vmatprep.subr.bf16.mxu0 %v7450_v59 }
0x134f   : > { %6842 = vmatprep.subr.bf16.mxu1 %v7451_v60 }
0x1351   : > { %6821 = vmatpush3.bf16.msra.mxu0 %v7452_v61 }
0x1352   : > { %6843 = vmatpush3.bf16.msra.mxu1 %v7453_v37  ;;  %6822 = vmatprep.subr.bf16.mxu0 %v7454_v62 }
0x1353   : > { %6844 = vmatprep.subr.bf16.mxu1 %v7455_v0 }
0x1355   : > { %6823 = vmatpush3.bf16.msra.mxu0 %v7456_v3 }
0x1356   : > { %6845 = vmatpush3.bf16.msra.mxu1 %v7457_v11  ;;  %6824 = vmatprep.subr.bf16.mxu0 %v7458_v49 }
0x1357   : > { %6846 = vmatprep.subr.bf16.mxu1 %v7459_v10 }
0x1359   : > { %6825 = vmatpush3.bf16.msra.mxu0 %v7460_v39 }
0x135a   : > { %6847 = vmatpush3.bf16.msra.mxu1 %v7461_v34 }
0x135c   : > { %5412 = vmatmul.mubr.bf16.vlgmr.msra.gmra.mxu0 %v4100_v13 }
0x135d   : > { %5453 = vmatmul.mubr.bf16.vlgmr.msra.gmra.mxu1 %v4102_v55 }
0x13bc   : > { %v6694_v57 = vpop.f32.mrf.mxu0  ;;  %v6716_v63 = vpop.f32.mrf.mxu1 }
0x13be   : > { %v6695_v8 = vpop.f32.mrf.mxu0  ;;  %v6717_v35 = vpop.f32.mrf.mxu1 }
0x13bf   : > { %v6696_v20 = vadd.f32 %v6695_v8, %v6694_v57  ;;  %v6718_v27 = vadd.f32 %v6717_v35, %v6716_v63 }
0x13c0   : > { %v6697_v1 = vpop.f32.mrf.mxu0  ;;  %v6719_v14 = vpop.f32.mrf.mxu1 }
0x13c1   : > { %v5168_v24 = vadd.f32 %v6696_v20, %v6352_v21 }
0x13c2   : > { %v6698_v48 = vpop.f32.mrf.mxu0  ;;  %v6720_v46 = vpop.f32.mrf.mxu1 }
0x13c3   : > { %v6699_v25 = vadd.f32 %v6698_v48, %v6697_v1  ;;  %v5209_v30 = vadd.f32 %v6718_v27, %v5168_v24  ;;  %v6721_v6 = vadd.f32 %v6720_v46, %v6719_v14 }
0x13c5   : > { %v5171_v31 = vadd.f32 %v6699_v25, %v6352_v21 }
0x13c7   : > { %v5212_v42 = vadd.f32 %v6721_v6, %v5171_v31 }
0x13dc   : > { %v6738_v15 = vpop.f32.mrf.mxu0  ;;  %v6760_v16 = vpop.f32.mrf.mxu1 }
0x13de   : > { %v6739_v17 = vpop.f32.mrf.mxu0  ;;  %v6761_v58 = vpop.f32.mrf.mxu1 }
0x13df   : > { %v6740_v28 = vadd.f32 %v6739_v17, %v6738_v15  ;;  %v6762_v43 = vadd.f32 %v6761_v58, %v6760_v16 }
0x13e0   : > { %v6741_v18 = vpop.f32.mrf.mxu0  ;;  %v6763_v32 = vpop.f32.mrf.mxu1 }
0x13e1   : > { %v5250_v38 = vadd.f32 %v6740_v28, %v5209_v30  ;;  %v6482_v28 = vld [vmem:[%s7689_s13 + $0x5] ss:$0 sm:$0xff] }
0x13e2   : > { %v6742_v19 = vpop.f32.mrf.mxu0  ;;  %v6764_v23 = vpop.f32.mrf.mxu1 }
0x13e3   : > { %v6743_v41 = vadd.f32 %v6742_v19, %v6741_v18  ;;  %v5291_v9 = vadd.f32 %v6762_v43, %v5250_v38  ;;  %v6765_v59 = vadd.f32 %v6764_v23, %v6763_v32 }
0x13e5   : > { %v5253_v56 = vadd.f32 %v6743_v41, %v5212_v42 }
0x13e7   : > { %v5294_v0 = vadd.f32 %v6765_v59, %v5253_v56 }
0x13fc   : > { %v6782_v22 = vpop.f32.mrf.mxu0 }
0x13fd   : > { %v6804_v26 = vpop.f32.mrf.mxu1 }
0x13fe   : > { %v6783_v47 = vpop.f32.mrf.mxu0 }
0x13ff   : > { %v6805_v33 = vpop.f32.mrf.mxu1  ;;  %v6784_v44 = vadd.f32 %v6783_v47, %v6782_v22  ;;  %v6481_v47 = vld [vmem:[%s7689_s13 + $0x4] ss:$0 sm:$0xff] }
0x1400   : > { %v6785_v36 = vpop.f32.mrf.mxu0  ;;  %v6806_v2 = vadd.f32 %v6805_v33, %v6804_v26 }
0x1401   : > { %v6807_v50 = vpop.f32.mrf.mxu1  ;;  %v5332_v60 = vadd.f32 %v6784_v44, %v5291_v9 }
0x1402   : > { %v6786_v51 = vpop.f32.mrf.mxu0 }
0x1403   : > { %v6787_v61 = vadd.f32 %v6786_v51, %v6785_v36  ;;  %v6808_v37 = vpop.f32.mrf.mxu1  ;;  %v5373_v11 = vadd.f32 %v6806_v2, %v5332_v60 }
0x1404   : > { %v6809_v5 = vadd.f32 %v6808_v37, %v6807_v50 }
0x1405   : > { %v5335_v49 = vadd.f32 %v6787_v61, %v5294_v0 }
0x1407   : > { %v5376_v53 = vadd.f32 %v6809_v5, %v5335_v49 }
0x141c   : > { %v6826_v62 = vpop.f32.mrf.mxu0 }
0x141d   : > { %v6848_v3 = vpop.f32.mrf.mxu1 }
0x141e   : > { %v6827_v4 = vpop.f32.mrf.mxu0 }
0x141f   : > { %v6828_v52 = vadd.f32 %v6827_v4, %v6826_v62  ;;  %v6849_v10 = vpop.f32.mrf.mxu1 }
0x1420   : > { %v6829_v54 = vpop.f32.mrf.mxu0  ;;  %v6850_v29 = vadd.f32 %v6849_v10, %v6848_v3 }
0x1421   : > { %v5414_v39 = vadd.f32 %v6828_v52, %v5373_v11  ;;  %v6851_v34 = vpop.f32.mrf.mxu1 }
0x1422   : > { %v6830_v12 = vpop.f32.mrf.mxu0 }
0x1423   : > { %v5455_v45 = vadd.f32 %v6850_v29, %v5414_v39  ;;  %v6831_v13 = vadd.f32 %v6830_v12, %v6829_v54  ;;  %v6852_v55 = vpop.f32.mrf.mxu1 }
0x1424   : > { %v6853_v63 = vadd.f32 %v6852_v55, %v6851_v34 }
0x1425   : > { %v5417_v57 = vadd.f32 %v6831_v13, %v5376_v53  ;;  %v5461_v8 = vadd.f32 %v5455_v45, %v8048_v7 }
0x1427   : > { %v5458_v35 = vadd.f32 %v6853_v63, %v5417_v57  ;;  %v5465_v1 = vsel %vm993_vm4, %v5461_v8, 0.0 }
0x1428   : > { %5466 = vadd.xlane.f32.xlu0 %v5465_v1 }
0x1429   : > { %v5462_v14 = vadd.f32 %v5458_v35, %v8046_v40 }
0x142b   : > { %v5468_v48 = vsel %vm993_vm4, %v5462_v14, 0.0 }
0x142c   : > { %5469 = vadd.xlane.f32.xlu1 %v5468_v48 }
0x14b1   : > { %v5467_v15 = vpop.xlane.xlu0 %5466 }
0x14b2   : > { %v5471_v46 = vmul.f32 0.015625, %v5467_v15 }
0x14b4   : > { %v5473_v16 = vsub.f32 %v5461_v8, %v5471_v46 }
0x14b5   : > { %v5470_v17 = vpop.xlane.xlu1 %5469 }
0x14b6   : > { %v5472_v58 = vmul.f32 0.015625, %v5470_v17  ;;  %v5475_v18 = vmul.f32 %v5473_v16, %v5473_v16 }
0x14b8   : > { %v5474_v32 = vsub.f32 %v5462_v14, %v5472_v58  ;;  %v5477_v19 = vsel %vm993_vm4, %v5475_v18, 0.0 }
0x14b9   : > { %5478 = vadd.xlane.f32.xlu0 %v5477_v19 }
0x14ba   : > { %v5476_v7 = vmul.f32 %v5474_v32, %v5474_v32 }
0x14bc   : > { %v5480_v20 = vsel %vm993_vm4, %v5476_v7, 0.0 }
0x14bd   : > { %5481 = vadd.xlane.f32.xlu1 %v5480_v20 }
0x1542   : > { %v5479_v40 = vpop.xlane.xlu0 %5478 }
0x1543   : > { %v5483_v21 = vmul.f32 0.015625, %v5479_v40 }
0x1545   : > { %v5485_v22 = vadd.f32 1e-05, %v5483_v21 }
0x1546   : > { %v5482_v23 = vpop.xlane.xlu1 %5481 }
0x1547   : > { %7498 = vrsqrt.f32 %v5485_v22  ;;  %v5484_v24 = vmul.f32 0.015625, %v5482_v23 }
0x1549   : > { %v5486_v25 = vadd.f32 1e-05, %v5484_v24 }
0x154b   : > { %7500 = vrsqrt.f32 %v5486_v25 }
0x1554   : > { %v7499_v26 = vpop.eup %7498 }
0x1555   : > { %v5489_v27 = vmul.f32 %v7499_v26, %v5473_v16 }
0x1557   : > { %v5495_v30 = vmul.f32 %v6481_v47, %v5489_v27 }
0x1558   : > { %v7501_v31 = vpop.eup %7500 }
0x1559   : > { %v5501_v33 = vadd.f32 %v6482_v28, %v5495_v30  ;;  %v5490_v36 = vmul.f32 %v7501_v31, %v5474_v32 }
0x155b   : > { %5503 = vst.msk [vmem:[#allocation2] sm:$0xff] %vm993_vm4, %v5501_v33  ;;  %v5496_v6 = vmul.f32 %v6481_v47, %v5490_v36  ;;  %5508 = sbr.rel (%p6483_p5) target bundleno = 6479 (0x194f), region = 116 }
0x155d   : > { %v5502_v38 = vadd.f32 %v6482_v28, %v5496_v6 }
0x155f   : > { %5504 = vst.msk [vmem:[#allocation2 + $0x8] sm:$0xff] %vm993_vm4, %v5502_v38 }
0x1560   : > { %v5516_v41 = vld [vmem:[%s8546_s3 + $0x38] sm:$0xff]  ;;  %v5515_v42 = vld [vmem:[%s8547_s5 + $0x30] sm:$0xff]  ;;  %7243 = vmatprep.mubr.msk.f32.mxu0 %vm993_vm4, %v5501_v33  ;;  %v5514_v43 = vld [vmem:[%s8547_s5 + $0x28] sm:$0xff]  ;;  %v7541_v26 = vmov 0.0   ;;  %vm7542_vm6 = vmmov 0   ;;  %vm5964_vm7 = vcmask 25600  }
0x1561   : > { %7227 = vmatprep.subr.mxu0 %v5516_v41  ;;  %v5513_v44 = vld [vmem:[%s8547_s5 + $0x20] sm:$0xff]  ;;  %v5512_v50 = vld [vmem:[%s8547_s5 + $0x18] sm:$0xff]  ;;  %v5511_v51 = vld [vmem:[%s8547_s5 + $0x10] sm:$0xff] }
0x1562   : > { %7228 = vmatpush3.msra.mxu0 %v5516_v41  ;;  %v5510_v9 = vld [vmem:[%s8547_s5 + $0x8] sm:$0xff]  ;;  %v5509_v56 = vld [vmem:[%s8547_s5] sm:$0xff]  ;;  %v5614_v59 = vld [vmem:[%s8503_s7 + $0x38] sm:$0xff] }
0x1563   : > { %7229 = vmatprep.subr.mxu0 %v5515_v42  ;;  %v5613_v60 = vld [vmem:[%s8503_s7 + $0x30] sm:$0xff]  ;;  %v5612_v61 = vld [vmem:[%s8503_s7 + $0x28] sm:$0xff]  ;;  %v5611_v37 = vld [vmem:[%s8503_s7 + $0x20] sm:$0xff] }
0x1564   : > { %7230 = vmatpush3.msra.mxu0 %v5515_v42  ;;  %v5610_v62 = vld [vmem:[%s8503_s7 + $0x18] sm:$0xff]  ;;  %v5609_v0 = vld [vmem:[%s8503_s7 + $0x10] sm:$0xff]  ;;  %v5608_v2 = vld [vmem:[%s8503_s7 + $0x8] sm:$0xff] }
0x1565   : > { %7231 = vmatprep.subr.mxu0 %v5514_v43  ;;  %v5607_v3 = vld [vmem:[%s8503_s7] sm:$0xff]  ;;  %v5706_v39 = vld [vmem:[%s8507_s11 + $0x8] sm:$0xff]  ;;  %v5807_v34 = vld [vmem:[%s8505_s9 + $0x78] sm:$0xff] }
0x1566   : > { %7232 = vmatpush3.msra.mxu0 %v5514_v43  ;;  %v6484_v4 = vld [vmem:[%s8548_s25] ss:$0 sm:$0xff]  ;;  %7265 = vmatprep.subr.mxu1 %v5706_v39  ;;  %v5806_v8 = vld [vmem:[%s8505_s9 + $0x70] sm:$0xff]  ;;  %v5805_v35 = vld [vmem:[%s8505_s9 + $0x68] sm:$0xff] }
0x1567   : > { %7233 = vmatprep.subr.mxu0 %v5513_v44  ;;  %v5705_v29 = vld [vmem:[%s8507_s11] sm:$0xff]  ;;  %7266 = vmatpush3.msra.mxu1 %v5706_v39  ;;  %v5803_v14 = vld [vmem:[%s8505_s9 + $0x58] sm:$0xff]  ;;  %v5802_v48 = vld [vmem:[%s8505_s9 + $0x50] sm:$0xff] }
0x1568   : > { %7234 = vmatpush3.msra.mxu0 %v5513_v44  ;;  %7267 = vmatprep.subr.mxu1 %v5705_v29  ;;  %v6487_v12 = vld [vmem:[%s8504_s8] ss:$0 sm:$0xff]  ;;  %v5801_v15 = vld [vmem:[%s8505_s9 + $0x48] sm:$0xff]  ;;  %v5799_v16 = vld [vmem:[%s8505_s9 + $0x38] sm:$0xff] }
0x1569   : > { %7235 = vmatprep.subr.mxu0 %v5512_v50  ;;  %7268 = vmatpush3.msra.mxu1 %v5705_v29  ;;  %v5804_v1 = vld [vmem:[%s8505_s9 + $0x60] sm:$0xff]  ;;  %v5798_v17 = vld [vmem:[%s8505_s9 + $0x30] sm:$0xff]  ;;  %v5797_v58 = vld [vmem:[%s8505_s9 + $0x28] sm:$0xff] }
0x156a   : > { %7236 = vmatpush3.msra.mxu0 %v5512_v50  ;;  %7272 = vmatprep.subr.mxu1 %v5807_v34  ;;  %v5800_v46 = vld [vmem:[%s8505_s9 + $0x40] sm:$0xff]  ;;  %v5795_v32 = vld [vmem:[%s8505_s9 + $0x18] sm:$0xff]  ;;  %v5794_v19 = vld [vmem:[%s8505_s9 + $0x10] sm:$0xff] }
0x156b   : > { %7237 = vmatprep.subr.mxu0 %v5511_v51  ;;  %v5796_v18 = vld [vmem:[%s8505_s9 + $0x20] sm:$0xff]  ;;  %v5793_v7 = vld [vmem:[%s8505_s9 + $0x8] sm:$0xff] }
0x156c   : > { %7238 = vmatpush3.msra.mxu0 %v5511_v51  ;;  %v5792_v20 = vld [vmem:[%s8505_s9] sm:$0xff]  ;;  %v5789_v22 = vld [vmem:[%s8549_s22 + $0x8] sm:$0xff] }
0x156d   : > { %7239 = vmatprep.subr.mxu0 %v5510_v9  ;;  %v5788_v21 = vld [vmem:[%s8549_s22] sm:$0xff] }
0x156e   : > { %7240 = vmatpush3.msra.mxu0 %v5510_v9  ;;  %v5883_v27 = vld [vmem:[%s8550_s17] sm:$0x3] }
0x156f   : > { %7241 = vmatprep.subr.mxu0 %v5509_v56  ;;  %v6492_v30 = vld [vmem:[%s8551_s6] ss:$0 sm:$0xff] }
0x1570   : > { %7242 = vmatpush3.msra.mxu0 %v5509_v56 }
0x1571   : > { %7244 = vmatmul.mubr.msk.f32.vlgmr.msra.gmra.mxu0 %vm993_vm4, %v5502_v38  ;;  %7246 = vmatprep.subr.mxu0 %v5614_v59 }
0x1572   : > { %7247 = vmatpush3.msra.mxu0 %v5614_v59 }
0x1573   : > { %7248 = vmatprep.subr.mxu0 %v5613_v60 }
0x1574   : > { %7249 = vmatpush3.msra.mxu0 %v5613_v60 }
0x1575   : > { %7250 = vmatprep.subr.mxu0 %v5612_v61 }
0x1576   : > { %7251 = vmatpush3.msra.mxu0 %v5612_v61 }
0x1577   : > { %7252 = vmatprep.subr.mxu0 %v5611_v37 }
0x1578   : > { %7253 = vmatpush3.msra.mxu0 %v5611_v37 }
0x1579   : > { %7254 = vmatprep.subr.mxu0 %v5610_v62 }
0x157a   : > { %7255 = vmatpush3.msra.mxu0 %v5610_v62 }
0x157b   : > { %7256 = vmatprep.subr.mxu0 %v5609_v0 }
0x157c   : > { %7257 = vmatpush3.msra.mxu0 %v5609_v0 }
0x157d   : > { %7258 = vmatprep.subr.mxu0 %v5608_v2 }
0x157e   : > { %7259 = vmatpush3.msra.mxu0 %v5608_v2 }
0x157f   : > { %7260 = vmatprep.subr.mxu0 %v5607_v3 }
0x1580   : > { %7261 = vmatpush3.msra.mxu0 %v5607_v3 }
0x1581   : > { %7307 = vmatprep.subr.mxu0 %v7541_v26 }
0x1631   : > { %v7245_v11 = vpop.f32.mrf.mxu0 }
0x1632   : > { %v5602_v49 = vadd.f32 %v7245_v11, %v6484_v4 }
0x1633   : > { %v5596_v52 = vpop.f32.mrf.mxu0 }
0x1634   : > { %v5597_v10 = vadd.f32 %v6484_v4, %v5596_v52  ;;  %v5606_v5 = vmax.f32 %v5602_v49, 0.0 }
0x1636   : > { %v5605_v54 = vmax.f32 %v5597_v10, 0.0 }
0x1638   : > { %7262 = vmatprep.mubr.msk.f32.mxu0 %vm993_vm4, %v5605_v54 }
0x1639   : > { %7263 = vmatmul.mubr.msk.f32.vlgmr.msra.gmra.mxu0 %vm993_vm4, %v5606_v5 }
0x163a   : > { %7311 = vmatprep.mubr.msk.f32.mxu0 %vm7542_vm6, %v7541_v26 }
0x16f9   : > { %v7264_v53 = vpop.f32.mrf.mxu0 }
0x16fa   : > { %v5700_v45 = vadd.f32 %v7264_v53, %v6487_v12 }
0x16fb   : > { %v5694_v13 = vpop.f32.mrf.mxu0 }
0x16fc   : > { %v5695_v55 = vadd.f32 %v6487_v12, %v5694_v13  ;;  %v5704_v63 = vmax.f32 %v5700_v45, 0.0 }
0x16fe   : > { %v5703_v57 = vmax.f32 %v5695_v55, 0.0 }
0x1700   : > { %7269 = vmatprep.mubr.msk.f32.mxu1 %vm1261_vm5, %v5703_v57 }
0x1701   : > { %7270 = vmatmul.mubr.msk.f32.vlgmr.msra.gmra.mxu1 %vm1261_vm5, %v5704_v63 }
0x1702   : > { %7273 = vmatpush3.msra.mxu1 %v5807_v34 }
0x1703   : > { %7274 = vmatprep.subr.mxu1 %v5806_v8 }
0x1704   : > { %7275 = vmatpush3.msra.mxu1 %v5806_v8 }
0x1705   : > { %7276 = vmatprep.subr.mxu1 %v5805_v35 }
0x1706   : > { %7277 = vmatpush3.msra.mxu1 %v5805_v35 }
0x1707   : > { %7278 = vmatprep.subr.mxu1 %v5804_v1 }
0x1708   : > { %7279 = vmatpush3.msra.mxu1 %v5804_v1 }
0x1709   : > { %7280 = vmatprep.subr.mxu1 %v5803_v14 }
0x170a   : > { %7281 = vmatpush3.msra.mxu1 %v5803_v14 }
0x170b   : > { %7282 = vmatprep.subr.mxu1 %v5802_v48 }
0x170c   : > { %7283 = vmatpush3.msra.mxu1 %v5802_v48 }
0x170d   : > { %7284 = vmatprep.subr.mxu1 %v5801_v15 }
0x170e   : > { %7285 = vmatpush3.msra.mxu1 %v5801_v15 }
0x170f   : > { %7286 = vmatprep.subr.mxu1 %v5800_v46 }
0x1710   : > { %7287 = vmatpush3.msra.mxu1 %v5800_v46 }
0x1711   : > { %7288 = vmatprep.subr.mxu1 %v5799_v16 }
0x1712   : > { %7289 = vmatpush3.msra.mxu1 %v5799_v16 }
0x1713   : > { %7290 = vmatprep.subr.mxu1 %v5798_v17 }
0x1714   : > { %7291 = vmatpush3.msra.mxu1 %v5798_v17 }
0x1715   : > { %7292 = vmatprep.subr.mxu1 %v5797_v58 }
0x1716   : > { %7293 = vmatpush3.msra.mxu1 %v5797_v58 }
0x1717   : > { %7294 = vmatprep.subr.mxu1 %v5796_v18 }
0x1718   : > { %7295 = vmatpush3.msra.mxu1 %v5796_v18 }
0x1719   : > { %7296 = vmatprep.subr.mxu1 %v5795_v32 }
0x171a   : > { %7297 = vmatpush3.msra.mxu1 %v5795_v32 }
0x171b   : > { %7298 = vmatprep.subr.mxu1 %v5794_v19 }
0x171c   : > { %7299 = vmatpush3.msra.mxu1 %v5794_v19 }
0x171d   : > { %7300 = vmatprep.subr.mxu1 %v5793_v7 }
0x171e   : > { %7301 = vmatpush3.msra.mxu1 %v5793_v7 }
0x171f   : > { %7302 = vmatprep.subr.mxu1 %v5792_v20 }
0x1720   : > { %7303 = vmatpush3.msra.mxu1 %v5792_v20 }
0x17c1   : > { %v7271_v40 = vpop.f32.mrf.mxu1 }
0x17c2   : > { %v5791_v25 = vmul.f32 %v7271_v40, %v5789_v22 }
0x17c3   : > { %v5779_v23 = vpop.f32.mrf.mxu1 }
0x17c4   : > { %v5790_v24 = vmul.f32 %v5788_v21, %v5779_v23 }
0x17c6   : > { %7304 = vmatprep.mubr.f32.mxu1 %v5790_v24 }
0x17c7   : > { %7305 = vmatmul.mubr.f32.vlgmr.msra.gmra.mxu1 %v5791_v25 }
0x1887   : > { %v7306_v47 = vpop.f32.mrf.mxu1 }
0x1888   : > { %7308 = vmatpush3.msra.mxu0 %v7306_v47 }
0x1889   : > { %v5874_v28 = vpop.f32.mrf.mxu1  ;;  %7309 = vmatprep.subr.mxu0 %v7541_v26 }
0x188a   : > { %7310 = vmatpush3.msra.mxu0 %v5874_v28 }
0x188b   : > { %7312 = vmatmul.mubr.msk.f32.vlgmr.msra.gmra.mxu0 %vm1261_vm5, %v5883_v27 }
0x194b   : > { %v5960_v31 = vpop.f32.mrf.mxu0 }
0x194c   : > { %v5961_v33 = vadd.f32 %v6492_v30, %v5960_v31 }
0x194d   : > { %v7313_v36 = vpop.f32.mrf.mxu0 }
0x194e   : > { %5965 = vst.msk [vmem:[#allocation3] sm:$0x3] %vm5964_vm7, %v5961_v33 }
0x194f PF: > { %p7320_p6 = scmp.eq.s32.totalorder %s7665_s28, 1  ;;  %s7543_s13 = smov [#allocation3]  }
0x1950   : > { %s5973_s23 = sshll.u32 %s7543_s13, 4  ;;  %s5974_s23 = int_to_ptr.vmem [resolvable:$true] %s5973_s23 }
0x1951   : > { %s7504_s29 = scalar_lea.vmem %s5974_s23, 32  ;;  %p7511_p10 = scmp.lt.s32.totalorder %s5974_s23, %s5974_s23 }
0x1952   : > { %p7505_p7 = scmp.ne.s32.totalorder %s5974_s23, %s7504_s29  ;;  %p7512_p11 = scmp.lt.s32.totalorder %s7504_s29, %s7504_s29 }
0x1954   : > { %p7506_p8 = pnand %p7505_p7, %p7320_p6  ;;  %p7513_p12 = por %p7512_p11, %p7511_p10 }
0x1956   : > { %p7507_p9 = pneg %p7506_p8 }
0x1958   : > { %p7514_p13 = pnand %p7513_p12, %p7507_p9 }
0x195a   : > { %7517 = shalt.err (!%p7514_p13)
}
0x195b   : > { %s8552_s27 = sld [smem:[#allocation19_spill]] }
0x1961   : > { %7317 = dma.vmem_to_hbm [thread:$0]  (%p7320_p6), %s5974_s23, 32, %s8552_s27, [#allocation4]  }
0x1962   : > { %7533 = dma.done.wait (%p7320_p6), [#allocation4], 32  }
0x1963   : > { %7535 = vsyncadd (%p7320_p6), [#allocation4], 4294967264 }
0x1964 PF: > { %s8553_s10 = sld [smem:[#allocation6_spill]] }
0x196a   : > { %s33_s3 = sadd.s32 1, %s8553_s10  }
0x196b   : > { %p30_p0 = scmp.ge.s32.totalorder %s33_s3, 4  }
0x196d   :  { %32 = sbr.rel (!%p30_p0) target bundleno = 15 (0xf), region = 186 }
0x1972   :  { %5986 = vsyncpa [#allocation4], 1 }
0x1973   :  { %5988 = vsyncpa [#allocation4 + $0x1], 1 }

</bundles_post_ra>
